<compile_context>
chip_gen: v7x
topology: tpu7x:2x2x1
jax: 0.10.0
libtpu: 0.0.40
codegen_flags: <defaults>
</compile_context>

<pallas_src>
import jax
import jax.numpy as jnp
import numpy as np
from jax.experimental import pallas as pl
from jax.experimental.pallas import tpu as pltpu


def _lrelu(v):
    # LeakyReLU(negative_slope=0.2)
    return jnp.where(v >= 0, v, 0.2 * v)


def _discriminator_kernel(x_ref, z_ref, b_ref,
                          xw1_ref, xw2_ref, zw1_ref, zw2_ref,
                          jw1_hbm, jw2_hbm, jw3_ref,
                          out_ref,
                          jw1_vmem, jw2_vmem, dma_sem):
    """Fused forward pass.

    x_ref   : (M, B, Dx) bf16   stacked flattened modality inputs
    z_ref   : (B, Dz)    bf16   latent input
    b_ref   : (2M+5, hj) f32    packed biases, one per row
                                [xb1_0..xb1_{M-1}, xb2_0..xb2_{M-1},
                                 zb1, zb2, jb1, jb2, jb3]
    xw*/zw* : bf16 per-modality / z weights, (in, out) layout (VMEM resident)
    jw1_hbm : (M+1, h2, hj) bf16 in HBM (pl.ANY)  -> streamed into jw1_vmem
    jw2_hbm : (hj, hj)      bf16 in HBM (pl.ANY)  -> streamed into jw2_vmem
    jw3_ref : (output_dim, hj) bf16, lane-dense final weight
    """
    n_mod = x_ref.shape[0]
    h1 = xw1_ref.shape[2]
    h2 = xw2_ref.shape[2]
    hj = jw3_ref.shape[1]
    out_dim = jw3_ref.shape[0]
    bf16 = jnp.bfloat16

    # Kick off the dominant joint-layer weight streams first; they overlap
    # with the cheap per-modality / z compute below.
    cp_jw1 = pltpu.make_async_copy(jw1_hbm, jw1_vmem, dma_sem.at[0])
    cp_jw2 = pltpu.make_async_copy(jw2_hbm, jw2_vmem, dma_sem.at[1])
    cp_jw1.start()
    cp_jw2.start()

    def bias(row, width):
        # Static slice of the packed bias array -> (1, width), broadcasts
        # against (B, width).
        return b_ref[row:row + 1, 0:width]

    def two_layer(inp, w1, b1, w2, b2):
        h = _lrelu(jnp.dot(inp, w1, preferred_element_type=jnp.float32) + b1)
        h = _lrelu(jnp.dot(h.astype(bf16), w2,
                           preferred_element_type=jnp.float32) + b2)
        return h.astype(bf16)

    # Per-modality x-discriminators: Linear->LReLU->Linear->LReLU
    feats = []
    for m in range(n_mod):
        feats.append(two_layer(x_ref[m], xw1_ref[m],
                               bias(m, h1),
                               xw2_ref[m], bias(n_mod + m, h2)))
    # z-discriminator
    feats.append(two_layer(z_ref[...], zw1_ref[...], bias(2 * n_mod, h1),
                           zw2_ref[...], bias(2 * n_mod + 1, h2)))

    # Joint layer 1: accumulate per-feature row blocks (no concat buffer).
    cp_jw1.wait()
    acc = jnp.dot(feats[0], jw1_vmem[0], preferred_element_type=jnp.float32)
    for m in range(1, n_mod + 1):
        acc = acc + jnp.dot(feats[m], jw1_vmem[m],
                            preferred_element_type=jnp.float32)
    h = _lrelu(acc + bias(2 * n_mod + 2, hj))

    # Joint layer 2
    cp_jw2.wait()
    h = _lrelu(jnp.dot(h.astype(bf16), jw2_vmem[...],
                       preferred_element_type=jnp.float32)
               + bias(2 * n_mod + 3, hj))

    # Final layer: jw3 is lane-dense (output_dim, hj).
    jb3 = bias(2 * n_mod + 4, out_dim)
    if out_dim == 1:
        # VPU multiply + XLU lane reduce; h stays f32 (no bf16 round-trip),
        # only the (tiny) weight is the bf16-rounded value.
        w3 = jw3_ref[...].astype(jnp.float32)            # (1, hj)
        out_ref[...] = jnp.sum(h * w3, axis=1, keepdims=True) + jb3
    else:
        out_ref[...] = jax.lax.dot_general(
            h.astype(bf16), jw3_ref[...],
            dimension_numbers=(((1,), (1,)), ((), ())),
            preferred_element_type=jnp.float32) + jb3


def init_params(key, n_modalities, img_dim, latent_dim, output_dim,
                h1=400, h2=256, hj=1024):
    """Deterministic synthetic f32 parameters. Weights stored as (in, out)."""
    ks = jax.random.split(key, 14)
    s = 0.02

    def w(k, shape):
        return (s * jax.random.normal(k, shape)).astype(jnp.float32)

    return dict(
        xw1=w(ks[0], (n_modalities, img_dim, h1)),
        xb1=w(ks[1], (n_modalities, 1, h1)),
        xw2=w(ks[2], (n_modalities, h1, h2)),
        xb2=w(ks[3], (n_modalities, 1, h2)),
        zw1=w(ks[4], (latent_dim, h1)),
        zb1=w(ks[5], (1, h1)),
        zw2=w(ks[6], (h1, h2)),
        zb2=w(ks[7], (1, h2)),
        jw1=w(ks[8], (h2 * (n_modalities + 1), hj)),
        jb1=w(ks[9], (1, hj)),
        jw2=w(ks[10], (hj, hj)),
        jb2=w(ks[11], (1, hj)),
        jw3=w(ks[12], (hj, output_dim)),
        jb3=w(ks[13], (1, output_dim)),
    )


def preprocess_params(params):
    """One-time (hoisted) weight preprocessing:
       - cast weight matrices to bf16 (no h1 padding: full-array specs)
       - reshape jw1 into per-feature row blocks (M+1, h2, hj)
       - store jw3 lane-dense as (output_dim, hj)
       - pack the 7 small biases into one (2M+5, hj) f32 array."""
    bf16 = jnp.bfloat16
    n_mod = params["xw1"].shape[0]
    h2 = params["xw2"].shape[2]
    hj = params["jw1"].shape[1]

    def row(v):
        v = v.reshape(-1).astype(jnp.float32)
        return jnp.pad(v, (0, hj - v.shape[0]))

    bias_rows = ([row(params["xb1"][m]) for m in range(n_mod)] +
                 [row(params["xb2"][m]) for m in range(n_mod)] +
                 [row(params["zb1"]), row(params["zb2"]),
                  row(params["jb1"]), row(params["jb2"]), row(params["jb3"])])
    biases = jnp.stack(bias_rows, axis=0)           # (2M+5, hj) f32

    return dict(
        xw1=params["xw1"].astype(bf16),
        xw2=params["xw2"].astype(bf16),
        zw1=params["zw1"].astype(bf16),
        zw2=params["zw2"].astype(bf16),
        jw1=params["jw1"].reshape(n_mod + 1, h2, hj).astype(bf16),
        jw2=params["jw2"].astype(bf16),
        jw3=params["jw3"].T.astype(bf16),           # (output_dim, hj)
        biases=biases,
    )


def multi_xz_discriminator(xs, z, pparams):
    """xs: list of (B, C, H, W) arrays (one per modality), z: (B, latent_dim).
    `pparams` must come from `preprocess_params` (called once, hoisted out of
    the per-call path)."""
    batch = xs[0].shape[0]
    # Flatten(start_dim=1) on NCHW, stack over modalities -> (M, B, D), bf16.
    x_flat = jnp.stack([x.reshape(batch, -1) for x in xs],
                       axis=0).astype(jnp.bfloat16)
    z_bf = z.astype(jnp.bfloat16)

    jw1, jw2, jw3 = pparams["jw1"], pparams["jw2"], pparams["jw3"]
    output_dim = jw3.shape[0]

    vmem = pl.BlockSpec(memory_space=pltpu.MemorySpace.VMEM)
    hbm = pl.BlockSpec(memory_space=pl.ANY)   # raw HBM ref, manual DMA inside

    args = [x_flat, z_bf, pparams["biases"],
            pparams["xw1"], pparams["xw2"], pparams["zw1"], pparams["zw2"],
            jw1, jw2, jw3]
    in_specs = [vmem, vmem, vmem,
                vmem, vmem, vmem, vmem,
                hbm, hbm, vmem]

    out = pl.pallas_call(
        _discriminator_kernel,
        out_shape=jax.ShapeDtypeStruct((batch, output_dim), jnp.float32),
        in_specs=in_specs,
        out_specs=vmem,
        scratch_shapes=[
            pltpu.VMEM(jw1.shape, jw1.dtype),    # jw1 landing buffer
            pltpu.VMEM(jw2.shape, jw2.dtype),    # jw2 landing buffer
            pltpu.SemaphoreType.DMA((2,)),
        ],
        # bf16 resident footprint is ~5 MiB; 32 MiB is safe on v5e/v6e/v7x
        # (v7x has 64 MiB physical VMEM per TensorCore).
        compiler_params=pltpu.CompilerParams(vmem_limit_bytes=32 << 20),
    )(*args)
    return out


def _reference_forward_bf16(xs, z, params):
    """Pure-JAX reference mirroring the kernel's bf16-weight / f32-accum
    arithmetic layer by layer (structural regression check)."""
    bf16 = jnp.bfloat16

    def lrelu(v):
        return jnp.where(v >= 0, v, 0.2 * v)

    def dot(a, w):
        return jnp.dot(a.astype(bf16), w.astype(bf16),
                       preferred_element_type=jnp.float32)

    batch = xs[0].shape[0]
    feats = []
    for m, x in enumerate(xs):
        xf = x.reshape(batch, -1)
        h = lrelu(dot(xf, params["xw1"][m]) + params["xb1"][m])
        h = lrelu(dot(h, params["xw2"][m]) + params["xb2"][m])
        feats.append(h)
    hz = lrelu(dot(z, params["zw1"]) + params["zb1"])
    hz = lrelu(dot(hz, params["zw2"]) + params["zb2"])
    hcat = jnp.concatenate(feats + [hz], axis=1)
    h = lrelu(dot(hcat, params["jw1"]) + params["jb1"])
    h = lrelu(dot(h, params["jw2"]) + params["jb2"])
    # Final layer mirrors the kernel: h stays f32, only w3 is bf16-rounded.
    w3 = params["jw3"].astype(bf16).astype(jnp.float32)
    return (jnp.dot(h, w3, precision=jax.lax.Precision.HIGHEST)
            + params["jb3"])


def _reference_forward_f32(xs, z, params):
    """True f32 PyTorch-semantics reference (spectral_norm omitted)."""
    def lrelu(v):
        return jnp.where(v >= 0, v, 0.2 * v)

    def dot(a, w):
        return jnp.dot(a, w, precision=jax.lax.Precision.HIGHEST)

    batch = xs[0].shape[0]
    feats = []
    for m, x in enumerate(xs):
        xf = x.reshape(batch, -1)
        h = lrelu(dot(xf, params["xw1"][m]) + params["xb1"][m])
        h = lrelu(dot(h, params["xw2"][m]) + params["xb2"][m])
        feats.append(h)
    hz = lrelu(dot(z, params["zw1"]) + params["zb1"])
    hz = lrelu(dot(hz, params["zw2"]) + params["zb2"])
    hcat = jnp.concatenate(feats + [hz], axis=1)
    h = lrelu(dot(hcat, params["jw1"]) + params["jb1"])
    h = lrelu(dot(h, params["jw2"]) + params["jb2"])
    return dot(h, params["jw3"]) + params["jb3"]


if __name__ == "__main__":
    # Small shapes consistent with the module's forward:
    #   n_modalities image inputs (B, C, H, W) + one latent input (B, latent_dim)
    n_modalities = 2
    batch = 2
    img_shape = (1, 16, 16)          # flattened -> 256 features per modality
    latent_dim = 8
    output_dim = 1

    key = jax.random.PRNGKey(0)
    kx0, kx1, kz, kp = jax.random.split(key, 4)
    x0 = jax.random.normal(kx0, (batch,) + img_shape, dtype=jnp.float32)
    x1 = jax.random.normal(kx1, (batch,) + img_shape, dtype=jnp.float32)
    z = jax.random.normal(kz, (batch, latent_dim), dtype=jnp.float32)

    params = init_params(kp, n_modalities, int(np.prod(img_shape)),
                         latent_dim, output_dim)
    # One-time cast / reshape / bias packing, hoisted out of the per-call path.
    pparams = preprocess_params(params)

    out = jax.block_until_ready(multi_xz_discriminator([x0, x1], z, pparams))
    assert out.shape == (batch, output_dim), out.shape

    # Tight structural check against the bf16-mirroring reference.
    ref_bf16 = jax.block_until_ready(
        _reference_forward_bf16([x0, x1], z, params))
    np.testing.assert_allclose(np.asarray(out), np.asarray(ref_bf16),
                               rtol=2e-2, atol=2e-4)

    # Loose sanity check against true f32 PyTorch semantics (bf16 weight
    # quantization is the only source of deviation).
    ref_f32 = jax.block_until_ready(
        _reference_forward_f32([x0, x1], z, params))
    np.testing.assert_allclose(np.asarray(out), np.asarray(ref_f32),
                               rtol=1e-1, atol=1e-2)

    print("KERNEL_OK")
</pallas_src>

<mosaic_0001>
module attributes {stable_mosaic.version = 11 : i64} {
  func.func @_discriminator_kernel(%arg0: memref<2x2x256xbf16, #tpu.memory_space<vmem>>, %arg1: memref<2x8xbf16, #tpu.memory_space<vmem>>, %arg2: memref<9x1024xf32, #tpu.memory_space<vmem>>, %arg3: memref<2x256x400xbf16, #tpu.memory_space<vmem>>, %arg4: memref<2x400x256xbf16, #tpu.memory_space<vmem>>, %arg5: memref<8x400xbf16, #tpu.memory_space<vmem>>, %arg6: memref<400x256xbf16, #tpu.memory_space<vmem>>, %arg7: memref<3x256x1024xbf16, #tpu.memory_space<any>>, %arg8: memref<1024x1024xbf16, #tpu.memory_space<any>>, %arg9: memref<1x1024xbf16, #tpu.memory_space<vmem>>, %arg10: memref<2x1xf32, #tpu.memory_space<vmem>>, %arg11: memref<3x256x1024xbf16, #tpu.memory_space<vmem>>, %arg12: memref<1024x1024xbf16, #tpu.memory_space<vmem>>, %arg13: memref<2x!tpu.dma_semaphore, #tpu.memory_space<semaphore_mem>>) attributes {dimension_semantics = [], scalar_prefetch = 0 : i64, scratch_operands = 3 : i64, tpu.core_type = #tpu.core_type<tc>} {
    %c0_i32 = arith.constant 0 : i32
    %0 = tpu.memref_slice %arg13[%c0_i32] : memref<2x!tpu.dma_semaphore, #tpu.memory_space<semaphore_mem>> -> memref<1x!tpu.dma_semaphore, #tpu.memory_space<semaphore_mem>>
    %1 = tpu.memref_squeeze %0 : memref<1x!tpu.dma_semaphore, #tpu.memory_space<semaphore_mem>> -> memref<!tpu.dma_semaphore, #tpu.memory_space<semaphore_mem>>
    tpu.enqueue_dma source(%arg7 : memref<3x256x1024xbf16, #tpu.memory_space<any>>) target(%arg11 : memref<3x256x1024xbf16, #tpu.memory_space<vmem>>) target_semaphore(%1 : memref<!tpu.dma_semaphore, #tpu.memory_space<semaphore_mem>>)
    %c1_i32 = arith.constant 1 : i32
    %2 = tpu.memref_slice %arg13[%c1_i32] : memref<2x!tpu.dma_semaphore, #tpu.memory_space<semaphore_mem>> -> memref<1x!tpu.dma_semaphore, #tpu.memory_space<semaphore_mem>>
    %3 = tpu.memref_squeeze %2 : memref<1x!tpu.dma_semaphore, #tpu.memory_space<semaphore_mem>> -> memref<!tpu.dma_semaphore, #tpu.memory_space<semaphore_mem>>
    tpu.enqueue_dma source(%arg8 : memref<1024x1024xbf16, #tpu.memory_space<any>>) target(%arg12 : memref<1024x1024xbf16, #tpu.memory_space<vmem>>) target_semaphore(%3 : memref<!tpu.dma_semaphore, #tpu.memory_space<semaphore_mem>>)
    %c0 = arith.constant 0 : index
    %c0_0 = arith.constant 0 : index
    %c0_1 = arith.constant 0 : index
    %4 = vector.load %arg0[%c0, %c0_0, %c0_1] : memref<2x2x256xbf16, #tpu.memory_space<vmem>>, vector<1x2x256xbf16>
    %5 = vector.shape_cast %4 : vector<1x2x256xbf16> to vector<2x256xbf16>
    %c0_2 = arith.constant 0 : index
    %c0_3 = arith.constant 0 : index
    %c0_4 = arith.constant 0 : index
    %6 = vector.load %arg3[%c0_2, %c0_3, %c0_4] : memref<2x256x400xbf16, #tpu.memory_space<vmem>>, vector<1x256x400xbf16>
    %7 = vector.shape_cast %6 : vector<1x256x400xbf16> to vector<256x400xbf16>
    %c0_5 = arith.constant 0 : index
    %c0_6 = arith.constant 0 : index
    %8 = vector.load %arg2[%c0_5, %c0_6] : memref<9x1024xf32, #tpu.memory_space<vmem>>, vector<1x400xf32>
    %c0_7 = arith.constant 0 : index
    %c0_8 = arith.constant 0 : index
    %c0_9 = arith.constant 0 : index
    %9 = vector.load %arg4[%c0_7, %c0_8, %c0_9] : memref<2x400x256xbf16, #tpu.memory_space<vmem>>, vector<1x400x256xbf16>
    %10 = vector.shape_cast %9 : vector<1x400x256xbf16> to vector<400x256xbf16>
    %c2 = arith.constant 2 : index
    %c0_10 = arith.constant 0 : index
    %11 = vector.load %arg2[%c2, %c0_10] : memref<9x1024xf32, #tpu.memory_space<vmem>>, vector<1x256xf32>
    %cst = arith.constant dense<0.000000e+00> : vector<2x400xf32>
    %12 = tpu.matmul %5, %7, %cst {dimension_numbers = #tpu.dot_dimension_numbers<[1], [0], [0], [1], [0, 0, 1, 1], [], []>} : vector<2x256xbf16>, vector<256x400xbf16>, vector<2x400xf32> -> vector<2x400xf32>
    %13 = vector.broadcast %8 : vector<1x400xf32> to vector<2x400xf32>
    %14 = arith.addf %12, %13 : vector<2x400xf32>
    %cst_11 = arith.constant 0.000000e+00 : f32
    %15 = vector.broadcast %cst_11 : f32 to vector<2x400xf32>
    %16 = arith.cmpf oge, %14, %15 : vector<2x400xf32>
    %cst_12 = arith.constant 2.000000e-01 : f32
    %17 = vector.broadcast %cst_12 : f32 to vector<2x400xf32>
    %18 = arith.mulf %17, %14 : vector<2x400xf32>
    %19 = arith.select %16, %14, %18 : vector<2x400xi1>, vector<2x400xf32>
    %20 = arith.truncf %19 : vector<2x400xf32> to vector<2x400xbf16>
    %cst_13 = arith.constant dense<0.000000e+00> : vector<2x256xf32>
    %21 = tpu.matmul %20, %10, %cst_13 {dimension_numbers = #tpu.dot_dimension_numbers<[1], [0], [0], [1], [0, 0, 1, 1], [], []>} : vector<2x400xbf16>, vector<400x256xbf16>, vector<2x256xf32> -> vector<2x256xf32>
    %22 = vector.broadcast %11 : vector<1x256xf32> to vector<2x256xf32>
    %23 = arith.addf %21, %22 : vector<2x256xf32>
    %cst_14 = arith.constant 0.000000e+00 : f32
    %24 = vector.broadcast %cst_14 : f32 to vector<2x256xf32>
    %25 = arith.cmpf oge, %23, %24 : vector<2x256xf32>
    %cst_15 = arith.constant 2.000000e-01 : f32
    %26 = vector.broadcast %cst_15 : f32 to vector<2x256xf32>
    %27 = arith.mulf %26, %23 : vector<2x256xf32>
    %28 = arith.select %25, %23, %27 : vector<2x256xi1>, vector<2x256xf32>
    %29 = arith.truncf %28 : vector<2x256xf32> to vector<2x256xbf16>
    %c1 = arith.constant 1 : index
    %c0_16 = arith.constant 0 : index
    %c0_17 = arith.constant 0 : index
    %30 = vector.load %arg0[%c1, %c0_16, %c0_17] : memref<2x2x256xbf16, #tpu.memory_space<vmem>>, vector<1x2x256xbf16>
    %31 = vector.shape_cast %30 : vector<1x2x256xbf16> to vector<2x256xbf16>
    %c1_18 = arith.constant 1 : index
    %c0_19 = arith.constant 0 : index
    %c0_20 = arith.constant 0 : index
    %32 = vector.load %arg3[%c1_18, %c0_19, %c0_20] : memref<2x256x400xbf16, #tpu.memory_space<vmem>>, vector<1x256x400xbf16>
    %33 = vector.shape_cast %32 : vector<1x256x400xbf16> to vector<256x400xbf16>
    %c1_21 = arith.constant 1 : index
    %c0_22 = arith.constant 0 : index
    %34 = vector.load %arg2[%c1_21, %c0_22] : memref<9x1024xf32, #tpu.memory_space<vmem>>, vector<1x400xf32>
    %c1_23 = arith.constant 1 : index
    %c0_24 = arith.constant 0 : index
    %c0_25 = arith.constant 0 : index
    %35 = vector.load %arg4[%c1_23, %c0_24, %c0_25] : memref<2x400x256xbf16, #tpu.memory_space<vmem>>, vector<1x400x256xbf16>
    %36 = vector.shape_cast %35 : vector<1x400x256xbf16> to vector<400x256xbf16>
    %c3 = arith.constant 3 : index
    %c0_26 = arith.constant 0 : index
    %37 = vector.load %arg2[%c3, %c0_26] : memref<9x1024xf32, #tpu.memory_space<vmem>>, vector<1x256xf32>
    %cst_27 = arith.constant dense<0.000000e+00> : vector<2x400xf32>
    %38 = tpu.matmul %31, %33, %cst_27 {dimension_numbers = #tpu.dot_dimension_numbers<[1], [0], [0], [1], [0, 0, 1, 1], [], []>} : vector<2x256xbf16>, vector<256x400xbf16>, vector<2x400xf32> -> vector<2x400xf32>
    %39 = vector.broadcast %34 : vector<1x400xf32> to vector<2x400xf32>
    %40 = arith.addf %38, %39 : vector<2x400xf32>
    %cst_28 = arith.constant 0.000000e+00 : f32
    %41 = vector.broadcast %cst_28 : f32 to vector<2x400xf32>
    %42 = arith.cmpf oge, %40, %41 : vector<2x400xf32>
    %cst_29 = arith.constant 2.000000e-01 : f32
    %43 = vector.broadcast %cst_29 : f32 to vector<2x400xf32>
    %44 = arith.mulf %43, %40 : vector<2x400xf32>
    %45 = arith.select %42, %40, %44 : vector<2x400xi1>, vector<2x400xf32>
    %46 = arith.truncf %45 : vector<2x400xf32> to vector<2x400xbf16>
    %cst_30 = arith.constant dense<0.000000e+00> : vector<2x256xf32>
    %47 = tpu.matmul %46, %36, %cst_30 {dimension_numbers = #tpu.dot_dimension_numbers<[1], [0], [0], [1], [0, 0, 1, 1], [], []>} : vector<2x400xbf16>, vector<400x256xbf16>, vector<2x256xf32> -> vector<2x256xf32>
    %48 = vector.broadcast %37 : vector<1x256xf32> to vector<2x256xf32>
    %49 = arith.addf %47, %48 : vector<2x256xf32>
    %cst_31 = arith.constant 0.000000e+00 : f32
    %50 = vector.broadcast %cst_31 : f32 to vector<2x256xf32>
    %51 = arith.cmpf oge, %49, %50 : vector<2x256xf32>
    %cst_32 = arith.constant 2.000000e-01 : f32
    %52 = vector.broadcast %cst_32 : f32 to vector<2x256xf32>
    %53 = arith.mulf %52, %49 : vector<2x256xf32>
    %54 = arith.select %51, %49, %53 : vector<2x256xi1>, vector<2x256xf32>
    %55 = arith.truncf %54 : vector<2x256xf32> to vector<2x256xbf16>
    %c0_33 = arith.constant 0 : index
    %c0_34 = arith.constant 0 : index
    %56 = vector.load %arg1[%c0_33, %c0_34] : memref<2x8xbf16, #tpu.memory_space<vmem>>, vector<2x8xbf16>
    %c0_35 = arith.constant 0 : index
    %c0_36 = arith.constant 0 : index
    %57 = vector.load %arg5[%c0_35, %c0_36] : memref<8x400xbf16, #tpu.memory_space<vmem>>, vector<8x400xbf16>
    %c4 = arith.constant 4 : index
    %c0_37 = arith.constant 0 : index
    %58 = vector.load %arg2[%c4, %c0_37] : memref<9x1024xf32, #tpu.memory_space<vmem>>, vector<1x400xf32>
    %c0_38 = arith.constant 0 : index
    %c0_39 = arith.constant 0 : index
    %59 = vector.load %arg6[%c0_38, %c0_39] : memref<400x256xbf16, #tpu.memory_space<vmem>>, vector<400x256xbf16>
    %c5 = arith.constant 5 : index
    %c0_40 = arith.constant 0 : index
    %60 = vector.load %arg2[%c5, %c0_40] : memref<9x1024xf32, #tpu.memory_space<vmem>>, vector<1x256xf32>
    %cst_41 = arith.constant dense<0.000000e+00> : vector<2x400xf32>
    %61 = tpu.matmul %56, %57, %cst_41 {dimension_numbers = #tpu.dot_dimension_numbers<[1], [0], [0], [1], [0, 0, 1, 1], [], []>} : vector<2x8xbf16>, vector<8x400xbf16>, vector<2x400xf32> -> vector<2x400xf32>
    %62 = vector.broadcast %58 : vector<1x400xf32> to vector<2x400xf32>
    %63 = arith.addf %61, %62 : vector<2x400xf32>
    %cst_42 = arith.constant 0.000000e+00 : f32
    %64 = vector.broadcast %cst_42 : f32 to vector<2x400xf32>
    %65 = arith.cmpf oge, %63, %64 : vector<2x400xf32>
    %cst_43 = arith.constant 2.000000e-01 : f32
    %66 = vector.broadcast %cst_43 : f32 to vector<2x400xf32>
    %67 = arith.mulf %66, %63 : vector<2x400xf32>
    %68 = arith.select %65, %63, %67 : vector<2x400xi1>, vector<2x400xf32>
    %69 = arith.truncf %68 : vector<2x400xf32> to vector<2x400xbf16>
    %cst_44 = arith.constant dense<0.000000e+00> : vector<2x256xf32>
    %70 = tpu.matmul %69, %59, %cst_44 {dimension_numbers = #tpu.dot_dimension_numbers<[1], [0], [0], [1], [0, 0, 1, 1], [], []>} : vector<2x400xbf16>, vector<400x256xbf16>, vector<2x256xf32> -> vector<2x256xf32>
    %71 = vector.broadcast %60 : vector<1x256xf32> to vector<2x256xf32>
    %72 = arith.addf %70, %71 : vector<2x256xf32>
    %cst_45 = arith.constant 0.000000e+00 : f32
    %73 = vector.broadcast %cst_45 : f32 to vector<2x256xf32>
    %74 = arith.cmpf oge, %72, %73 : vector<2x256xf32>
    %cst_46 = arith.constant 2.000000e-01 : f32
    %75 = vector.broadcast %cst_46 : f32 to vector<2x256xf32>
    %76 = arith.mulf %75, %72 : vector<2x256xf32>
    %77 = arith.select %74, %72, %76 : vector<2x256xi1>, vector<2x256xf32>
    %78 = arith.truncf %77 : vector<2x256xf32> to vector<2x256xbf16>
    %c0_i32_47 = arith.constant 0 : i32
    %79 = tpu.memref_slice %arg13[%c0_i32_47] : memref<2x!tpu.dma_semaphore, #tpu.memory_space<semaphore_mem>> -> memref<1x!tpu.dma_semaphore, #tpu.memory_space<semaphore_mem>>
    %80 = tpu.memref_squeeze %79 : memref<1x!tpu.dma_semaphore, #tpu.memory_space<semaphore_mem>> -> memref<!tpu.dma_semaphore, #tpu.memory_space<semaphore_mem>>
    tpu.wait_dma2 semaphore(%80 : memref<!tpu.dma_semaphore, #tpu.memory_space<semaphore_mem>>) src(%arg7 : memref<3x256x1024xbf16, #tpu.memory_space<any>>) dst(%arg11 : memref<3x256x1024xbf16, #tpu.memory_space<vmem>>)
    %c0_48 = arith.constant 0 : index
    %c0_49 = arith.constant 0 : index
    %c0_50 = arith.constant 0 : index
    %81 = vector.load %arg11[%c0_48, %c0_49, %c0_50] : memref<3x256x1024xbf16, #tpu.memory_space<vmem>>, vector<1x256x1024xbf16>
    %82 = vector.shape_cast %81 : vector<1x256x1024xbf16> to vector<256x1024xbf16>
    %cst_51 = arith.constant dense<0.000000e+00> : vector<2x1024xf32>
    %83 = tpu.matmul %29, %82, %cst_51 {dimension_numbers = #tpu.dot_dimension_numbers<[1], [0], [0], [1], [0, 0, 1, 1], [], []>} : vector<2x256xbf16>, vector<256x1024xbf16>, vector<2x1024xf32> -> vector<2x1024xf32>
    %c1_52 = arith.constant 1 : index
    %c0_53 = arith.constant 0 : index
    %c0_54 = arith.constant 0 : index
    %84 = vector.load %arg11[%c1_52, %c0_53, %c0_54] : memref<3x256x1024xbf16, #tpu.memory_space<vmem>>, vector<1x256x1024xbf16>
    %85 = vector.shape_cast %84 : vector<1x256x1024xbf16> to vector<256x1024xbf16>
    %cst_55 = arith.constant dense<0.000000e+00> : vector<2x1024xf32>
    %86 = tpu.matmul %55, %85, %cst_55 {dimension_numbers = #tpu.dot_dimension_numbers<[1], [0], [0], [1], [0, 0, 1, 1], [], []>} : vector<2x256xbf16>, vector<256x1024xbf16>, vector<2x1024xf32> -> vector<2x1024xf32>
    %87 = arith.addf %83, %86 : vector<2x1024xf32>
    %c2_56 = arith.constant 2 : index
    %c0_57 = arith.constant 0 : index
    %c0_58 = arith.constant 0 : index
    %88 = vector.load %arg11[%c2_56, %c0_57, %c0_58] : memref<3x256x1024xbf16, #tpu.memory_space<vmem>>, vector<1x256x1024xbf16>
    %89 = vector.shape_cast %88 : vector<1x256x1024xbf16> to vector<256x1024xbf16>
    %cst_59 = arith.constant dense<0.000000e+00> : vector<2x1024xf32>
    %90 = tpu.matmul %78, %89, %cst_59 {dimension_numbers = #tpu.dot_dimension_numbers<[1], [0], [0], [1], [0, 0, 1, 1], [], []>} : vector<2x256xbf16>, vector<256x1024xbf16>, vector<2x1024xf32> -> vector<2x1024xf32>
    %91 = arith.addf %87, %90 : vector<2x1024xf32>
    %c6 = arith.constant 6 : index
    %c0_60 = arith.constant 0 : index
    %92 = vector.load %arg2[%c6, %c0_60] : memref<9x1024xf32, #tpu.memory_space<vmem>>, vector<1x1024xf32>
    %93 = vector.broadcast %92 : vector<1x1024xf32> to vector<2x1024xf32>
    %94 = arith.addf %91, %93 : vector<2x1024xf32>
    %cst_61 = arith.constant 0.000000e+00 : f32
    %95 = vector.broadcast %cst_61 : f32 to vector<2x1024xf32>
    %96 = arith.cmpf oge, %94, %95 : vector<2x1024xf32>
    %cst_62 = arith.constant 2.000000e-01 : f32
    %97 = vector.broadcast %cst_62 : f32 to vector<2x1024xf32>
    %98 = arith.mulf %97, %94 : vector<2x1024xf32>
    %99 = arith.select %96, %94, %98 : vector<2x1024xi1>, vector<2x1024xf32>
    %c1_i32_63 = arith.constant 1 : i32
    %100 = tpu.memref_slice %arg13[%c1_i32_63] : memref<2x!tpu.dma_semaphore, #tpu.memory_space<semaphore_mem>> -> memref<1x!tpu.dma_semaphore, #tpu.memory_space<semaphore_mem>>
    %101 = tpu.memref_squeeze %100 : memref<1x!tpu.dma_semaphore, #tpu.memory_space<semaphore_mem>> -> memref<!tpu.dma_semaphore, #tpu.memory_space<semaphore_mem>>
    tpu.wait_dma2 semaphore(%101 : memref<!tpu.dma_semaphore, #tpu.memory_space<semaphore_mem>>) src(%arg8 : memref<1024x1024xbf16, #tpu.memory_space<any>>) dst(%arg12 : memref<1024x1024xbf16, #tpu.memory_space<vmem>>)
    %102 = arith.truncf %99 : vector<2x1024xf32> to vector<2x1024xbf16>
    %c0_64 = arith.constant 0 : index
    %c0_65 = arith.constant 0 : index
    %103 = vector.load %arg12[%c0_64, %c0_65] : memref<1024x1024xbf16, #tpu.memory_space<vmem>>, vector<1024x1024xbf16>
    %cst_66 = arith.constant dense<0.000000e+00> : vector<2x1024xf32>
    %104 = tpu.matmul %102, %103, %cst_66 {dimension_numbers = #tpu.dot_dimension_numbers<[1], [0], [0], [1], [0, 0, 1, 1], [], []>} : vector<2x1024xbf16>, vector<1024x1024xbf16>, vector<2x1024xf32> -> vector<2x1024xf32>
    %c7 = arith.constant 7 : index
    %c0_67 = arith.constant 0 : index
    %105 = vector.load %arg2[%c7, %c0_67] : memref<9x1024xf32, #tpu.memory_space<vmem>>, vector<1x1024xf32>
    %106 = vector.broadcast %105 : vector<1x1024xf32> to vector<2x1024xf32>
    %107 = arith.addf %104, %106 : vector<2x1024xf32>
    %cst_68 = arith.constant 0.000000e+00 : f32
    %108 = vector.broadcast %cst_68 : f32 to vector<2x1024xf32>
    %109 = arith.cmpf oge, %107, %108 : vector<2x1024xf32>
    %cst_69 = arith.constant 2.000000e-01 : f32
    %110 = vector.broadcast %cst_69 : f32 to vector<2x1024xf32>
    %111 = arith.mulf %110, %107 : vector<2x1024xf32>
    %112 = arith.select %109, %107, %111 : vector<2x1024xi1>, vector<2x1024xf32>
    %c8 = arith.constant 8 : index
    %c0_70 = arith.constant 0 : index
    %113 = vector.load %arg2[%c8, %c0_70] : memref<9x1024xf32, #tpu.memory_space<vmem>>, vector<1x1xf32>
    %c0_71 = arith.constant 0 : index
    %c0_72 = arith.constant 0 : index
    %114 = vector.load %arg9[%c0_71, %c0_72] : memref<1x1024xbf16, #tpu.memory_space<vmem>>, vector<1x1024xbf16>
    %115 = arith.extf %114 : vector<1x1024xbf16> to vector<1x1024xf32>
    %116 = vector.broadcast %115 : vector<1x1024xf32> to vector<2x1024xf32>
    %117 = arith.mulf %112, %116 : vector<2x1024xf32>
    %cst_73 = arith.constant dense<0.000000e+00> : vector<2xf32>
    %118 = vector.multi_reduction <add>, %117, %cst_73 [1] : vector<2x1024xf32> to vector<2xf32>
    %119 = vector.shape_cast %118 : vector<2xf32> to vector<2x1xf32>
    %120 = vector.broadcast %113 : vector<1x1xf32> to vector<2x1xf32>
    %121 = arith.addf %119, %120 : vector<2x1xf32>
    %c0_74 = arith.constant 0 : index
    %c0_75 = arith.constant 0 : index
    %122 = vector.load %arg10[%c0_74, %c0_75] : memref<2x1xf32, #tpu.memory_space<vmem>>, vector<2x1xf32>
    tpu.vector_store %arg10[%c0_74, %c0_75], %121 {strides = array<i32>} : memref<2x1xf32, #tpu.memory_space<vmem>>, vector<2x1xf32>,
    return
  }
}

</mosaic_0001>

<bundles_post_ra>
// kernel: tpu_custom_call.1
= control target key start
LH: loop header
LB: loop body
LE: loop exit
PB: predicated region body
PF: predicated region fallthrough
CT: control target
= control target key end

     0   :  { %15 = vsyncpa [#allocation6], 0  ;;  %s6875_s0 = inlined_call_operand.hbm [shape: bf16[2,2,256], index: 0, kind: input, shape index: {}]   ;;  %s6876_s1 = inlined_call_operand.hbm [shape: bf16[2,8], index: 1, kind: input, shape index: {}]   ;;  %s6877_s2 = inlined_call_operand.hbm [shape: f32[9,1024], index: 2, kind: input, shape index: {}]   ;;  %s6878_s3 = inlined_call_operand.vmem [shape: bf16[2,256,400], index: 3, kind: input, shape index: {}]   ;;  %s6879_s4 = inlined_call_operand.hbm [shape: bf16[2,400,256], index: 4, kind: input, shape index: {}]   ;;  %s6880_s5 = inlined_call_operand.hbm [shape: bf16[8,400], index: 5, kind: input, shape index: {}]   ;;  %s6881_s6 = inlined_call_operand.hbm [shape: bf16[400,256], index: 6, kind: input, shape index: {}]   ;;  %s6882_s7 = inlined_call_operand.hbm [shape: bf16[3,256,1024], index: 7, kind: input, shape index: {}]   ;;  %s6883_s8 = inlined_call_operand.hbm [shape: bf16[1024,1024], index: 8, kind: input, shape index: {}]   ;;  %s6884_s9 = inlined_call_operand.hbm [shape: bf16[1,1024], index: 9, kind: input, shape index: {}]   ;;  %s6885_s10 = inlined_call_operand.vmem [shape: f32[2,1], index: 10, kind: output, shape index: {}]  }
   0x1   :  { %16 = vsyncpa [#allocation8], 0 }
   0x2   :  { %17 = vsyncpa [#allocation11], 0 }
   0x3   :  { %18 = vsyncpa [#allocation14], 0  ;;  %s6015_s13 = smov [#allocation7]   ;;  %s6016_s15 = smov [#allocation10]  }
   0x4   :  { %s37_s14 = sshll.u32 %s6015_s13, 4  ;;  %s60_s16 = sshll.u32 %s6016_s15, 4  ;;  %s38_s14 = int_to_ptr.vmem [resolvable:$true] %s37_s14  ;;  %s6093_s16 = int_to_ptr.vmem [resolvable:$true] %s60_s16 }
   0x5   :  { %s5849_s19 = scalar_lea.hbm %s6876_s1, 16 }
   0x6   :  { %p5850_p0 = scmp.ne.s32.totalorder %s6876_s1, %s5849_s19  ;;  %p5853_p1 = scmp.lt.u32.totalorder %s5849_s19, %s6876_s1 }
   0x8   :  { %p5855_p2 = pnand %p5853_p1, %p5850_p0 }
   0xa   :  { %5858 = shalt.err (!%p5855_p2)
}
   0xb   :  { %s5859_s24 = scalar_lea.vmem %s38_s14, 16  ;;  %s5863_s25 = scalar_lea.vmem %s38_s14, 32 }
   0xc   :  { %p5860_p3 = scmp.ne.s32.totalorder %s38_s14, %s5859_s24  ;;  %p5864_p4 = scmp.lt.s32.totalorder %s38_s14, %s38_s14 }
   0xd   :  { %p5865_p5 = scmp.lt.s32.totalorder %s5863_s25, %s5859_s24 }
   0xf   :  { %p5866_p6 = por %p5865_p5, %p5864_p4 }
  0x11   :  { %p5867_p7 = pnand %p5866_p6, %p5860_p3 }
  0x13   :  { %5870 = shalt.err (!%p5867_p7)
}
  0x14   :  { %40 = dma.hbm_to_vmem [thread:$0]  %s6876_s1, 16, %s38_s14, [#allocation8]  }
  0x15   :  { %s5871_s30 = scalar_lea.hbm %s6879_s4, 12800 }
  0x16   :  { %p5872_p8 = scmp.ne.s32.totalorder %s6879_s4, %s5871_s30  ;;  %p5875_p9 = scmp.lt.u32.totalorder %s5871_s30, %s6879_s4 }
  0x18   :  { %p5877_p10 = pnand %p5875_p9, %p5872_p8 }
  0x1a   :  { %5880 = shalt.err (!%p5877_p10)
}
  0x1b   :  { %s5881_s17 = scalar_lea.vmem %s6093_s16, 12800  ;;  %p5886_p12 = scmp.lt.s32.totalorder %s6093_s16, %s6093_s16 }
  0x1c   :  { %p5882_p11 = scmp.ne.s32.totalorder %s6093_s16, %s5881_s17  ;;  %p5887_p13 = scmp.lt.s32.totalorder %s5881_s17, %s5881_s17 }
  0x1e   :  { %p5888_p0 = por %p5887_p13, %p5886_p12 }
  0x20   :  { %p5889_p1 = pnand %p5888_p0, %p5882_p11 }
  0x22   :  { %5892 = shalt.err (!%p5889_p1)
}
  0x23   :  { %s6017_s1 = smov 128   ;;  %s6018_s14 = smov 8  }
  0x24   :  { %66 = dma.hbm_to_vmem [thread:$0]  %s6879_s4, 12800, %s6093_s16, [#allocation11], %s6017_s1, %s6017_s1, %s6018_s14  }
  0x25   :  { %s6019_s20 = smov [#allocation13]   ;;  %s6020_s22 = smov [#allocation5]  }
  0x26   :  { %s82_s21 = sshll.u32 %s6019_s20, 4  ;;  %s24_s23 = sshll.u32 %s6020_s22, 4  ;;  %s83_s21 = int_to_ptr.vmem [resolvable:$true] %s82_s21  ;;  %s6127_s23 = int_to_ptr.vmem [resolvable:$true] %s24_s23 }
  0x27   :  { %s5893_s26 = scalar_lea.hbm %s6881_s6, 6400 }
  0x28   :  { %p5894_p2 = scmp.ne.s32.totalorder %s6881_s6, %s5893_s26  ;;  %p5897_p3 = scmp.lt.u32.totalorder %s5893_s26, %s6881_s6 }
  0x2a   :  { %p5899_p4 = pnand %p5897_p3, %p5894_p2 }
  0x2c   :  { %5902 = shalt.err (!%p5899_p4)
}
  0x2d   :  { %s5903_s4 = scalar_lea.vmem %s83_s21, 6400  ;;  %p5908_p6 = scmp.lt.s32.totalorder %s83_s21, %s83_s21 }
  0x2e   :  { %p5904_p5 = scmp.ne.s32.totalorder %s83_s21, %s5903_s4  ;;  %p5909_p7 = scmp.lt.s32.totalorder %s5903_s4, %s5903_s4 }
  0x30   :  { %p5910_p8 = por %p5909_p7, %p5908_p6 }
  0x32   :  { %p5911_p9 = pnand %p5910_p8, %p5904_p5 }
  0x34   :  { %5914 = shalt.err (!%p5911_p9)
}
  0x35   :  { %88 = dma.hbm_to_vmem [thread:$0]  %s6881_s6, 6400, %s83_s21, [#allocation14], %s6017_s1, %s6017_s1, %s6018_s14  }
  0x36   :  { %s5915_s15 = scalar_lea.hbm %s6875_s0, 64 }
  0x37   :  { %p5916_p10 = scmp.ne.s32.totalorder %s6875_s0, %s5915_s15  ;;  %p5919_p11 = scmp.lt.u32.totalorder %s5915_s15, %s6875_s0 }
  0x39   :  { %p5921_p12 = pnand %p5919_p11, %p5916_p10 }
  0x3b   :  { %5924 = shalt.err (!%p5921_p12)
}
  0x3c   :  { %s5925_s22 = scalar_lea.vmem %s6127_s23, 64  ;;  %p5930_p0 = scmp.lt.s32.totalorder %s6127_s23, %s6127_s23 }
  0x3d   :  { %p5926_p13 = scmp.ne.s32.totalorder %s6127_s23, %s5925_s22  ;;  %p5931_p1 = scmp.lt.s32.totalorder %s5925_s22, %s5925_s22 }
  0x3f   :  { %p5932_p2 = por %p5931_p1, %p5930_p0 }
  0x41   :  { %p5933_p3 = pnand %p5932_p2, %p5926_p13 }
  0x43   :  { %5936 = shalt.err (!%p5933_p3)
}
  0x44   :  { %s6021_s6 = smov 32   ;;  %s6022_s21 = smov 2  }
  0x45   :  { %30 = dma.hbm_to_vmem [thread:$0]  %s6875_s0, 64, %s6127_s23, [#allocation6], %s6021_s6, %s6021_s6, %s6022_s21  }
  0x46   :  { %s6023_s26 = smov [#allocation9]   ;;  %s5937_s30 = scalar_lea.hbm %s6877_s2, 2048 }
  0x47   :  { %s46_s27 = sshll.u32 %s6023_s26, 4  ;;  %p5938_p4 = scmp.ne.s32.totalorder %s6877_s2, %s5937_s30  ;;  %s47_s27 = int_to_ptr.vmem [resolvable:$true] %s46_s27 }
  0x48   :  { %p5941_p5 = scmp.lt.u32.totalorder %s5937_s30, %s6877_s2 }
  0x4a   :  { %p5943_p6 = pnand %p5941_p5, %p5938_p4 }
  0x4c   :  { %5946 = shalt.err (!%p5943_p6)
}
  0x4d   :  { %s5947_s13 = scalar_lea.vmem %s47_s27, 2048  ;;  %p5952_p8 = scmp.lt.s32.totalorder %s47_s27, %s47_s27 }
  0x4e   :  { %p5948_p7 = scmp.ne.s32.totalorder %s47_s27, %s5947_s13  ;;  %p5953_p9 = scmp.lt.s32.totalorder %s5947_s13, %s5947_s13 }
  0x50   :  { %p5954_p10 = por %p5953_p9, %p5952_p8 }
  0x52   :  { %p5955_p11 = pnand %p5954_p10, %p5948_p7 }
  0x54   :  { %5958 = shalt.err (!%p5955_p11)
}
  0x55   :  { %s6024_s0 = smov 1024   ;;  %s6025_s23 = smov 64  }
  0x56   :  { %52 = dma.hbm_to_vmem [thread:$0]  %s6877_s2, 2048, %s47_s27, [#allocation8], %s6024_s0, %s6024_s0, %s6025_s23  }
  0x57   :  { %s6026_s18 = smov [#allocation12]   ;;  %s6027_s20 = smov [#allocation15]  }
  0x58   :  { %s73_s19 = sshll.u32 %s6026_s18, 4  ;;  %s95_s22 = sshll.u32 %s6027_s20, 4  ;;  %s74_s19 = int_to_ptr.vmem [resolvable:$true] %s73_s19  ;;  %s96_s22 = int_to_ptr.vmem [resolvable:$true] %s95_s22 }
  0x59   :  { %s5959_s25 = scalar_lea.hbm %s6880_s5, 256 }
  0x5a   :  { %p5960_p12 = scmp.ne.s32.totalorder %s6880_s5, %s5959_s25  ;;  %p5963_p13 = scmp.lt.u32.totalorder %s5959_s25, %s6880_s5 }
  0x5c   :  { %p5965_p0 = pnand %p5963_p13, %p5960_p12 }
  0x5e   :  { %5968 = shalt.err (!%p5965_p0)
}
  0x5f   :  { %s5969_s2 = scalar_lea.vmem %s74_s19, 256  ;;  %p5974_p2 = scmp.lt.s32.totalorder %s74_s19, %s74_s19 }
  0x60   :  { %p5970_p1 = scmp.ne.s32.totalorder %s74_s19, %s5969_s2  ;;  %p5975_p3 = scmp.lt.s32.totalorder %s5969_s2, %s5969_s2 }
  0x62   :  { %p5976_p4 = por %p5975_p3, %p5974_p2 }
  0x64   :  { %p5977_p5 = pnand %p5976_p4, %p5970_p1 }
  0x66   :  { %5980 = shalt.err (!%p5977_p5)
}
  0x67   :  { %76 = dma.hbm_to_vmem [thread:$0]  %s6880_s5, 256, %s74_s19, [#allocation11]  }
  0x68   :  { %s5981_s12 = scalar_lea.hbm %s6884_s9, 128 }
  0x69   :  { %p5982_p6 = scmp.ne.s32.totalorder %s6884_s9, %s5981_s12  ;;  %p5985_p7 = scmp.lt.u32.totalorder %s5981_s12, %s6884_s9 }
  0x6b   :  { %p5987_p8 = pnand %p5985_p7, %p5982_p6 }
  0x6d   :  { %5990 = shalt.err (!%p5987_p8)
}
  0x6e   :  { %s5991_s20 = scalar_lea.vmem %s96_s22, 128  ;;  %p5996_p10 = scmp.lt.s32.totalorder %s96_s22, %s96_s22 }
  0x6f   :  { %p5992_p9 = scmp.ne.s32.totalorder %s96_s22, %s5991_s20  ;;  %p5997_p11 = scmp.lt.s32.totalorder %s5991_s20, %s5991_s20 }
  0x71   :  { %p5998_p12 = por %p5997_p11, %p5996_p10 }
  0x73   :  { %p5999_p13 = pnand %p5998_p12, %p5992_p9 }
  0x75   :  { %6002 = shalt.err (!%p5999_p13)
}
  0x76   :  { %98 = dma.hbm_to_vmem [thread:$0]  %s6884_s9, 128, %s96_s22, [#allocation14]  }
  0x77   :  { %6003 = dma.done.wait [#allocation6], 64  }
  0x78   :  { %6004 = vsyncadd [#allocation6], 4294967232 }
  0x79   :  { %6005 = dma.done.wait [#allocation8], 2064  }
  0x7a   :  { %6006 = vsyncadd [#allocation8], 4294965232 }
  0x7b   :  { %6007 = dma.done.wait [#allocation11], 13056  }
  0x7c   :  { %6008 = vsyncadd [#allocation11], 4294954240 }
  0x7d   :  { %6009 = dma.done.wait [#allocation14], 6528  }
  0x7e   :  { %6010 = vsyncadd [#allocation14], 4294960768  ;;  %s125_s6 = sld [smem:[#allocation0]]   ;;  %137 = sst [smem:[#allocation17]] %s6024_s0  ;;  %v310_v36 = vlaneseq  ;;  %v6036_v37 = vmov 1966171168  }
  0x7f   :  { %139 = sst [smem:[#allocation17 + $0x1]] %s6024_s0  ;;  %s6028_s24 = smov [#allocation2]   ;;  %v340_v38 = vunpack.c.l.s4 %v6036_v37  ;;  %vm1034_vm3 = vcmask 130048   ;;  %vm2160_vm9 = vcmask 1043456   ;;  %vm2156_vm10 = vcmask 64512  }
  0x80   :  { %s133_s25 = sshll.u32 %s6028_s24, 4  ;;  %141 = sst [smem:[#allocation17 + $0x2]] %s6018_s14  ;;  %v6341_v43 = vshrl.u32 %v310_v36, 7  ;;  %s134_s25 = int_to_ptr.vmem [resolvable:$true] %s133_s25 }
  0x81   :  { %143 = sst [smem:[#allocation17 + $0x3]] %s6025_s23  ;;  %s6029_s26 = smov 512   ;;  %v341_v44 = vunpack.c.0.s8 %v340_v38 }
  0x82   :  { %145 = sst [smem:[#allocation17 + $0x4]] %s6017_s1  ;;  %s6030_s28 = smov 4  }
  0x83   :  { %147 = sst [smem:[#allocation17 + $0x5]] %s6022_s21  ;;  %s6031_s29 = smov [#allocation4]   ;;  %v344_v49 = vsub.s32 %v341_v44, %v6341_v43 }
  0x84   :  { %s4970_s9 = sshll.u32 %s125_s6, 26  ;;  %151 = sst [smem:[#allocation17 + $0x7]] %s6025_s23 }
  0x85   :  { %s4971_s22 = sadd.s32 134217728, %s4970_s9  ;;  %149 = sst [smem:[#allocation17 + $0x6]] %s6029_s26 }
  0x86   :  { %153 = sst [smem:[#allocation17 + $0x8]] %s6030_s28  ;;  %s6032_s30 = smov [#allocation16]  }
  0x87   :  { %155 = dma.general %s6882_s7, 49152, %s134_s25, %s6031_s29, %s6032_s30, [#allocation17], %s4971_s22, 0  }
  0x88   :  { %172 = sst [smem:[#allocation19]] %s6024_s0  ;;  %s6033_s4 = smov [#allocation3]  }
  0x89   :  { %174 = sst [smem:[#allocation19 + $0x1]] %s6024_s0  ;;  %s168_s16 = sshll.u32 %s6033_s4, 4  ;;  %s169_s16 = int_to_ptr.vmem [resolvable:$true] %s168_s16 }
  0x8a   :  { %176 = sst [smem:[#allocation19 + $0x2]] %s6018_s14  ;;  %s6034_s7 = smov [#allocation4 + $0x1]  }
  0x8b   :  { %178 = sst [smem:[#allocation19 + $0x3]] %s6025_s23  ;;  %s6035_s11 = smov [#allocation18]  }
  0x8c   :  { %180 = sst [smem:[#allocation19 + $0x4]] %s6017_s1 }
  0x8d   :  { %182 = sst [smem:[#allocation19 + $0x5]] %s6022_s21 }
  0x8e   :  { %184 = sst [smem:[#allocation19 + $0x6]] %s6029_s26 }
  0x8f   :  { %186 = sst [smem:[#allocation19 + $0x7]] %s6025_s23 }
  0x90   :  { %188 = sst [smem:[#allocation19 + $0x8]] %s6030_s28 }
  0x91   :  { %190 = dma.general %s6883_s8, 65536, %s169_s16, %s6034_s7, %s6035_s11, [#allocation19], %s4971_s22, 0  }
  0x92   :  { %v5428_v0 = vld [vmem:[%s6878_s3 + $0x4] ss:$16 sps:$4 sm:$0xff]   ;;  %v5430_v1 = vld [vmem:[%s6878_s3] ss:$16 sps:$4 sm:$0xff]   ;;  %v5434_v4 = vld [vmem:[%s6878_s3 + $0xc] ss:$16 sps:$4 sm:$0xff]  }
  0x93   :  { %675 = vmatprep.subr.bf16.mxu0 %v5428_v0  ;;  %v5431_v2 = vld [vmem:[%s6878_s3 + $0x24] ss:$16 sps:$4 sm:$0xff]   ;;  %v5433_v3 = vld [vmem:[%s6878_s3 + $0x20] ss:$16 sps:$4 sm:$0xff]   ;;  %v5436_v5 = vld [vmem:[%s6878_s3 + $0x8] ss:$16 sps:$4 sm:$0xff]   ;;  %716 = vmatprep.subr.bf16.mxu1 %v5434_v4 }
  0x94   :  { %676 = vmatpush1.bf16.msra.mxu0 %v5430_v1  ;;  %v5437_v6 = vld [vmem:[%s6878_s3 + $0x44] ss:$16 sps:$4 sm:$0xff]   ;;  %717 = vmatpush1.bf16.msra.mxu1 %v5436_v5  ;;  %v5440_v7 = vld [vmem:[%s6878_s3 + $0x2c] ss:$16 sps:$4 sm:$0xff]   ;;  %v5442_v8 = vld [vmem:[%s6878_s3 + $0x28] ss:$16 sps:$4 sm:$0xff]  }
  0x95   :  { %677 = vmatprep.subr.bf16.mxu0 %v5431_v2  ;;  %v5439_v9 = vld [vmem:[%s6878_s3 + $0x40] ss:$16 sps:$4 sm:$0xff]   ;;  %v5443_v10 = vld [vmem:[%s6878_s3 + $0x64] ss:$16 sps:$4 sm:$0xff]   ;;  %718 = vmatprep.subr.bf16.mxu1 %v5440_v7  ;;  %v5446_v11 = vld [vmem:[%s6878_s3 + $0x4c] ss:$16 sps:$4 sm:$0xff]  }
  0x96   :  { %v5448_v12 = vld [vmem:[%s6878_s3 + $0x48] ss:$16 sps:$4 sm:$0xff]   ;;  %v5445_v13 = vld [vmem:[%s6878_s3 + $0x60] ss:$16 sps:$4 sm:$0xff]   ;;  %v5452_v14 = vld [vmem:[%s6878_s3 + $0x6c] ss:$16 sps:$4 sm:$0xff]  }
  0x97   :  { %v5449_v15 = vld [vmem:[%s6878_s3 + $0x84] ss:$16 sps:$4 sm:$0xff]   ;;  %v5454_v16 = vld [vmem:[%s6878_s3 + $0x68] ss:$16 sps:$4 sm:$0xff]   ;;  %v5451_v17 = vld [vmem:[%s6878_s3 + $0x80] ss:$16 sps:$4 sm:$0xff]  }
  0x98   :  { %678 = vmatpush1.bf16.msra.mxu0 %v5433_v3  ;;  %719 = vmatpush1.bf16.msra.mxu1 %v5442_v8  ;;  %v5458_v18 = vld [vmem:[%s6878_s3 + $0x8c] ss:$16 sps:$4 sm:$0xff]   ;;  %v5455_v19 = vld [vmem:[%s6878_s3 + $0xa4] ss:$16 sps:$4 sm:$0xff]   ;;  %v5460_v20 = vld [vmem:[%s6878_s3 + $0x88] ss:$16 sps:$4 sm:$0xff]  }
  0x99   :  { %679 = vmatprep.subr.bf16.mxu0 %v5437_v6  ;;  %720 = vmatprep.subr.bf16.mxu1 %v5446_v11  ;;  %v5457_v21 = vld [vmem:[%s6878_s3 + $0xa0] ss:$16 sps:$4 sm:$0xff]   ;;  %v5464_v22 = vld [vmem:[%s6878_s3 + $0xac] ss:$16 sps:$4 sm:$0xff]   ;;  %v5461_v23 = vld [vmem:[%s6878_s3 + $0xc4] ss:$16 sps:$4 sm:$0xff]  }
  0x9a   :  { %v5466_v24 = vld [vmem:[%s6878_s3 + $0xa8] ss:$16 sps:$4 sm:$0xff]   ;;  %v5463_v25 = vld [vmem:[%s6878_s3 + $0xc0] ss:$16 sps:$4 sm:$0xff]   ;;  %v5470_v26 = vld [vmem:[%s6878_s3 + $0xcc] ss:$16 sps:$4 sm:$0xff]  }
  0x9b   :  { %v5467_v27 = vld [vmem:[%s6878_s3 + $0xe4] ss:$16 sps:$4 sm:$0xff]   ;;  %v5472_v28 = vld [vmem:[%s6878_s3 + $0xc8] ss:$16 sps:$4 sm:$0xff]   ;;  %v5469_v29 = vld [vmem:[%s6878_s3 + $0xe0] ss:$16 sps:$4 sm:$0xff]  }
  0x9c   :  { %680 = vmatpush1.bf16.msra.mxu0 %v5439_v9  ;;  %721 = vmatpush1.bf16.msra.mxu1 %v5448_v12  ;;  %v5476_v30 = vld [vmem:[%s6878_s3 + $0xec] ss:$16 sps:$4 sm:$0xff]   ;;  %v5473_v31 = vld [vmem:[%s6878_s3 + $0x104] ss:$16 sps:$4 sm:$0xff]   ;;  %v5478_v32 = vld [vmem:[%s6878_s3 + $0xe8] ss:$16 sps:$4 sm:$0xff]  }
  0x9d   :  { %681 = vmatprep.subr.bf16.mxu0 %v5443_v10  ;;  %722 = vmatprep.subr.bf16.mxu1 %v5452_v14  ;;  %v5475_v33 = vld [vmem:[%s6878_s3 + $0x100] ss:$16 sps:$4 sm:$0xff]   ;;  %v5482_v34 = vld [vmem:[%s6878_s3 + $0x10c] ss:$16 sps:$4 sm:$0xff]   ;;  %v5479_v35 = vld [vmem:[%s6878_s3 + $0x124] ss:$16 sps:$4 sm:$0xff]  }
  0x9e   :  { %v5484_v39 = vld [vmem:[%s6878_s3 + $0x108] ss:$16 sps:$4 sm:$0xff]   ;;  %v5481_v40 = vld [vmem:[%s6878_s3 + $0x120] ss:$16 sps:$4 sm:$0xff]   ;;  %v5488_v41 = vld [vmem:[%s6878_s3 + $0x12c] ss:$16 sps:$4 sm:$0xff]  }
  0x9f   :  { %v5485_v42 = vld [vmem:[%s6878_s3 + $0x144] ss:$16 sps:$4 sm:$0xff]   ;;  %v5490_v45 = vld [vmem:[%s6878_s3 + $0x128] ss:$16 sps:$4 sm:$0xff]   ;;  %v5487_v46 = vld [vmem:[%s6878_s3 + $0x140] ss:$16 sps:$4 sm:$0xff]  }
  0xa0   :  { %682 = vmatpush1.bf16.msra.mxu0 %v5445_v13  ;;  %723 = vmatpush1.bf16.msra.mxu1 %v5454_v16  ;;  %v5494_v47 = vld [vmem:[%s6878_s3 + $0x14c] ss:$16 sps:$4 sm:$0xff]   ;;  %v5491_v48 = vld [vmem:[%s6878_s3 + $0x164] ss:$16 sps:$4 sm:$0xff]   ;;  %v5493_v50 = vld [vmem:[%s6878_s3 + $0x160] ss:$16 sps:$4 sm:$0xff]  }
  0xa1   :  { %683 = vmatprep.subr.bf16.mxu0 %v5449_v15  ;;  %724 = vmatprep.subr.bf16.mxu1 %v5458_v18  ;;  %v4974_v51 = vld.sshfl [vmem:[#allocation5] sm:$0x11 pattern:$0x75316420]  ;;  %v5496_v52 = vld [vmem:[%s6878_s3 + $0x148] ss:$16 sps:$4 sm:$0xff]  }
  0xa2   :  { %v338_v53 = vcombine.high %v4974_v51, %v4974_v51  ;;  %v5500_v54 = vld [vmem:[%s6878_s3 + $0x16c] ss:$16 sps:$4 sm:$0xff]   ;;  %v5497_v55 = vld [vmem:[%s6878_s3 + $0x184] ss:$16 sps:$4 sm:$0xff]   ;;  %v5499_v57 = vld [vmem:[%s6878_s3 + $0x180] ss:$16 sps:$4 sm:$0xff]   ;;  %v345_v8 = vrot.slane %v4974_v51, %v344_v49 }
  0xa3   :  { %v5502_v58 = vld [vmem:[%s6878_s3 + $0x168] ss:$16 sps:$4 sm:$0xff]   ;;  %v5506_v59 = vld [vmem:[%s6878_s3 + $0x18c] ss:$16 sps:$4 sm:$0xff]   ;;  %v5503_v60 = vld [vmem:[%s6878_s3 + $0x1a4] ss:$16 sps:$4 sm:$0xff]  }
  0xa4   :  { %684 = vmatpush1.bf16.msra.mxu0 %v5451_v17  ;;  %725 = vmatpush1.bf16.msra.mxu1 %v5460_v20  ;;  %v352_v56 = vrot.slane %v338_v53, %v344_v49  ;;  %v5505_v61 = vld [vmem:[%s6878_s3 + $0x1a0] ss:$16 sps:$4 sm:$0xff]   ;;  %v5508_v62 = vld [vmem:[%s6878_s3 + $0x188] ss:$16 sps:$4 sm:$0xff]   ;;  %v5512_v63 = vld [vmem:[%s6878_s3 + $0x1ac] ss:$16 sps:$4 sm:$0xff]  }
  0xa5   :  { %685 = vmatprep.subr.bf16.mxu0 %v5455_v19  ;;  %726 = vmatprep.subr.bf16.mxu1 %v5464_v22  ;;  %v5509_v0 = vld [vmem:[%s6878_s3 + $0x1c4] ss:$16 sps:$4 sm:$0xff]   ;;  %v5511_v1 = vld [vmem:[%s6878_s3 + $0x1c0] ss:$16 sps:$4 sm:$0xff]   ;;  %v5514_v2 = vld [vmem:[%s6878_s3 + $0x1a8] ss:$16 sps:$4 sm:$0xff]  }
  0xa6   :  { %707 = vmatprep.mubr.bf16.mxu0 %v352_v56  ;;  %748 = vmatprep.mubr.bf16.mxu1 %v352_v56  ;;  %v5518_v3 = vld [vmem:[%s6878_s3 + $0x1cc] ss:$16 sps:$4 sm:$0xff]   ;;  %v5515_v4 = vld [vmem:[%s6878_s3 + $0x1e4] ss:$16 sps:$4 sm:$0xff]   ;;  %v5517_v5 = vld [vmem:[%s6878_s3 + $0x1e0] ss:$16 sps:$4 sm:$0xff]  }
  0xa7   :  { %v5520_v6 = vld [vmem:[%s6878_s3 + $0x1c8] ss:$16 sps:$4 sm:$0xff]   ;;  %v5521_v7 = vld [vmem:[%s6878_s3 + $0x1ec] ss:$16 sps:$4 sm:$0xff]   ;;  %v5526_v10 = vld [vmem:[%s6878_s3 + $0x204] ss:$16 sps:$4 sm:$0xff]  }
  0xa8   :  { %686 = vmatpush1.bf16.msra.mxu0 %v5457_v21  ;;  %727 = vmatpush1.bf16.msra.mxu1 %v5466_v24  ;;  %v5523_v9 = vld [vmem:[%s6878_s3 + $0x1e8] ss:$16 sps:$4 sm:$0xff]   ;;  %v5154_v11 = vld.sshfl [vmem:[#allocation5 + $0x2] sm:$0x11 pattern:$0x75316420] }
  0xa9   :  { %687 = vmatprep.subr.bf16.mxu0 %v5461_v23  ;;  %728 = vmatprep.subr.bf16.mxu1 %v5470_v26  ;;  %v5524_v12 = vld [vmem:[%s6878_s3 + $0x200] ss:$16 sps:$4 sm:$0xff]   ;;  %v1279_v13 = vcombine.high %v5154_v11, %v5154_v11  ;;  %v6422_v14 = vrot.slane %v5154_v11, %v344_v49  ;;  %v5529_v15 = vld [vmem:[%s6878_s3 + $0x224] ss:$16 sps:$4 sm:$0xff]   ;;  %v5575_v11 = vld [vmem:[%s6878_s3 + $0x228] ss:$16 sps:$4 sm:$0xff]  }
  0xaa   :  { %v5527_v17 = vld [vmem:[%s6878_s3 + $0x220] ss:$16 sps:$4 sm:$0xff]   ;;  %v5532_v18 = vld [vmem:[%s6878_s3 + $0x244] ss:$16 sps:$4 sm:$0xff]  }
  0xab   :  { %v6427_v16 = vrot.slane %v1279_v13, %v344_v49  ;;  %v5530_v19 = vld [vmem:[%s6878_s3 + $0x240] ss:$16 sps:$4 sm:$0xff]   ;;  %v5535_v20 = vld [vmem:[%s6878_s3 + $0x264] ss:$16 sps:$4 sm:$0xff]  }
  0xac   :  { %688 = vmatpush1.bf16.msra.mxu0 %v5463_v25  ;;  %729 = vmatpush1.bf16.msra.mxu1 %v5472_v28  ;;  %v5533_v21 = vld [vmem:[%s6878_s3 + $0x260] ss:$16 sps:$4 sm:$0xff]   ;;  %v5538_v22 = vld [vmem:[%s6878_s3 + $0x284] ss:$16 sps:$4 sm:$0xff]  }
  0xad   :  { %689 = vmatprep.subr.bf16.mxu0 %v5467_v27  ;;  %730 = vmatprep.subr.bf16.mxu1 %v5476_v30  ;;  %v5536_v23 = vld [vmem:[%s6878_s3 + $0x280] ss:$16 sps:$4 sm:$0xff]   ;;  %v5541_v24 = vld [vmem:[%s6878_s3 + $0x2a4] ss:$16 sps:$4 sm:$0xff]  }
  0xae   :  { %v5539_v25 = vld [vmem:[%s6878_s3 + $0x2a0] ss:$16 sps:$4 sm:$0xff]   ;;  %v5544_v26 = vld [vmem:[%s6878_s3 + $0x2c4] ss:$16 sps:$4 sm:$0xff]  }
  0xaf   :  { %v5620_v27 = vld [vmem:[#allocation10] ss:$8 sps:$4 sm:$0xff]   ;;  %v5622_v28 = vld [vmem:[#allocation10 + $0x4] ss:$8 sps:$4 sm:$0xff]   ;;  %v5631_v37 = vld [vmem:[#allocation10 + $0x34] ss:$8 sps:$4 sm:$0xff]  }
  0xb0   :  { %690 = vmatpush1.bf16.msra.mxu0 %v5469_v29  ;;  %731 = vmatpush1.bf16.msra.mxu1 %v5478_v32  ;;  %v5625_v29 = vld [vmem:[#allocation10 + $0x14] ss:$8 sps:$4 sm:$0xff]   ;;  %v5632_v44 = vld [vmem:[#allocation10 + $0x40] ss:$8 sps:$4 sm:$0xff]   ;;  %v5641_v56 = vld [vmem:[#allocation10 + $0x70] ss:$8 sps:$4 sm:$0xff]  }
  0xb1   :  { %691 = vmatprep.subr.bf16.mxu0 %v5473_v31  ;;  %732 = vmatprep.subr.bf16.mxu1 %v5482_v34  ;;  %v5542_v30 = vld [vmem:[%s6878_s3 + $0x2c0] ss:$16 sps:$4 sm:$0xff]   ;;  %v5547_v32 = vld [vmem:[%s6878_s3 + $0x2e4] ss:$16 sps:$4 sm:$0xff]  }
  0xb2   :  { %v5623_v31 = vld [vmem:[#allocation10 + $0x10] ss:$8 sps:$4 sm:$0xff]   ;;  %v5656_v13 = vld [vmem:[#allocation10 + $0xc0] ss:$8 sps:$4 sm:$0xff]  }
  0xb3   :  { %v5545_v34 = vld [vmem:[%s6878_s3 + $0x2e0] ss:$16 sps:$4 sm:$0xff]   ;;  %v5550_v36 = vld [vmem:[%s6878_s3 + $0x304] ss:$16 sps:$4 sm:$0xff]  }
  0xb4   :  { %692 = vmatpush1.bf16.msra.mxu0 %v5475_v33  ;;  %733 = vmatpush1.bf16.msra.mxu1 %v5484_v39  ;;  %v5628_v33 = vld [vmem:[#allocation10 + $0x24] ss:$8 sps:$4 sm:$0xff]   ;;  %v5629_v39 = vld [vmem:[#allocation10 + $0x30] ss:$8 sps:$4 sm:$0xff]  }
  0xb5   :  { %693 = vmatprep.subr.bf16.mxu0 %v5479_v35  ;;  %734 = vmatprep.subr.bf16.mxu1 %v5488_v41  ;;  %v5626_v35 = vld [vmem:[#allocation10 + $0x20] ss:$8 sps:$4 sm:$0xff]   ;;  %v5634_v41 = vld [vmem:[#allocation10 + $0x44] ss:$8 sps:$4 sm:$0xff]  }
  0xb6   :  { %v5548_v38 = vld [vmem:[%s6878_s3 + $0x300] ss:$16 sps:$4 sm:$0xff]   ;;  %v5559_v49 = vld [vmem:[%s6878_s3 + $0x364] ss:$16 sps:$4 sm:$0xff]  }
  0xb7   :  { %v5557_v51 = vld [vmem:[%s6878_s3 + $0x360] ss:$16 sps:$4 sm:$0xff]   ;;  %v5562_v53 = vld [vmem:[%s6878_s3 + $0x384] ss:$16 sps:$4 sm:$0xff]  }
  0xb8   :  { %694 = vmatpush1.bf16.msra.mxu0 %v5481_v40  ;;  %735 = vmatpush1.bf16.msra.mxu1 %v5490_v45  ;;  %v5553_v40 = vld [vmem:[%s6878_s3 + $0x324] ss:$16 sps:$4 sm:$0xff]  }
  0xb9   :  { %695 = vmatprep.subr.bf16.mxu0 %v5485_v42  ;;  %736 = vmatprep.subr.bf16.mxu1 %v5494_v47  ;;  %v5551_v42 = vld [vmem:[%s6878_s3 + $0x320] ss:$16 sps:$4 sm:$0xff]   ;;  %v5556_v45 = vld [vmem:[%s6878_s3 + $0x344] ss:$16 sps:$4 sm:$0xff]  }
  0xba   :  { %v5554_v47 = vld [vmem:[%s6878_s3 + $0x340] ss:$16 sps:$4 sm:$0xff]  }
  0xbc   :  { %696 = vmatpush1.bf16.msra.mxu0 %v5487_v46  ;;  %737 = vmatpush1.bf16.msra.mxu1 %v5496_v52  ;;  %v5637_v46 = vld [vmem:[#allocation10 + $0x54] ss:$8 sps:$4 sm:$0xff]   ;;  %v5638_v52 = vld [vmem:[#allocation10 + $0x60] ss:$8 sps:$4 sm:$0xff]  }
  0xbd   :  { %697 = vmatprep.subr.bf16.mxu0 %v5491_v48  ;;  %738 = vmatprep.subr.bf16.mxu1 %v5500_v54  ;;  %v5635_v48 = vld [vmem:[#allocation10 + $0x50] ss:$8 sps:$4 sm:$0xff]   ;;  %v5643_v54 = vld [vmem:[#allocation10 + $0x74] ss:$8 sps:$4 sm:$0xff]  }
  0xc0   :  { %698 = vmatpush1.bf16.msra.mxu0 %v5493_v50  ;;  %739 = vmatpush1.bf16.msra.mxu1 %v5502_v58  ;;  %v5640_v50 = vld [vmem:[#allocation10 + $0x64] ss:$8 sps:$4 sm:$0xff]  }
  0xc1   :  { %699 = vmatprep.subr.bf16.mxu0 %v5497_v55  ;;  %740 = vmatprep.subr.bf16.mxu1 %v5506_v59  ;;  %v5560_v55 = vld [vmem:[%s6878_s3 + $0x380] ss:$16 sps:$4 sm:$0xff]  }
  0xc2   :  { %v5646_v58 = vld [vmem:[#allocation10 + $0x84] ss:$8 sps:$4 sm:$0xff]  }
  0xc3   :  { %v5563_v59 = vld [vmem:[%s6878_s3 + $0x3a0] ss:$16 sps:$4 sm:$0xff]  }
  0xc4   :  { %700 = vmatpush1.bf16.msra.mxu0 %v5499_v57  ;;  %741 = vmatpush1.bf16.msra.mxu1 %v5508_v62  ;;  %v5565_v57 = vld [vmem:[%s6878_s3 + $0x3a4] ss:$16 sps:$4 sm:$0xff]  }
  0xc5   :  { %701 = vmatprep.subr.bf16.mxu0 %v5503_v60  ;;  %742 = vmatprep.subr.bf16.mxu1 %v5512_v63  ;;  %v5644_v60 = vld [vmem:[#allocation10 + $0x80] ss:$8 sps:$4 sm:$0xff]   ;;  %v5649_v62 = vld [vmem:[#allocation10 + $0x94] ss:$8 sps:$4 sm:$0xff]  }
  0xc6   :  { %v5566_v63 = vld [vmem:[%s6878_s3 + $0x3c0] ss:$16 sps:$4 sm:$0xff]  }
  0xc8   :  { %702 = vmatpush1.bf16.msra.mxu0 %v5505_v61  ;;  %743 = vmatpush1.bf16.msra.mxu1 %v5514_v2  ;;  %v5568_v61 = vld [vmem:[%s6878_s3 + $0x3c4] ss:$16 sps:$4 sm:$0xff]  }
  0xc9   :  { %703 = vmatprep.subr.bf16.mxu0 %v5509_v0  ;;  %744 = vmatprep.subr.bf16.mxu1 %v5518_v3  ;;  %v5647_v0 = vld [vmem:[#allocation10 + $0x90] ss:$8 sps:$4 sm:$0xff]   ;;  %v5652_v2 = vld [vmem:[#allocation10 + $0xa4] ss:$8 sps:$4 sm:$0xff]  }
  0xca   :  { %v5569_v3 = vld [vmem:[%s6878_s3 + $0x3e0] ss:$16 sps:$4 sm:$0xff]  }
  0xcc   :  { %704 = vmatpush1.bf16.msra.mxu0 %v5511_v1  ;;  %745 = vmatpush1.bf16.msra.mxu1 %v5520_v6  ;;  %v5571_v1 = vld [vmem:[%s6878_s3 + $0x3e4] ss:$16 sps:$4 sm:$0xff]  }
  0xcd   :  { %705 = vmatprep.subr.bf16.mxu0 %v5515_v4  ;;  %746 = vmatprep.subr.bf16.mxu1 %v5521_v7  ;;  %v5650_v4 = vld [vmem:[#allocation10 + $0xa0] ss:$8 sps:$4 sm:$0xff]   ;;  %v5655_v6 = vld [vmem:[#allocation10 + $0xb4] ss:$8 sps:$4 sm:$0xff]  }
  0xce   :  { %v5572_v7 = vld [vmem:[%s6878_s3 + $0x208] ss:$16 sps:$4 sm:$0xff]  }
  0xd0   :  { %706 = vmatpush1.bf16.msra.mxu0 %v5517_v5  ;;  %747 = vmatpush1.bf16.msra.mxu1 %v5523_v9  ;;  %v5574_v5 = vld [vmem:[%s6878_s3 + $0x20c] ss:$16 sps:$4 sm:$0xff]  }
  0xd1   :  { %1616 = vmatprep.subr.bf16.mxu1 %v5526_v10  ;;  %1038 = vmatprep.subr.bf16.mxu0 %v5622_v28  ;;  %v5653_v9 = vld [vmem:[#allocation10 + $0xb0] ss:$8 sps:$4 sm:$0xff]   ;;  %v5658_v10 = vld [vmem:[#allocation10 + $0xc4] ss:$8 sps:$4 sm:$0xff]  }
  0xd2   :  { %v5665_v28 = vld [vmem:[#allocation10 + $0xf0] ss:$8 sps:$4 sm:$0xff]  }
  0xd3   :  { %708 = vmatmul.mubr.bf16.vlgmr.msra.gmra.mrb[0].mxu0 %v345_v8  ;;  %749 = vmatmul.mubr.bf16.vlgmr.msra.gmra.mrb[0].mxu1 %v345_v8  ;;  %v5577_v8 = vld [vmem:[%s6878_s3 + $0x22c] ss:$16 sps:$4 sm:$0xff]  }
  0xd4   :  { %1617 = vmatpush1.bf16.msra.mxu1 %v5524_v12  ;;  %1648 = vmatprep.mubr.bf16.mxu1 %v6427_v16  ;;  %v5580_v12 = vld [vmem:[%s6878_s3 + $0x24c] ss:$16 sps:$4 sm:$0xff]  }
  0xd5   :  { %1618 = vmatprep.subr.bf16.mxu1 %v5529_v15  ;;  %1039 = vmatpush1.bf16.msra.mxu0 %v5620_v27  ;;  %v5661_v15 = vld [vmem:[#allocation10 + $0xd4] ss:$8 sps:$4 sm:$0xff]  }
  0xd6   :  { %1040 = vmatprep.subr.bf16.mxu0 %v5625_v29  ;;  %v5667_v27 = vld [vmem:[#allocation10 + $0xf4] ss:$8 sps:$4 sm:$0xff]  }
  0xd7   :  { %v5590_v29 = vld [vmem:[%s6878_s3 + $0x2c8] ss:$16 sps:$4 sm:$0xff]  }
  0xd8   :  { %1619 = vmatpush1.bf16.msra.mxu1 %v5527_v17  ;;  %v5578_v17 = vld [vmem:[%s6878_s3 + $0x248] ss:$16 sps:$4 sm:$0xff]  }
  0xd9   :  { %1620 = vmatprep.subr.bf16.mxu1 %v5532_v18  ;;  %1041 = vmatpush1.bf16.msra.mxu0 %v5623_v31  ;;  %v5583_v18 = vld [vmem:[%s6878_s3 + $0x26c] ss:$16 sps:$4 sm:$0xff]  }
  0xda   :  { %1042 = vmatprep.subr.bf16.mxu0 %v5628_v33  ;;  %v5670_v31 = vld [vmem:[#allocation10 + $0x104] ss:$8 sps:$4 sm:$0xff]  }
  0xdb   :  { %v5598_v33 = vld [vmem:[%s6878_s3 + $0x30c] ss:$16 sps:$4 sm:$0xff]  }
  0xdc   :  { %1621 = vmatpush1.bf16.msra.mxu1 %v5530_v19  ;;  %v5659_v19 = vld [vmem:[#allocation10 + $0xd0] ss:$8 sps:$4 sm:$0xff]  }
  0xdd   :  { %1622 = vmatprep.subr.bf16.mxu1 %v5535_v20  ;;  %1043 = vmatpush1.bf16.msra.mxu0 %v5626_v35  ;;  %v5586_v20 = vld [vmem:[%s6878_s3 + $0x28c] ss:$16 sps:$4 sm:$0xff]  }
  0xde   :  { %1044 = vmatprep.subr.bf16.mxu0 %v5631_v37  ;;  %v5601_v35 = vld [vmem:[%s6878_s3 + $0x32c] ss:$16 sps:$4 sm:$0xff]  }
  0xdf   :  { %v5604_v37 = vld [vmem:[%s6878_s3 + $0x34c] ss:$16 sps:$4 sm:$0xff]  }
  0xe0   :  { %1623 = vmatpush1.bf16.msra.mxu1 %v5533_v21  ;;  %v5584_v21 = vld [vmem:[%s6878_s3 + $0x288] ss:$16 sps:$4 sm:$0xff]  }
  0xe1   :  { %1624 = vmatprep.subr.bf16.mxu1 %v5538_v22  ;;  %1045 = vmatpush1.bf16.msra.mxu0 %v5629_v39  ;;  %v5589_v22 = vld [vmem:[%s6878_s3 + $0x2ac] ss:$16 sps:$4 sm:$0xff]  }
  0xe2   :  { %1046 = vmatprep.subr.bf16.mxu0 %v5634_v41  ;;  %v5607_v39 = vld [vmem:[%s6878_s3 + $0x36c] ss:$16 sps:$4 sm:$0xff]  }
  0xe3   :  { %v5610_v41 = vld [vmem:[%s6878_s3 + $0x38c] ss:$16 sps:$4 sm:$0xff]  }
  0xe4   :  { %1625 = vmatpush1.bf16.msra.mxu1 %v5536_v23  ;;  %v5664_v23 = vld [vmem:[#allocation10 + $0xe4] ss:$8 sps:$4 sm:$0xff]  }
  0xe5   :  { %1626 = vmatprep.subr.bf16.mxu1 %v5541_v24  ;;  %1047 = vmatpush1.bf16.msra.mxu0 %v5632_v44  ;;  %v5662_v24 = vld [vmem:[#allocation10 + $0xe0] ss:$8 sps:$4 sm:$0xff]  }
  0xe6   :  { %1048 = vmatprep.subr.bf16.mxu0 %v5637_v46  ;;  %v5613_v44 = vld [vmem:[%s6878_s3 + $0x3ac] ss:$16 sps:$4 sm:$0xff]  }
  0xe7   :  { %v5616_v46 = vld [vmem:[%s6878_s3 + $0x3cc] ss:$16 sps:$4 sm:$0xff]  }
  0xe8   :  { %1627 = vmatpush1.bf16.msra.mxu1 %v5539_v25  ;;  %v5587_v25 = vld [vmem:[%s6878_s3 + $0x2a8] ss:$16 sps:$4 sm:$0xff]  }
  0xe9   :  { %1628 = vmatprep.subr.bf16.mxu1 %v5544_v26  ;;  %1049 = vmatpush1.bf16.msra.mxu0 %v5635_v48  ;;  %v5592_v26 = vld [vmem:[%s6878_s3 + $0x2cc] ss:$16 sps:$4 sm:$0xff]  }
  0xea   :  { %1050 = vmatprep.subr.bf16.mxu0 %v5640_v50  ;;  %v5619_v48 = vld [vmem:[%s6878_s3 + $0x3ec] ss:$16 sps:$4 sm:$0xff]   ;;  %v6617_v50 = vsub.s32 0, %v6341_v43 }
  0xec   :  { %1629 = vmatpush1.bf16.msra.mxu1 %v5542_v30  ;;  %v5595_v30 = vld [vmem:[%s6878_s3 + $0x2ec] ss:$16 sps:$4 sm:$0xff]  }
  0xed   :  { %1630 = vmatprep.subr.bf16.mxu1 %v5547_v32  ;;  %1051 = vmatpush1.bf16.msra.mxu0 %v5638_v52  ;;  %v5593_v32 = vld [vmem:[%s6878_s3 + $0x2e8] ss:$16 sps:$4 sm:$0xff]   ;;  %v6620_v52 = vsub.s32 1, %v6341_v43 }
  0xee   :  { %1052 = vmatprep.subr.bf16.mxu0 %v5643_v54  ;;  %v6624_v54 = vsub.s32 3, %v6341_v43 }
  0xf0   :  { %1631 = vmatpush1.bf16.msra.mxu1 %v5545_v34  ;;  %v5596_v34 = vld [vmem:[%s6878_s3 + $0x308] ss:$16 sps:$4 sm:$0xff]  }
  0xf1   :  { %1632 = vmatprep.subr.bf16.mxu1 %v5550_v36  ;;  %1053 = vmatpush1.bf16.msra.mxu0 %v5641_v56  ;;  %v5599_v36 = vld [vmem:[%s6878_s3 + $0x328] ss:$16 sps:$4 sm:$0xff]  }
  0xf2   :  { %1054 = vmatprep.subr.bf16.mxu0 %v5646_v58 }
  0xf4   :  { %1633 = vmatpush1.bf16.msra.mxu1 %v5548_v38  ;;  %v5602_v38 = vld [vmem:[%s6878_s3 + $0x348] ss:$16 sps:$4 sm:$0xff]  }
  0xf5   :  { %1634 = vmatprep.subr.bf16.mxu1 %v5553_v40  ;;  %1055 = vmatpush1.bf16.msra.mxu0 %v5644_v60  ;;  %v5605_v40 = vld [vmem:[%s6878_s3 + $0x368] ss:$16 sps:$4 sm:$0xff]  }
  0xf6   :  { %1056 = vmatprep.subr.bf16.mxu0 %v5649_v62 }
  0xf8   :  { %1635 = vmatpush1.bf16.msra.mxu1 %v5551_v42  ;;  %v5608_v42 = vld [vmem:[%s6878_s3 + $0x388] ss:$16 sps:$4 sm:$0xff]  }
  0xf9   :  { %1636 = vmatprep.subr.bf16.mxu1 %v5556_v45  ;;  %1057 = vmatpush1.bf16.msra.mxu0 %v5647_v0  ;;  %v5611_v45 = vld [vmem:[%s6878_s3 + $0x3a8] ss:$16 sps:$4 sm:$0xff]  }
  0xfa   :  { %1058 = vmatprep.subr.bf16.mxu0 %v5652_v2 }
  0xfc   :  { %1637 = vmatpush1.bf16.msra.mxu1 %v5554_v47  ;;  %v5614_v47 = vld [vmem:[%s6878_s3 + $0x3c8] ss:$16 sps:$4 sm:$0xff]  }
  0xfd   :  { %1638 = vmatprep.subr.bf16.mxu1 %v5559_v49  ;;  %1059 = vmatpush1.bf16.msra.mxu0 %v5650_v4  ;;  %v5617_v49 = vld [vmem:[%s6878_s3 + $0x3e8] ss:$16 sps:$4 sm:$0xff]  }
  0xfe   :  { %1060 = vmatprep.subr.bf16.mxu0 %v5655_v6 }
 0x100   :  { %1639 = vmatpush1.bf16.msra.mxu1 %v5557_v51  ;;  %v256_v51 = vld [vmem:[#allocation9] ss:$8 sm:$0xf] }
 0x101   :  { %1640 = vmatprep.subr.bf16.mxu1 %v5562_v53  ;;  %1061 = vmatpush1.bf16.msra.mxu0 %v5653_v9  ;;  %v313_v53 = vrot.slane %v256_v51, %v6617_v50  ;;  %v5668_v9 = vld [vmem:[#allocation10 + $0x100] ss:$8 sps:$4 sm:$0xff]  }
 0x102   :  { %1062 = vmatprep.subr.bf16.mxu0 %v5658_v10 }
 0x104   :  { %1641 = vmatpush1.bf16.msra.mxu1 %v5560_v55  ;;  %v317_v55 = vrot.slane %v256_v51, %v6620_v52 }
 0x105   :  { %1642 = vmatprep.subr.bf16.mxu1 %v5565_v57  ;;  %1063 = vmatpush1.bf16.msra.mxu0 %v5656_v13 }
 0x106   :  { %1064 = vmatprep.subr.bf16.mxu0 %v5661_v15  ;;  %v5671_v15 = vld [vmem:[#allocation10 + $0x110] ss:$8 sps:$4 sm:$0xff]  }
 0x108   :  { %1643 = vmatpush1.bf16.msra.mxu1 %v5563_v59  ;;  %v325_v59 = vrot.slane %v256_v51, %v6624_v54 }
 0x109   :  { %1644 = vmatprep.subr.bf16.mxu1 %v5568_v61  ;;  %1065 = vmatpush1.bf16.msra.mxu0 %v5659_v19  ;;  %v5679_v19 = vld [vmem:[#allocation10 + $0x134] ss:$8 sps:$4 sm:$0xff]  }
 0x10a   :  { %1066 = vmatprep.subr.bf16.mxu0 %v5664_v23  ;;  %v6630_v23 = vsub.s32 2, %v6341_v43 }
 0x10c   :  { %1645 = vmatpush1.bf16.msra.mxu1 %v5566_v63 }
 0x10d   :  { %1646 = vmatprep.subr.bf16.mxu1 %v5571_v1  ;;  %1067 = vmatpush1.bf16.msra.mxu0 %v5662_v24  ;;  %v5683_v24 = vld [vmem:[#allocation10 + $0x150] ss:$8 sps:$4 sm:$0xff]  }
 0x10e   :  { %1068 = vmatprep.subr.bf16.mxu0 %v5667_v27  ;;  %v5686_v27 = vld [vmem:[#allocation10 + $0x160] ss:$8 sps:$4 sm:$0xff]  }
 0x110   :  { %1647 = vmatpush1.bf16.msra.mxu1 %v5569_v3 }
 0x111   :  { %1657 = vmatprep.subr.bf16.mxu1 %v5574_v5  ;;  %1069 = vmatpush1.bf16.msra.mxu0 %v5665_v28  ;;  %v5691_v28 = vld [vmem:[#allocation10 + $0x174] ss:$8 sps:$4 sm:$0xff]  }
 0x112   :  { %1079 = vmatprep.subr.bf16.mxu0 %v5670_v31  ;;  %v5694_v31 = vld [vmem:[#allocation10 + $0x184] ss:$8 sps:$4 sm:$0xff]  }
 0x113   :  { %1649 = vmatmul.mubr.bf16.vlgmr.msra.gmra.mrb[4].mxu1 %v6422_v14 }
 0x114   :  { %1658 = vmatpush1.bf16.msra.mxu1 %v5572_v7  ;;  %1689 = vmatprep.mubr.bf16.mxu1 %v6427_v16  ;;  %v5581_v16 = vld [vmem:[%s6878_s3 + $0x268] ss:$16 sps:$4 sm:$0xff]  }
 0x115   :  { %1659 = vmatprep.subr.bf16.mxu1 %v5577_v8 }
 0x118   :  { %1660 = vmatpush1.bf16.msra.mxu1 %v5575_v11  ;;  %v5673_v11 = vld [vmem:[#allocation10 + $0x114] ss:$8 sps:$4 sm:$0xff]  }
 0x119   :  { %1661 = vmatprep.subr.bf16.mxu1 %v5580_v12 }
 0x11c   :  { %1662 = vmatpush1.bf16.msra.mxu1 %v5578_v17  ;;  %v5676_v17 = vld [vmem:[#allocation10 + $0x124] ss:$8 sps:$4 sm:$0xff]  }
 0x11d   :  { %1663 = vmatprep.subr.bf16.mxu1 %v5583_v18  ;;  %v5674_v18 = vld [vmem:[#allocation10 + $0x120] ss:$8 sps:$4 sm:$0xff]  }
 0x120   :  { %1664 = vmatpush1.bf16.msra.mxu1 %v5581_v16  ;;  %v5677_v16 = vld [vmem:[#allocation10 + $0x130] ss:$8 sps:$4 sm:$0xff]  }
 0x121   :  { %1665 = vmatprep.subr.bf16.mxu1 %v5586_v20  ;;  %v5682_v20 = vld [vmem:[#allocation10 + $0x144] ss:$8 sps:$4 sm:$0xff]  }
 0x124   :  { %1666 = vmatpush1.bf16.msra.mxu1 %v5584_v21  ;;  %v5680_v21 = vld [vmem:[#allocation10 + $0x140] ss:$8 sps:$4 sm:$0xff]  }
 0x125   :  { %1667 = vmatprep.subr.bf16.mxu1 %v5589_v22  ;;  %v5685_v22 = vld [vmem:[#allocation10 + $0x154] ss:$8 sps:$4 sm:$0xff]  }
 0x128   :  { %1668 = vmatpush1.bf16.msra.mxu1 %v5587_v25  ;;  %v5688_v25 = vld [vmem:[#allocation10 + $0x164] ss:$8 sps:$4 sm:$0xff]  }
 0x129   :  { %1669 = vmatprep.subr.bf16.mxu1 %v5592_v26  ;;  %v321_v26 = vrot.slane %v256_v51, %v6630_v23  ;;  %v5715_v51 = vld [vmem:[#allocation10 + $0x1f4] ss:$8 sps:$4 sm:$0xff]  }
 0x12c   :  { %1670 = vmatpush1.bf16.msra.mxu1 %v5590_v29 }
 0x12d   :  { %1671 = vmatprep.subr.bf16.mxu1 %v5595_v30  ;;  %v5689_v30 = vld [vmem:[#allocation10 + $0x170] ss:$8 sps:$4 sm:$0xff]  }
 0x130   :  { %1672 = vmatpush1.bf16.msra.mxu1 %v5593_v32 }
 0x131   :  { %1673 = vmatprep.subr.bf16.mxu1 %v5598_v33  ;;  %v5692_v33 = vld [vmem:[#allocation10 + $0x180] ss:$8 sps:$4 sm:$0xff]  }
 0x134   :  { %1674 = vmatpush1.bf16.msra.mxu1 %v5596_v34  ;;  %v5697_v34 = vld [vmem:[#allocation10 + $0x194] ss:$8 sps:$4 sm:$0xff]  }
 0x135   :  { %1675 = vmatprep.subr.bf16.mxu1 %v5601_v35 }
 0x138   :  { %1676 = vmatpush1.bf16.msra.mxu1 %v5599_v36  ;;  %v5695_v36 = vld [vmem:[#allocation10 + $0x190] ss:$8 sps:$4 sm:$0xff]  }
 0x139   :  { %1677 = vmatprep.subr.bf16.mxu1 %v5604_v37 }
 0x13c   :  { %1678 = vmatpush1.bf16.msra.mxu1 %v5602_v38  ;;  %v5700_v38 = vld [vmem:[#allocation10 + $0x1a4] ss:$8 sps:$4 sm:$0xff]  }
 0x13d   :  { %1679 = vmatprep.subr.bf16.mxu1 %v5607_v39  ;;  %v5698_v39 = vld [vmem:[#allocation10 + $0x1a0] ss:$8 sps:$4 sm:$0xff]  }
 0x140   :  { %1680 = vmatpush1.bf16.msra.mxu1 %v5605_v40  ;;  %v5703_v40 = vld [vmem:[#allocation10 + $0x1b4] ss:$8 sps:$4 sm:$0xff]  }
 0x141   :  { %1681 = vmatprep.subr.bf16.mxu1 %v5610_v41  ;;  %v5701_v41 = vld [vmem:[#allocation10 + $0x1b0] ss:$8 sps:$4 sm:$0xff]  }
 0x144   :  { %1682 = vmatpush1.bf16.msra.mxu1 %v5608_v42  ;;  %v5706_v42 = vld [vmem:[#allocation10 + $0x1c4] ss:$8 sps:$4 sm:$0xff]  }
 0x145   :  { %1683 = vmatprep.subr.bf16.mxu1 %v5613_v44  ;;  %v5704_v44 = vld [vmem:[#allocation10 + $0x1c0] ss:$8 sps:$4 sm:$0xff]  }
 0x148   :  { %1684 = vmatpush1.bf16.msra.mxu1 %v5611_v45  ;;  %v5709_v45 = vld [vmem:[#allocation10 + $0x1d4] ss:$8 sps:$4 sm:$0xff]  }
 0x149   :  { %1685 = vmatprep.subr.bf16.mxu1 %v5616_v46  ;;  %v5707_v46 = vld [vmem:[#allocation10 + $0x1d0] ss:$8 sps:$4 sm:$0xff]  }
 0x14c   :  { %1686 = vmatpush1.bf16.msra.mxu1 %v5614_v47  ;;  %v5712_v47 = vld [vmem:[#allocation10 + $0x1e4] ss:$8 sps:$4 sm:$0xff]  }
 0x14d   :  { %1687 = vmatprep.subr.bf16.mxu1 %v5619_v48  ;;  %v6633_v48 = vld [vmem:[#allocation9 + $0x1] ss:$8 sm:$0xf] }
 0x150   :  { %1688 = vmatpush1.bf16.msra.mxu1 %v5617_v49  ;;  %v5710_v49 = vld [vmem:[#allocation10 + $0x1e0] ss:$8 sps:$4 sm:$0xff]  }
 0x153   :  { %1690 = vmatmul.mubr.bf16.vlgmr.msra.gmra.mrb[8].mxu1 %v6422_v14 }
 0x1a6   :  { %v709_v56 = vpop.f32.mrb[0].mxu0  ;;  %v750_v63 = vpop.f32.mrb[0].mxu1 }
 0x1a7   :  { %v710_v57 = vadd.f32 %v709_v56, %v313_v53  ;;  %v711_v58 = vpop.f32.mrb[1].mxu0  ;;  %v752_v1 = vpop.f32.mrb[1].mxu1  ;;  %v751_v29 = vadd.f32 %v750_v63, %v321_v26  ;;  %v1258_v53 = vrot.slane %v6633_v48, %v6620_v52  ;;  %v5721_v63 = vld [vmem:[#allocation10 + $0x214] ss:$8 sps:$4 sm:$0xff]   ;;  %v5748_v26 = vld [vmem:[#allocation10 + $0x2a4] ss:$8 sps:$4 sm:$0xff]  }
 0x1a8   :  { %v712_v14 = vadd.f32 %v711_v58, %v317_v55  ;;  %v713_v60 = vpop.f32.mrb[2].mxu0  ;;  %v753_v3 = vadd.f32 %v752_v1, %v325_v59  ;;  %v754_v4 = vpop.f32.mrb[2].mxu1  ;;  %v5713_v55 = vld [vmem:[#allocation10 + $0x1f0] ss:$8 sps:$4 sm:$0xff]   ;;  %v5718_v58 = vld [vmem:[#allocation10 + $0x204] ss:$8 sps:$4 sm:$0xff]  }
 0x1a9   :  { %vm757_vm0 = vcmp.ge.f32.partialorder %v710_v57, 0.0  ;;  %v761_v61 = vmul.f32 0.2, %v710_v57  ;;  %v714_v62 = vpop.f32.mrb[3].mxu0  ;;  %v755_v5 = vpop.f32.mrb[3].mxu1  ;;  %vm759_vm4 = vcmp.ge.f32.partialorder %v751_v29, 0.0 }
 0x1aa   :  { %vm758_vm1 = vcmp.ge.f32.partialorder %v712_v14, 0.0  ;;  %v762_v0 = vmul.f32 0.2, %v712_v14  ;;  %vm760_vm2 = vcmp.ge.f32.partialorder %v753_v3, 0.0  ;;  %v764_v7 = vmul.f32 0.2, %v753_v3 }
 0x1ab   :  { %v765_v2 = vsel %vm757_vm0, %v710_v57, %v761_v61  ;;  %v763_v32 = vmul.f32 0.2, %v751_v29  ;;  %v5716_v62 = vld [vmem:[#allocation10 + $0x200] ss:$8 sps:$4 sm:$0xff]   ;;  %v5727_v5 = vld [vmem:[#allocation10 + $0x234] ss:$8 sps:$4 sm:$0xff]  }
 0x1ac   :  { %v766_v6 = vsel %vm758_vm1, %v712_v14, %v762_v0  ;;  %v769_v10 = vpack.c.bf16 %v765_v2, %v765_v2  ;;  %v768_v12 = vsel %vm760_vm2, %v753_v3, %v764_v7  ;;  %v5719_v2 = vld [vmem:[#allocation10 + $0x210] ss:$8 sps:$4 sm:$0xff]   ;;  %v5724_v3 = vld [vmem:[#allocation10 + $0x224] ss:$8 sps:$4 sm:$0xff]   ;;  %v5722_v4 = vld [vmem:[#allocation10 + $0x220] ss:$8 sps:$4 sm:$0xff]  }
 0x1ad   :  { %v770_v8 = vpack.c.bf16 %v766_v6, %v766_v6  ;;  %v772_v13 = vpack.c.bf16 %v768_v12, %v768_v12  ;;  %v767_v35 = vsel %vm759_vm4, %v751_v29, %v763_v32  ;;  %v5725_v6 = vld [vmem:[#allocation10 + $0x230] ss:$8 sps:$4 sm:$0xff]   ;;  %v5730_v7 = vld [vmem:[#allocation10 + $0x244] ss:$8 sps:$4 sm:$0xff]   ;;  %v1254_v12 = vrot.slane %v6633_v48, %v6617_v50  ;;  %v5757_v32 = vld [vmem:[#allocation10 + $0x2d4] ss:$8 sps:$4 sm:$0xff]  }
 0x1ae   :  { %v771_v37 = vpack.c.bf16 %v767_v35, %v767_v35  ;;  %v5749_v29 = vld [vmem:[#allocation10 + $0x2b0] ss:$8 sps:$4 sm:$0xff]   ;;  %v5758_v35 = vld [vmem:[#allocation10 + $0x2e0] ss:$8 sps:$4 sm:$0xff]  }
 0x1af   :  { %1070 = vmatprep.mubr.bf16.mxu0 %v770_v8  ;;  %v5728_v8 = vld [vmem:[#allocation10 + $0x240] ss:$8 sps:$4 sm:$0xff]  }
 0x1b0   :  { %1071 = vmatmul.mubr.bf16.vlgmr.msra.gmra.mrb[4].mxu0 %v769_v10  ;;  %v5731_v10 = vld [vmem:[#allocation10 + $0x250] ss:$8 sps:$4 sm:$0xff]  }
 0x1b1   :  { %1080 = vmatpush1.bf16.msra.mxu0 %v5668_v9  ;;  %5089 = vmatprep.mubr.msk.bf16.mxu0 %vm1034_vm3, %v772_v13  ;;  %v5733_v9 = vld [vmem:[#allocation10 + $0x254] ss:$8 sps:$4 sm:$0xff]   ;;  %v5734_v13 = vld [vmem:[#allocation10 + $0x260] ss:$8 sps:$4 sm:$0xff]  }
 0x1b2   :  { %1081 = vmatprep.subr.bf16.mxu0 %v5673_v11  ;;  %v5736_v11 = vld [vmem:[#allocation10 + $0x264] ss:$8 sps:$4 sm:$0xff]  }
 0x1b5   :  { %1082 = vmatpush1.bf16.msra.mxu0 %v5671_v15  ;;  %v5739_v15 = vld [vmem:[#allocation10 + $0x274] ss:$8 sps:$4 sm:$0xff]  }
 0x1b6   :  { %1083 = vmatprep.subr.bf16.mxu0 %v5676_v17 }
 0x1b9   :  { %1084 = vmatpush1.bf16.msra.mxu0 %v5674_v18  ;;  %v5737_v18 = vld [vmem:[#allocation10 + $0x270] ss:$8 sps:$4 sm:$0xff]  }
 0x1ba   :  { %1085 = vmatprep.subr.bf16.mxu0 %v5679_v19  ;;  %v5742_v19 = vld [vmem:[#allocation10 + $0x284] ss:$8 sps:$4 sm:$0xff]  }
 0x1bd   :  { %1086 = vmatpush1.bf16.msra.mxu0 %v5677_v16 }
 0x1be   :  { %1087 = vmatprep.subr.bf16.mxu0 %v5682_v20  ;;  %v5740_v20 = vld [vmem:[#allocation10 + $0x280] ss:$8 sps:$4 sm:$0xff]  }
 0x1c1   :  { %1088 = vmatpush1.bf16.msra.mxu0 %v5680_v21  ;;  %v5745_v21 = vld [vmem:[#allocation10 + $0x294] ss:$8 sps:$4 sm:$0xff]  }
 0x1c2   :  { %1089 = vmatprep.subr.bf16.mxu0 %v5685_v22 }
 0x1c5   :  { %1090 = vmatpush1.bf16.msra.mxu0 %v5683_v24  ;;  %v5743_v24 = vld [vmem:[#allocation10 + $0x290] ss:$8 sps:$4 sm:$0xff]  }
 0x1c6   :  { %1091 = vmatprep.subr.bf16.mxu0 %v5688_v25 }
 0x1c9   :  { %1092 = vmatpush1.bf16.msra.mxu0 %v5686_v27  ;;  %v5746_v27 = vld [vmem:[#allocation10 + $0x2a0] ss:$8 sps:$4 sm:$0xff]  }
 0x1ca   :  { %1093 = vmatprep.subr.bf16.mxu0 %v5691_v28  ;;  %v5751_v28 = vld [vmem:[#allocation10 + $0x2b4] ss:$8 sps:$4 sm:$0xff]  }
 0x1cd   :  { %1094 = vmatpush1.bf16.msra.mxu0 %v5689_v30  ;;  %v5754_v30 = vld [vmem:[#allocation10 + $0x2c4] ss:$8 sps:$4 sm:$0xff]  }
 0x1ce   :  { %1095 = vmatprep.subr.bf16.mxu0 %v5694_v31  ;;  %v5752_v31 = vld [vmem:[#allocation10 + $0x2c0] ss:$8 sps:$4 sm:$0xff]  }
 0x1d1   :  { %1096 = vmatpush1.bf16.msra.mxu0 %v5692_v33  ;;  %v5755_v33 = vld [vmem:[#allocation10 + $0x2d0] ss:$8 sps:$4 sm:$0xff]  }
 0x1d2   :  { %1978 = vmatprep.subr.bf16.mxu0 %v5697_v34  ;;  %v5760_v34 = vld [vmem:[#allocation10 + $0x2e4] ss:$8 sps:$4 sm:$0xff]  }
 0x1d4   :  { %1112 = vmatmul.mubr.bf16.vlgmr.msra.gmra.mrb[4].mxu0 %v771_v37  ;;  %v5763_v37 = vld [vmem:[#allocation10 + $0x2f4] ss:$8 sps:$4 sm:$0xff]  }
 0x1d5   :  { %1979 = vmatpush1.bf16.msra.mxu0 %v5695_v36  ;;  %v1262_v36 = vrot.slane %v6633_v48, %v6630_v23 }
 0x1d6   :  { %1980 = vmatprep.subr.bf16.mxu0 %v5700_v38  ;;  %v1266_v38 = vrot.slane %v6633_v48, %v6624_v54 }
 0x1d9   :  { %1981 = vmatpush1.bf16.msra.mxu0 %v5698_v39 }
 0x1da   :  { %1982 = vmatprep.subr.bf16.mxu0 %v5703_v40  ;;  %v5761_v40 = vld [vmem:[#allocation10 + $0x2f0] ss:$8 sps:$4 sm:$0xff]  }
 0x1dd   :  { %1983 = vmatpush1.bf16.msra.mxu0 %v5701_v41 }
 0x1de   :  { %1984 = vmatprep.subr.bf16.mxu0 %v5706_v42 }
 0x1e1   :  { %1985 = vmatpush1.bf16.msra.mxu0 %v5704_v44  ;;  %v5766_v44 = vld [vmem:[#allocation10 + $0x304] ss:$8 sps:$4 sm:$0xff]  }
 0x1e2   :  { %1986 = vmatprep.subr.bf16.mxu0 %v5709_v45 }
 0x1e5   :  { %1987 = vmatpush1.bf16.msra.mxu0 %v5707_v46 }
 0x1e6   :  { %1988 = vmatprep.subr.bf16.mxu0 %v5712_v47  ;;  %v1650_v56 = vpop.f32.mrb[4].mxu1 }
 0x1e7   :  { %v1652_v57 = vpop.f32.mrb[5].mxu1  ;;  %v1651_v17 = vadd.f32 %v1650_v56, %v1254_v12  ;;  %v5776_v56 = vld [vmem:[#allocation13 + $0x4] ss:$8 sps:$4 sm:$0xff]  }
 0x1e8   :  { %v1653_v59 = vadd.f32 %v1652_v57, %v1258_v53  ;;  %v1654_v14 = vpop.f32.mrb[6].mxu1  ;;  %v5769_v53 = vld [vmem:[#allocation10 + $0x314] ss:$8 sps:$4 sm:$0xff]   ;;  %2535 = vmatprep.subr.bf16.mxu1 %v5776_v56 }
 0x1e9   :  { %1989 = vmatpush1.bf16.msra.mxu0 %v5710_v49  ;;  %v1655_v60 = vpop.f32.mrb[7].mxu1  ;;  %v1702_v16 = vmul.f32 0.2, %v1651_v17  ;;  %vm1698_vm6 = vcmp.ge.f32.partialorder %v1651_v17, 0.0  ;;  %v2068_v12 = vld [vmem:[#allocation7] sm:$0x1] }
 0x1ea   :  { %1990 = vmatprep.subr.bf16.mxu0 %v5715_v51  ;;  %vm1699_vm5 = vcmp.ge.f32.partialorder %v1653_v59, 0.0  ;;  %v1703_v61 = vmul.f32 0.2, %v1653_v59  ;;  %v5764_v51 = vld [vmem:[#allocation10 + $0x300] ss:$8 sps:$4 sm:$0xff]  }
 0x1eb   :  { %v1706_v22 = vsel %vm1698_vm6, %v1651_v17, %v1702_v16  ;;  %v5767_v60 = vld [vmem:[#allocation10 + $0x310] ss:$8 sps:$4 sm:$0xff]   ;;  %v5791_v17 = vld [vmem:[#allocation13 + $0x54] ss:$8 sps:$4 sm:$0xff]  }
 0x1ec   :  { %v1707_v0 = vsel %vm1699_vm5, %v1653_v59, %v1703_v61  ;;  %v1710_v25 = vpack.c.bf16 %v1706_v22, %v1706_v22  ;;  %v5779_v59 = vld [vmem:[#allocation13 + $0x14] ss:$8 sps:$4 sm:$0xff]   ;;  %v5777_v61 = vld [vmem:[#allocation13 + $0x10] ss:$8 sps:$4 sm:$0xff]   ;;  %v5792_v16 = vld [vmem:[#allocation13 + $0x60] ss:$8 sps:$4 sm:$0xff]  }
 0x1ed   :  { %1991 = vmatpush1.bf16.msra.mxu0 %v5713_v55  ;;  %v1711_v1 = vpack.c.bf16 %v1707_v0, %v1707_v0  ;;  %v5774_v55 = vld [vmem:[#allocation13] ss:$8 sps:$4 sm:$0xff]   ;;  %v5782_v0 = vld [vmem:[#allocation13 + $0x24] ss:$8 sps:$4 sm:$0xff]  }
 0x1ee   :  { %1992 = vmatprep.subr.bf16.mxu0 %v5718_v58  ;;  %v2069_v58 = vld [vmem:[#allocation12] sm:$0xff]  ;;  %2536 = vmatpush1.bf16.msra.mxu1 %v5774_v55  ;;  %v5800_v22 = vld [vmem:[#allocation13 + $0x84] ss:$8 sps:$4 sm:$0xff]  }
 0x1ef   :  { %2010 = vmatprep.mubr.bf16.mxu0 %v1711_v1  ;;  %2537 = vmatprep.subr.bf16.mxu1 %v5779_v59  ;;  %v1249_v59 = vld [vmem:[#allocation9 + $0x3] ss:$8 sm:$0x3] }
 0x1f1   :  { %1993 = vmatpush1.bf16.msra.mxu0 %v5716_v62  ;;  %v5271_v62 = vcombine.high %v2069_v58, %v2069_v58 }
 0x1f2   :  { %1994 = vmatprep.subr.bf16.mxu0 %v5721_v63  ;;  %v5270_v63 = vcombine.low %v2069_v58, %v2069_v58  ;;  %2538 = vmatpush1.bf16.msra.mxu1 %v5777_v61 }
 0x1f3   :  { %2539 = vmatprep.subr.bf16.mxu1 %v5782_v0 }
 0x1f5   :  { %1995 = vmatpush1.bf16.msra.mxu0 %v5719_v2  ;;  %v2070_v2 = vld [vmem:[#allocation12 + $0x8] sm:$0xff] }
 0x1f6   :  { %1996 = vmatprep.subr.bf16.mxu0 %v5724_v3 }
 0x1f9   :  { %1997 = vmatpush1.bf16.msra.mxu0 %v5722_v4  ;;  %v2162_v4 = vsel %vm2160_vm9, %v5270_v63, 0 }
 0x1fa   :  { %1998 = vmatprep.subr.bf16.mxu0 %v5727_v5  ;;  %v5273_v5 = vcombine.high %v2070_v2, %v2070_v2 }
 0x1fd   :  { %1999 = vmatpush1.bf16.msra.mxu0 %v5725_v6  ;;  %v5780_v6 = vld [vmem:[#allocation13 + $0x20] ss:$8 sps:$4 sm:$0xff]  }
 0x1fe   :  { %2000 = vmatprep.subr.bf16.mxu0 %v5730_v7  ;;  %v5785_v7 = vld [vmem:[#allocation13 + $0x34] ss:$8 sps:$4 sm:$0xff]   ;;  %2540 = vmatpush1.bf16.msra.mxu1 %v5780_v6 }
 0x1ff   :  { %2541 = vmatprep.subr.bf16.mxu1 %v5785_v7 }
 0x201   :  { %2001 = vmatpush1.bf16.msra.mxu0 %v5728_v8  ;;  %v6037_v8 = vmov 0  }
 0x202   :  { %2002 = vmatprep.subr.bf16.mxu0 %v5733_v9  ;;  %v5272_v9 = vcombine.low %v2070_v2, %v2070_v2  ;;  %v6658_v2 = vld [vmem:[#allocation9 + $0x4] ss:$8 sm:$0xf] }
 0x203   :  { %v2129_v7 = vrot.slane %v6658_v2, %v6617_v50 }
 0x205   :  { %2003 = vmatpush1.bf16.msra.mxu0 %v5731_v10  ;;  %v5783_v10 = vld [vmem:[#allocation13 + $0x30] ss:$8 sps:$4 sm:$0xff]  }
 0x206   :  { %2004 = vmatprep.subr.bf16.mxu0 %v5736_v11  ;;  %v5788_v11 = vld [vmem:[#allocation13 + $0x44] ss:$8 sps:$4 sm:$0xff]   ;;  %2542 = vmatpush1.bf16.msra.mxu1 %v5783_v10  ;;  %v2133_v10 = vrot.slane %v6658_v2, %v6620_v52 }
 0x207   :  { %2543 = vmatprep.subr.bf16.mxu1 %v5788_v11 }
 0x209   :  { %2005 = vmatpush1.bf16.msra.mxu0 %v5734_v13  ;;  %v2168_v13 = vsel %vm2160_vm9, %v5272_v9, 0 }
 0x20a   :  { %2006 = vmatprep.subr.bf16.mxu0 %v5739_v15  ;;  %v5786_v15 = vld [vmem:[#allocation13 + $0x40] ss:$8 sps:$4 sm:$0xff]  }
 0x20b   :  { %2544 = vmatpush1.bf16.msra.mxu1 %v5786_v15 }
 0x20c   :  { %2545 = vmatprep.subr.bf16.mxu1 %v5791_v17 }
 0x20d   :  { %2007 = vmatpush1.bf16.msra.mxu0 %v5737_v18  ;;  %v5789_v18 = vld [vmem:[#allocation13 + $0x50] ss:$8 sps:$4 sm:$0xff]  }
 0x20e   :  { %2008 = vmatprep.subr.bf16.mxu0 %v5742_v19  ;;  %v5794_v19 = vld [vmem:[#allocation13 + $0x64] ss:$8 sps:$4 sm:$0xff]  }
 0x20f   :  { %2546 = vmatpush1.bf16.msra.mxu1 %v5789_v18 }
 0x210   :  { %2547 = vmatprep.subr.bf16.mxu1 %v5794_v19 }
 0x211   :  { %2009 = vmatpush1.bf16.msra.mxu0 %v5740_v20  ;;  %v5797_v20 = vld [vmem:[#allocation13 + $0x74] ss:$8 sps:$4 sm:$0xff]  }
 0x212   :  { %2019 = vmatprep.subr.bf16.mxu0 %v5745_v21  ;;  %v5795_v21 = vld [vmem:[#allocation13 + $0x70] ss:$8 sps:$4 sm:$0xff]  }
 0x213   :  { %2548 = vmatpush1.bf16.msra.mxu1 %v5792_v16 }
 0x214   :  { %2011 = vmatmul.mubr.bf16.vlgmr.msra.gmra.mrb[8].mxu0 %v1710_v25  ;;  %2549 = vmatprep.subr.bf16.mxu1 %v5797_v20  ;;  %v5803_v25 = vld [vmem:[#allocation13 + $0x94] ss:$8 sps:$4 sm:$0xff]  }
 0x215   :  { %2020 = vmatpush1.bf16.msra.mxu0 %v5743_v24  ;;  %v5798_v24 = vld [vmem:[#allocation13 + $0x80] ss:$8 sps:$4 sm:$0xff]  }
 0x216   :  { %2021 = vmatprep.subr.bf16.mxu0 %v5748_v26  ;;  %v5801_v26 = vld [vmem:[#allocation13 + $0x90] ss:$8 sps:$4 sm:$0xff]  }
 0x217   :  { %2550 = vmatpush1.bf16.msra.mxu1 %v5795_v21 }
 0x218   :  { %2551 = vmatprep.subr.bf16.mxu1 %v5800_v22 }
 0x219   :  { %2022 = vmatpush1.bf16.msra.mxu0 %v5746_v27  ;;  %v5806_v27 = vld [vmem:[#allocation13 + $0xa4] ss:$8 sps:$4 sm:$0xff]  }
 0x21a   :  { %2023 = vmatprep.subr.bf16.mxu0 %v5751_v28  ;;  %v5804_v28 = vld [vmem:[#allocation13 + $0xa0] ss:$8 sps:$4 sm:$0xff]  }
 0x21b   :  { %2552 = vmatpush1.bf16.msra.mxu1 %v5798_v24  ;;  %v2141_v24 = vrot.slane %v6658_v2, %v6624_v54 }
 0x21c   :  { %2553 = vmatprep.subr.bf16.mxu1 %v5803_v25 }
 0x21d   :  { %2024 = vmatpush1.bf16.msra.mxu0 %v5749_v29  ;;  %v5809_v29 = vld [vmem:[#allocation13 + $0xb4] ss:$8 sps:$4 sm:$0xff]  }
 0x21e   :  { %2025 = vmatprep.subr.bf16.mxu0 %v5754_v30  ;;  %v5807_v30 = vld [vmem:[#allocation13 + $0xb0] ss:$8 sps:$4 sm:$0xff]  }
 0x21f   :  { %2554 = vmatpush1.bf16.msra.mxu1 %v5801_v26  ;;  %v5822_v26 = vld [vmem:[#allocation13 + $0x100] ss:$8 sps:$4 sm:$0xff]  }
 0x220   :  { %2555 = vmatprep.subr.bf16.mxu1 %v5806_v27 }
 0x221   :  { %2026 = vmatpush1.bf16.msra.mxu0 %v5752_v31  ;;  %v5812_v31 = vld [vmem:[#allocation13 + $0xc4] ss:$8 sps:$4 sm:$0xff]  }
 0x222   :  { %2027 = vmatprep.subr.bf16.mxu0 %v5757_v32  ;;  %v5810_v32 = vld [vmem:[#allocation13 + $0xc0] ss:$8 sps:$4 sm:$0xff]  }
 0x223   :  { %2556 = vmatpush1.bf16.msra.mxu1 %v5804_v28  ;;  %v5827_v28 = vld [vmem:[#allocation13 + $0x114] ss:$8 sps:$4 sm:$0xff]  }
 0x224   :  { %2557 = vmatprep.subr.bf16.mxu1 %v5809_v29 }
 0x225   :  { %2028 = vmatpush1.bf16.msra.mxu0 %v5755_v33  ;;  %v5815_v33 = vld [vmem:[#allocation13 + $0xd4] ss:$8 sps:$4 sm:$0xff]  }
 0x226   :  { %2029 = vmatprep.subr.bf16.mxu0 %v5760_v34  ;;  %v1691_v39 = vpop.f32.mrb[8].mxu1  ;;  %v5813_v34 = vld [vmem:[#allocation13 + $0xd0] ss:$8 sps:$4 sm:$0xff]  }
 0x227   :  { %v1692_v41 = vadd.f32 %v1691_v39, %v1262_v36  ;;  %v1693_v42 = vpop.f32.mrb[9].mxu1  ;;  %2558 = vmatpush1.bf16.msra.mxu1 %v5807_v30  ;;  %v5816_v36 = vld [vmem:[#allocation13 + $0xe0] ss:$8 sps:$4 sm:$0xff]   ;;  %v5824_v39 = vld [vmem:[#allocation13 + $0x104] ss:$8 sps:$4 sm:$0xff]  }
 0x228   :  { %v1694_v45 = vadd.f32 %v1693_v42, %v1266_v38  ;;  %v1695_v46 = vpop.f32.mrb[10].mxu1  ;;  %2559 = vmatprep.subr.bf16.mxu1 %v5812_v31  ;;  %v5819_v38 = vld [vmem:[#allocation13 + $0xf0] ss:$8 sps:$4 sm:$0xff]  }
 0x229   :  { %2030 = vmatpush1.bf16.msra.mxu0 %v5758_v35  ;;  %v1696_v47 = vpop.f32.mrb[11].mxu1  ;;  %v1704_v57 = vmul.f32 0.2, %v1692_v41  ;;  %vm1700_vm8 = vcmp.ge.f32.partialorder %v1692_v41, 0.0  ;;  %v5818_v35 = vld [vmem:[#allocation13 + $0xe4] ss:$8 sps:$4 sm:$0xff]  }
 0x22a   :  { %2031 = vmatprep.subr.bf16.mxu0 %v5763_v37  ;;  %vm1701_vm7 = vcmp.ge.f32.partialorder %v1694_v45, 0.0  ;;  %v1705_v49 = vmul.f32 0.2, %v1694_v45  ;;  %v5821_v37 = vld [vmem:[#allocation13 + $0xf4] ss:$8 sps:$4 sm:$0xff]  }
 0x22b   :  { %v1708_v1 = vsel %vm1700_vm8, %v1692_v41, %v1704_v57  ;;  %2560 = vmatpush1.bf16.msra.mxu1 %v5810_v32 }
 0x22c   :  { %v1709_v48 = vsel %vm1701_vm7, %v1694_v45, %v1705_v49  ;;  %v1712_v3 = vpack.c.bf16 %v1708_v1, %v1708_v1  ;;  %2561 = vmatprep.subr.bf16.mxu1 %v5815_v33  ;;  %v5825_v33 = vld [vmem:[#allocation13 + $0x110] ss:$8 sps:$4 sm:$0xff]  }
 0x22d   :  { %2032 = vmatpush1.bf16.msra.mxu0 %v5761_v40  ;;  %v1713_v14 = vpack.c.bf16 %v1709_v48, %v1709_v48  ;;  %v308_v40 = vld [vmem:[#allocation9 + $0x2] ss:$8 sm:$0x3] }
 0x22e   :  { %2033 = vmatprep.subr.bf16.mxu0 %v5766_v44  ;;  %v777_v41 = vrot.slane %v308_v40, %v6617_v50  ;;  %v781_v42 = vrot.slane %v308_v40, %v6620_v52  ;;  %v5833_v40 = vld [vmem:[#allocation13 + $0x134] ss:$8 sps:$4 sm:$0xff]  }
 0x22f   :  { %5269 = vmatprep.mubr.msk.bf16.mxu0 %vm1034_vm3, %v1713_v14  ;;  %2562 = vmatpush1.bf16.msra.mxu1 %v5813_v34  ;;  %v1718_v14 = vrot.slane %v1249_v59, %v6617_v50 }
 0x230   :  { %2563 = vmatprep.subr.bf16.mxu1 %v5818_v35  ;;  %v5830_v35 = vld [vmem:[#allocation13 + $0x124] ss:$8 sps:$4 sm:$0xff]  }
 0x231   :  { %2034 = vmatpush1.bf16.msra.mxu0 %v5764_v51 }
 0x232   :  { %2035 = vmatprep.subr.bf16.mxu0 %v5769_v53 }
 0x233   :  { %2564 = vmatpush1.bf16.msra.mxu1 %v5816_v36 }
 0x234   :  { %2565 = vmatprep.subr.bf16.mxu1 %v5821_v37 }
 0x235   :  { %2036 = vmatpush1.bf16.msra.mxu0 %v5767_v60  ;;  %v1722_v60 = vrot.slane %v1249_v59, %v6620_v52 }
 0x236   :  { %5274 = vmatprep.subr.msk.bf16.mxu0 %vm2160_vm9, %v5271_v62 }
 0x237   :  { %2566 = vmatpush1.bf16.msra.mxu1 %v5819_v38  ;;  %v5828_v38 = vld [vmem:[#allocation13 + $0x120] ss:$8 sps:$4 sm:$0xff]  }
 0x238   :  { %2052 = vmatmul.mubr.bf16.vlgmr.msra.gmra.mrb[8].mxu0 %v1712_v3  ;;  %2576 = vmatprep.subr.bf16.mxu1 %v5824_v39 }
 0x239   :  { %2174 = vmatpush1.bf16.msra.mxu0 %v2162_v4  ;;  %2205 = vmatprep.mubr.bf16.mxu0 %v6037_v8 }
 0x23a   :  { %5276 = vmatprep.subr.msk.bf16.mxu0 %vm2160_vm9, %v5273_v5 }
 0x240   :  { %5275 = vmatmul.mubr.msk.bf16.vlgmr.msra.gmra.mrb[12].mxu0 %vm2156_vm10, %v2068_v12 }
 0x241   :  { %2215 = vmatpush1.bf16.msra.mxu0 %v2168_v13  ;;  %2246 = vmatprep.mubr.bf16.mxu0 %v6037_v8 }
 0x248   :  { %5277 = vmatmul.mubr.msk.bf16.vlgmr.msra.gmra.mrb[16].mxu0 %vm2156_vm10, %v2068_v12 }
 0x2a7   :  { %v1113_v44 = vpop.f32.mrb[4].mxu0 }
 0x2a8   :  { %v5331_v45 = vadd.f32 %v1113_v44, %v777_v41  ;;  %v1115_v46 = vpop.f32.mrb[5].mxu0  ;;  %v5831_v41 = vld [vmem:[#allocation13 + $0x130] ss:$8 sps:$4 sm:$0xff]   ;;  %v5834_v44 = vld [vmem:[#allocation13 + $0x140] ss:$8 sps:$4 sm:$0xff]  }
 0x2a9   :  { %v5332_v47 = vadd.f32 %v1115_v46, %v781_v42  ;;  %v1117_v49 = vpop.f32.mrb[6].mxu0  ;;  %v5836_v42 = vld [vmem:[#allocation13 + $0x144] ss:$8 sps:$4 sm:$0xff]   ;;  %v5837_v46 = vld [vmem:[#allocation13 + $0x150] ss:$8 sps:$4 sm:$0xff]  }
 0x2aa   :  { %vm1120_vm11 = vcmp.ge.f32.partialorder %v5331_v45, 0.0  ;;  %v1122_v51 = vmul.f32 0.2, %v5331_v45  ;;  %v1118_v53 = vpop.f32.mrb[7].mxu0  ;;  %v2137_v49 = vrot.slane %v6658_v2, %v6630_v23 }
 0x2ab   :  { %vm1121_vm12 = vcmp.ge.f32.partialorder %v5332_v47, 0.0  ;;  %v1123_v55 = vmul.f32 0.2, %v5332_v47  ;;  %v5845_v53 = vld [vmem:[#allocation13 + $0x174] ss:$8 sps:$4 sm:$0xff]  }
 0x2ac   :  { %v1124_v56 = vsel %vm1120_vm11, %v5331_v45, %v1122_v51  ;;  %v5839_v45 = vld [vmem:[#allocation13 + $0x154] ss:$8 sps:$4 sm:$0xff]   ;;  %v5840_v51 = vld [vmem:[#allocation13 + $0x160] ss:$8 sps:$4 sm:$0xff]  }
 0x2ad   :  { %v6652_v57 = vpack.c.bf16 %v1124_v56, %v1124_v56  ;;  %v1125_v48 = vsel %vm1121_vm12, %v5332_v47, %v1123_v55  ;;  %v5842_v47 = vld [vmem:[#allocation13 + $0x164] ss:$8 sps:$4 sm:$0xff]   ;;  %v5843_v56 = vld [vmem:[#allocation13 + $0x170] ss:$8 sps:$4 sm:$0xff]  }
 0x2ae   :  { %v6654_v58 = vpack.c.bf16 %v1125_v48, %v1125_v48  ;;  %v5848_v48 = vld [vmem:[#allocation13 + $0x184] ss:$8 sps:$4 sm:$0xff]  }
 0x30b   :  { %v2053_v61 = vpop.f32.mrb[8].mxu0 }
 0x30c   :  { %v5333_v62 = vadd.f32 %v2053_v61, %v1718_v14  ;;  %v2055_v63 = vpop.f32.mrb[9].mxu0  ;;  %v5846_v14 = vld [vmem:[#allocation13 + $0x180] ss:$8 sps:$4 sm:$0xff]  }
 0x30d   :  { %v5334_v0 = vadd.f32 %v2055_v63, %v1722_v60  ;;  %v2057_v1 = vpop.f32.mrb[10].mxu0 }
 0x30e   :  { %vm2060_vm13 = vcmp.ge.f32.partialorder %v5333_v62, 0.0  ;;  %v2062_v3 = vmul.f32 0.2, %v5333_v62  ;;  %v2058_v4 = vpop.f32.mrb[11].mxu0 }
 0x30f   :  { %vm2061_vm14 = vcmp.ge.f32.partialorder %v5334_v0, 0.0  ;;  %v2063_v5 = vmul.f32 0.2, %v5334_v0 }
 0x310   :  { %v2064_v6 = vsel %vm2060_vm13, %v5333_v62, %v2062_v3  ;;  %v2124_v62 = vld [vmem:[#allocation9 + $0x5] ss:$8 sm:$0x3] }
 0x311   :  { %v6662_v8 = vpack.c.bf16 %v2064_v6, %v2064_v6  ;;  %v2065_v9 = vsel %vm2061_vm14, %v5334_v0, %v2063_v5  ;;  %v2275_v63 = vrot.slane %v2124_v62, %v6617_v50  ;;  %v2279_v0 = vrot.slane %v2124_v62, %v6620_v52 }
 0x312   :  { %v6666_v11 = vpack.c.bf16 %v2065_v9, %v2065_v9 }
 0x313   :  { %v2207_v12 = vpop.f32.mrb[12].mxu0 }
 0x314   :  { %v2208_v13 = vadd.f32 %v2207_v12, %v2129_v7  ;;  %v2209_v15 = vpop.f32.mrb[13].mxu0 }
 0x315   :  { %v2210_v17 = vadd.f32 %v2209_v15, %v2133_v10  ;;  %v2211_v18 = vpop.f32.mrb[14].mxu0 }
 0x316   :  { %vm2255_vm15 = vcmp.ge.f32.partialorder %v2208_v13, 0.0  ;;  %v2259_v19 = vmul.f32 0.2, %v2208_v13  ;;  %v2212_v16 = vpop.f32.mrb[15].mxu0 }
 0x317   :  { %vm2256_vm0 = vcmp.ge.f32.partialorder %v2210_v17, 0.0  ;;  %v2260_v20 = vmul.f32 0.2, %v2210_v17 }
 0x318   :  { %v2263_v21 = vsel %vm2255_vm15, %v2208_v13, %v2259_v19 }
 0x319   :  { %v2264_v22 = vsel %vm2256_vm0, %v2210_v17, %v2260_v20  ;;  %v2267_v27 = vpack.c.bf16 %v2263_v21, %v2263_v21 }
 0x31a   :  { %v2268_v25 = vpack.c.bf16 %v2264_v22, %v2264_v22 }
 0x31b   :  { %v2248_v29 = vpop.f32.mrb[16].mxu0 }
 0x31c   :  { %2567 = vmatprep.mubr.bf16.mxu1 %v2268_v25  ;;  %v2250_v30 = vpop.f32.mrb[17].mxu0  ;;  %v2249_v55 = vadd.f32 %v2248_v29, %v2137_v49 }
 0x31d   :  { %2568 = vmatmul.mubr.bf16.vlgmr.msra.gmra.mrb[12].mxu1 %v2267_v27  ;;  %v2251_v31 = vadd.f32 %v2250_v30, %v2141_v24  ;;  %v2252_v32 = vpop.f32.mrb[18].mxu0 }
 0x31e   :  { %2577 = vmatpush1.bf16.msra.mxu1 %v5822_v26  ;;  %v2253_v34 = vpop.f32.mrb[19].mxu0  ;;  %v2261_v59 = vmul.f32 0.2, %v2249_v55  ;;  %vm2257_vm2 = vcmp.ge.f32.partialorder %v2249_v55, 0.0 }
 0x31f   :  { %2578 = vmatprep.subr.bf16.mxu1 %v5827_v28  ;;  %vm2258_vm1 = vcmp.ge.f32.partialorder %v2251_v31, 0.0  ;;  %v2262_v36 = vmul.f32 0.2, %v2251_v31 }
 0x320   :  { %v2265_v60 = vsel %vm2257_vm2, %v2249_v55, %v2261_v59 }
 0x321   :  { %v2266_v37 = vsel %vm2258_vm1, %v2251_v31, %v2262_v36  ;;  %v2269_v61 = vpack.c.bf16 %v2265_v60, %v2265_v60 }
 0x322   :  { %2579 = vmatpush1.bf16.msra.mxu1 %v5825_v33  ;;  %v2270_v39 = vpack.c.bf16 %v2266_v37, %v2266_v37 }
 0x323   :  { %2580 = vmatprep.subr.bf16.mxu1 %v5830_v35 }
 0x324   :  { %5328 = vmatprep.mubr.msk.bf16.mxu1 %vm1034_vm3, %v2270_v39 }
 0x326   :  { %2581 = vmatpush1.bf16.msra.mxu1 %v5828_v38 }
 0x327   :  { %2582 = vmatprep.subr.bf16.mxu1 %v5833_v40 }
 0x32a   :  { %2583 = vmatpush1.bf16.msra.mxu1 %v5831_v41 }
 0x32b   :  { %2584 = vmatprep.subr.bf16.mxu1 %v5836_v42 }
 0x32e   :  { %2585 = vmatpush1.bf16.msra.mxu1 %v5834_v44 }
 0x32f   :  { %2586 = vmatprep.subr.bf16.mxu1 %v5839_v45 }
 0x332   :  { %2587 = vmatpush1.bf16.msra.mxu1 %v5837_v46 }
 0x333   :  { %2588 = vmatprep.subr.bf16.mxu1 %v5842_v47 }
 0x336   :  { %2589 = vmatpush1.bf16.msra.mxu1 %v5840_v51 }
 0x337   :  { %2590 = vmatprep.subr.bf16.mxu1 %v5845_v53 }
 0x33a   :  { %2591 = vmatpush1.bf16.msra.mxu1 %v5843_v56 }
 0x33b   :  { %2592 = vmatprep.subr.bf16.mxu1 %v5848_v48 }
 0x33e   :  { %2593 = vmatpush1.bf16.msra.mxu1 %v5846_v14 }
 0x341   :  { %2609 = vmatmul.mubr.bf16.vlgmr.msra.gmra.mrb[12].mxu1 %v2269_v61 }
 0x414   :  { %v2610_v1 = vpop.f32.mrb[12].mxu1 }
 0x415   :  { %v5335_v2 = vadd.f32 %v2610_v1, %v2275_v63  ;;  %v2612_v3 = vpop.f32.mrb[13].mxu1 }
 0x416   :  { %v5336_v4 = vadd.f32 %v2612_v3, %v2279_v0  ;;  %v2614_v5 = vpop.f32.mrb[14].mxu1 }
 0x417   :  { %vm2617_vm3 = vcmp.ge.f32.partialorder %v5335_v2, 0.0  ;;  %v2619_v6 = vmul.f32 0.2, %v5335_v2  ;;  %v2615_v7 = vpop.f32.mrb[15].mxu1 }
 0x418   :  { %vm2618_vm4 = vcmp.ge.f32.partialorder %v5336_v4, 0.0  ;;  %v2620_v9 = vmul.f32 0.2, %v5336_v4 }
 0x419   :  { %v2621_v10 = vsel %vm2617_vm3, %v5335_v2, %v2619_v6 }
 0x41a   :  { %v6675_v12 = vpack.c.bf16 %v2621_v10, %v2621_v10  ;;  %v2622_v13 = vsel %vm2618_vm4, %v5336_v4, %v2620_v9 }
 0x41b   :  { %v6677_v15 = vpack.c.bf16 %v2622_v13, %v2622_v13 }
 0x41c   :  { %6011 = dma.done.wait [#allocation4], 49152 }
 0x41d   :  { %6012 = vsyncadd [#allocation4], 4294918144  ;;  %2919 = vmatprep.mubr.bf16.mxu0 %v6666_v11  ;;  %2960 = vmatprep.mubr.bf16.mxu1 %v6666_v11  ;;  %v2760_v17 = vld [vmem:[#allocation2 + $0x408] sm:$0xff]  ;;  %v2762_v18 = vld [vmem:[#allocation2 + $0x418] sm:$0xff] }
 0x41e   :  { %v2759_v19 = vld [vmem:[#allocation2 + $0x400] sm:$0xff]  ;;  %2887 = vmatprep.subr.bf16.mxu0 %v2760_v17  ;;  %2928 = vmatprep.subr.bf16.mxu1 %v2762_v18  ;;  %v2761_v16 = vld [vmem:[#allocation2 + $0x410] sm:$0xff]  ;;  %v2768_v20 = vld [vmem:[#allocation2 + $0x448] sm:$0xff] }
 0x41f   :  { %v2770_v21 = vld [vmem:[#allocation2 + $0x458] sm:$0xff]  ;;  %2888 = vmatpush1.bf16.msra.mxu0 %v2759_v19  ;;  %2929 = vmatpush1.bf16.msra.mxu1 %v2761_v16  ;;  %v2767_v22 = vld [vmem:[#allocation2 + $0x440] sm:$0xff]  ;;  %v2769_v24 = vld [vmem:[#allocation2 + $0x450] sm:$0xff] }
 0x420   :  { %2889 = vmatprep.subr.bf16.mxu0 %v2768_v20  ;;  %2930 = vmatprep.subr.bf16.mxu1 %v2770_v21  ;;  %v2776_v25 = vld [vmem:[#allocation2 + $0x488] sm:$0xff]  ;;  %v2778_v26 = vld [vmem:[#allocation2 + $0x498] sm:$0xff]  ;;  %v2775_v27 = vld [vmem:[#allocation2 + $0x480] sm:$0xff] }
 0x421   :  { %v2777_v28 = vld [vmem:[#allocation2 + $0x490] sm:$0xff]  ;;  %v2784_v29 = vld [vmem:[#allocation2 + $0x4c8] sm:$0xff]  ;;  %v2786_v30 = vld [vmem:[#allocation2 + $0x4d8] sm:$0xff] }
 0x422   :  { %v2783_v31 = vld [vmem:[#allocation2 + $0x4c0] sm:$0xff]  ;;  %v2785_v32 = vld [vmem:[#allocation2 + $0x4d0] sm:$0xff]  ;;  %v2792_v33 = vld [vmem:[#allocation2 + $0x508] sm:$0xff] }
 0x423   :  { %2890 = vmatpush1.bf16.msra.mxu0 %v2767_v22  ;;  %2931 = vmatpush1.bf16.msra.mxu1 %v2769_v24  ;;  %v2794_v34 = vld [vmem:[#allocation2 + $0x518] sm:$0xff]  ;;  %v2791_v35 = vld [vmem:[#allocation2 + $0x500] sm:$0xff]  ;;  %v2793_v36 = vld [vmem:[#allocation2 + $0x510] sm:$0xff] }
 0x424   :  { %2891 = vmatprep.subr.bf16.mxu0 %v2776_v25  ;;  %2932 = vmatprep.subr.bf16.mxu1 %v2778_v26  ;;  %v2800_v37 = vld [vmem:[#allocation2 + $0x548] sm:$0xff]  ;;  %v2802_v38 = vld [vmem:[#allocation2 + $0x558] sm:$0xff]  ;;  %v2799_v39 = vld [vmem:[#allocation2 + $0x540] sm:$0xff] }
 0x425   :  { %v2801_v40 = vld [vmem:[#allocation2 + $0x550] sm:$0xff]  ;;  %v2808_v41 = vld [vmem:[#allocation2 + $0x588] sm:$0xff]  ;;  %v2810_v42 = vld [vmem:[#allocation2 + $0x598] sm:$0xff] }
 0x426   :  { %v2807_v44 = vld [vmem:[#allocation2 + $0x580] sm:$0xff]  ;;  %v2809_v45 = vld [vmem:[#allocation2 + $0x590] sm:$0xff]  ;;  %v2816_v46 = vld [vmem:[#allocation2 + $0x5c8] sm:$0xff] }
 0x427   :  { %2892 = vmatpush1.bf16.msra.mxu0 %v2775_v27  ;;  %2933 = vmatpush1.bf16.msra.mxu1 %v2777_v28  ;;  %v2818_v47 = vld [vmem:[#allocation2 + $0x5d8] sm:$0xff]  ;;  %v2815_v49 = vld [vmem:[#allocation2 + $0x5c0] sm:$0xff]  ;;  %v2817_v51 = vld [vmem:[#allocation2 + $0x5d0] sm:$0xff] }
 0x428   :  { %2893 = vmatprep.subr.bf16.mxu0 %v2784_v29  ;;  %2934 = vmatprep.subr.bf16.mxu1 %v2786_v30  ;;  %v2824_v53 = vld [vmem:[#allocation2 + $0x608] sm:$0xff]  ;;  %v2826_v55 = vld [vmem:[#allocation2 + $0x618] sm:$0xff]  ;;  %v2823_v56 = vld [vmem:[#allocation2 + $0x600] sm:$0xff] }
 0x429   :  { %v2825_v48 = vld [vmem:[#allocation2 + $0x610] sm:$0xff]  ;;  %v2832_v59 = vld [vmem:[#allocation2 + $0x648] sm:$0xff]  ;;  %v2834_v14 = vld [vmem:[#allocation2 + $0x658] sm:$0xff] }
 0x42a   :  { %v2831_v60 = vld [vmem:[#allocation2 + $0x640] sm:$0xff]  ;;  %v2833_v61 = vld [vmem:[#allocation2 + $0x650] sm:$0xff]  ;;  %v2840_v62 = vld [vmem:[#allocation2 + $0x688] sm:$0xff] }
 0x42b   :  { %2894 = vmatpush1.bf16.msra.mxu0 %v2783_v31  ;;  %2935 = vmatpush1.bf16.msra.mxu1 %v2785_v32  ;;  %v2842_v63 = vld [vmem:[#allocation2 + $0x698] sm:$0xff]  ;;  %v2839_v0 = vld [vmem:[#allocation2 + $0x680] sm:$0xff]  ;;  %v2841_v1 = vld [vmem:[#allocation2 + $0x690] sm:$0xff] }
 0x42c   :  { %2895 = vmatprep.subr.bf16.mxu0 %v2792_v33  ;;  %2936 = vmatprep.subr.bf16.mxu1 %v2794_v34  ;;  %v2848_v2 = vld [vmem:[#allocation2 + $0x6c8] sm:$0xff]  ;;  %v2850_v3 = vld [vmem:[#allocation2 + $0x6d8] sm:$0xff]  ;;  %v2847_v4 = vld [vmem:[#allocation2 + $0x6c0] sm:$0xff] }
 0x42d   :  { %v2849_v5 = vld [vmem:[#allocation2 + $0x6d0] sm:$0xff]  ;;  %v2856_v6 = vld [vmem:[#allocation2 + $0x708] sm:$0xff]  ;;  %v2858_v7 = vld [vmem:[#allocation2 + $0x718] sm:$0xff] }
 0x42e   :  { %v2855_v9 = vld [vmem:[#allocation2 + $0x700] sm:$0xff]  ;;  %v2857_v10 = vld [vmem:[#allocation2 + $0x710] sm:$0xff]  ;;  %v2864_v13 = vld [vmem:[#allocation2 + $0x748] sm:$0xff] }
 0x42f   :  { %2896 = vmatpush1.bf16.msra.mxu0 %v2791_v35  ;;  %2937 = vmatpush1.bf16.msra.mxu1 %v2793_v36  ;;  %v2866_v17 = vld [vmem:[#allocation2 + $0x758] sm:$0xff]  ;;  %v2863_v18 = vld [vmem:[#allocation2 + $0x740] sm:$0xff]  ;;  %v2865_v19 = vld [vmem:[#allocation2 + $0x750] sm:$0xff] }
 0x430   :  { %2897 = vmatprep.subr.bf16.mxu0 %v2800_v37  ;;  %2938 = vmatprep.subr.bf16.mxu1 %v2802_v38  ;;  %v2872_v16 = vld [vmem:[#allocation2 + $0x788] sm:$0xff]  ;;  %v2874_v20 = vld [vmem:[#allocation2 + $0x798] sm:$0xff]  ;;  %v2871_v21 = vld [vmem:[#allocation2 + $0x780] sm:$0xff] }
 0x431   :  { %v2873_v22 = vld [vmem:[#allocation2 + $0x790] sm:$0xff]  ;;  %v2880_v24 = vld [vmem:[#allocation2 + $0x7c8] sm:$0xff]  ;;  %v2882_v25 = vld [vmem:[#allocation2 + $0x7d8] sm:$0xff] }
 0x432   :  { %v2879_v26 = vld [vmem:[#allocation2 + $0x7c0] sm:$0xff]  ;;  %v2881_v27 = vld [vmem:[#allocation2 + $0x7d0] sm:$0xff]  ;;  %v2764_v28 = vld [vmem:[#allocation2 + $0x428] sm:$0xff] }
 0x433   :  { %2898 = vmatpush1.bf16.msra.mxu0 %v2799_v39  ;;  %2939 = vmatpush1.bf16.msra.mxu1 %v2801_v40  ;;  %v2766_v29 = vld [vmem:[#allocation2 + $0x438] sm:$0xff]  ;;  %v2763_v30 = vld [vmem:[#allocation2 + $0x420] sm:$0xff]  ;;  %v2765_v31 = vld [vmem:[#allocation2 + $0x430] sm:$0xff] }
 0x434   :  { %2899 = vmatprep.subr.bf16.mxu0 %v2808_v41  ;;  %2940 = vmatprep.subr.bf16.mxu1 %v2810_v42  ;;  %v2772_v32 = vld [vmem:[#allocation2 + $0x468] sm:$0xff]  ;;  %v2774_v33 = vld [vmem:[#allocation2 + $0x478] sm:$0xff]  ;;  %v2771_v34 = vld [vmem:[#allocation2 + $0x460] sm:$0xff] }
 0x435   :  { %v2773_v35 = vld [vmem:[#allocation2 + $0x470] sm:$0xff]  ;;  %v2780_v36 = vld [vmem:[#allocation2 + $0x4a8] sm:$0xff]  ;;  %v2782_v37 = vld [vmem:[#allocation2 + $0x4b8] sm:$0xff] }
 0x436   :  { %v2779_v38 = vld [vmem:[#allocation2 + $0x4a0] sm:$0xff]  ;;  %v2781_v39 = vld [vmem:[#allocation2 + $0x4b0] sm:$0xff]  ;;  %v2788_v40 = vld [vmem:[#allocation2 + $0x4e8] sm:$0xff] }
 0x437   :  { %2900 = vmatpush1.bf16.msra.mxu0 %v2807_v44  ;;  %2941 = vmatpush1.bf16.msra.mxu1 %v2809_v45  ;;  %v2790_v41 = vld [vmem:[#allocation2 + $0x4f8] sm:$0xff]  ;;  %v2787_v42 = vld [vmem:[#allocation2 + $0x4e0] sm:$0xff]  ;;  %v2789_v44 = vld [vmem:[#allocation2 + $0x4f0] sm:$0xff] }
 0x438   :  { %2901 = vmatprep.subr.bf16.mxu0 %v2816_v46  ;;  %2942 = vmatprep.subr.bf16.mxu1 %v2818_v47  ;;  %v2796_v45 = vld [vmem:[#allocation2 + $0x528] sm:$0xff]  ;;  %v2798_v46 = vld [vmem:[#allocation2 + $0x538] sm:$0xff]  ;;  %v2797_v47 = vld [vmem:[#allocation2 + $0x530] sm:$0xff] }
 0x43b   :  { %2902 = vmatpush1.bf16.msra.mxu0 %v2815_v49  ;;  %2943 = vmatpush1.bf16.msra.mxu1 %v2817_v51  ;;  %v2804_v49 = vld [vmem:[#allocation2 + $0x568] sm:$0xff]  ;;  %v2806_v51 = vld [vmem:[#allocation2 + $0x578] sm:$0xff] }
 0x43c   :  { %2903 = vmatprep.subr.bf16.mxu0 %v2824_v53  ;;  %2944 = vmatprep.subr.bf16.mxu1 %v2826_v55  ;;  %v2803_v53 = vld [vmem:[#allocation2 + $0x560] sm:$0xff]  ;;  %v2805_v55 = vld [vmem:[#allocation2 + $0x570] sm:$0xff] }
 0x43f   :  { %2904 = vmatpush1.bf16.msra.mxu0 %v2823_v56  ;;  %2945 = vmatpush1.bf16.msra.mxu1 %v2825_v48  ;;  %v2812_v56 = vld [vmem:[#allocation2 + $0x5a8] sm:$0xff]  ;;  %v2814_v48 = vld [vmem:[#allocation2 + $0x5b8] sm:$0xff] }
 0x440   :  { %2905 = vmatprep.subr.bf16.mxu0 %v2832_v59  ;;  %2946 = vmatprep.subr.bf16.mxu1 %v2834_v14  ;;  %v2811_v59 = vld [vmem:[#allocation2 + $0x5a0] sm:$0xff]  ;;  %v2813_v14 = vld [vmem:[#allocation2 + $0x5b0] sm:$0xff] }
 0x443   :  { %2906 = vmatpush1.bf16.msra.mxu0 %v2831_v60  ;;  %2947 = vmatpush1.bf16.msra.mxu1 %v2833_v61  ;;  %v2820_v60 = vld [vmem:[#allocation2 + $0x5e8] sm:$0xff]  ;;  %v2822_v61 = vld [vmem:[#allocation2 + $0x5f8] sm:$0xff] }
 0x444   :  { %2907 = vmatprep.subr.bf16.mxu0 %v2840_v62  ;;  %2948 = vmatprep.subr.bf16.mxu1 %v2842_v63  ;;  %v2819_v62 = vld [vmem:[#allocation2 + $0x5e0] sm:$0xff]  ;;  %v2821_v63 = vld [vmem:[#allocation2 + $0x5f0] sm:$0xff] }
 0x447   :  { %2908 = vmatpush1.bf16.msra.mxu0 %v2839_v0  ;;  %2949 = vmatpush1.bf16.msra.mxu1 %v2841_v1  ;;  %v2828_v0 = vld [vmem:[#allocation2 + $0x628] sm:$0xff]  ;;  %v2830_v1 = vld [vmem:[#allocation2 + $0x638] sm:$0xff] }
 0x448   :  { %2909 = vmatprep.subr.bf16.mxu0 %v2848_v2  ;;  %2950 = vmatprep.subr.bf16.mxu1 %v2850_v3  ;;  %v2827_v2 = vld [vmem:[#allocation2 + $0x620] sm:$0xff]  ;;  %v2829_v3 = vld [vmem:[#allocation2 + $0x630] sm:$0xff] }
 0x44b   :  { %2910 = vmatpush1.bf16.msra.mxu0 %v2847_v4  ;;  %2951 = vmatpush1.bf16.msra.mxu1 %v2849_v5  ;;  %v2836_v4 = vld [vmem:[#allocation2 + $0x668] sm:$0xff]  ;;  %v2838_v5 = vld [vmem:[#allocation2 + $0x678] sm:$0xff] }
 0x44c   :  { %2911 = vmatprep.subr.bf16.mxu0 %v2856_v6  ;;  %2952 = vmatprep.subr.bf16.mxu1 %v2858_v7  ;;  %v2835_v6 = vld [vmem:[#allocation2 + $0x660] sm:$0xff]  ;;  %v2837_v7 = vld [vmem:[#allocation2 + $0x670] sm:$0xff] }
 0x44f   :  { %2912 = vmatpush1.bf16.msra.mxu0 %v2855_v9  ;;  %2953 = vmatpush1.bf16.msra.mxu1 %v2857_v10  ;;  %v2844_v9 = vld [vmem:[#allocation2 + $0x6a8] sm:$0xff]  ;;  %v2846_v10 = vld [vmem:[#allocation2 + $0x6b8] sm:$0xff] }
 0x450   :  { %2913 = vmatprep.subr.bf16.mxu0 %v2864_v13  ;;  %2954 = vmatprep.subr.bf16.mxu1 %v2866_v17  ;;  %v2843_v13 = vld [vmem:[#allocation2 + $0x6a0] sm:$0xff]  ;;  %v2845_v17 = vld [vmem:[#allocation2 + $0x6b0] sm:$0xff] }
 0x453   :  { %2914 = vmatpush1.bf16.msra.mxu0 %v2863_v18  ;;  %2955 = vmatpush1.bf16.msra.mxu1 %v2865_v19  ;;  %v2852_v18 = vld [vmem:[#allocation2 + $0x6e8] sm:$0xff]  ;;  %v2854_v19 = vld [vmem:[#allocation2 + $0x6f8] sm:$0xff] }
 0x454   :  { %2915 = vmatprep.subr.bf16.mxu0 %v2872_v16  ;;  %2956 = vmatprep.subr.bf16.mxu1 %v2874_v20  ;;  %v2851_v16 = vld [vmem:[#allocation2 + $0x6e0] sm:$0xff]  ;;  %v2853_v20 = vld [vmem:[#allocation2 + $0x6f0] sm:$0xff] }
 0x457   :  { %2916 = vmatpush1.bf16.msra.mxu0 %v2871_v21  ;;  %2957 = vmatpush1.bf16.msra.mxu1 %v2873_v22  ;;  %v2860_v21 = vld [vmem:[#allocation2 + $0x728] sm:$0xff]  ;;  %v2862_v22 = vld [vmem:[#allocation2 + $0x738] sm:$0xff] }
 0x458   :  { %2917 = vmatprep.subr.bf16.mxu0 %v2880_v24  ;;  %2958 = vmatprep.subr.bf16.mxu1 %v2882_v25  ;;  %v2859_v24 = vld [vmem:[#allocation2 + $0x720] sm:$0xff]  ;;  %v2861_v25 = vld [vmem:[#allocation2 + $0x730] sm:$0xff] }
 0x45b   :  { %2918 = vmatpush1.bf16.msra.mxu0 %v2879_v26  ;;  %2959 = vmatpush1.bf16.msra.mxu1 %v2881_v27  ;;  %v2868_v26 = vld [vmem:[#allocation2 + $0x768] sm:$0xff]  ;;  %v2870_v27 = vld [vmem:[#allocation2 + $0x778] sm:$0xff] }
 0x45c   :  { %2969 = vmatprep.subr.bf16.mxu0 %v2764_v28  ;;  %3010 = vmatprep.subr.bf16.mxu1 %v2766_v29  ;;  %v2867_v28 = vld [vmem:[#allocation2 + $0x760] sm:$0xff]  ;;  %v2869_v29 = vld [vmem:[#allocation2 + $0x770] sm:$0xff] }
 0x45e   :  { %2920 = vmatmul.mubr.bf16.vlgmr.msra.gmra.mrb[20].mxu0 %v6662_v8  ;;  %2961 = vmatmul.mubr.bf16.vlgmr.msra.gmra.mrb[16].mxu1 %v6662_v8 }
 0x45f   :  { %2970 = vmatpush1.bf16.msra.mxu0 %v2763_v30  ;;  %3011 = vmatpush1.bf16.msra.mxu1 %v2765_v31  ;;  %v2876_v30 = vld [vmem:[#allocation2 + $0x7a8] sm:$0xff]  ;;  %v2878_v31 = vld [vmem:[#allocation2 + $0x7b8] sm:$0xff] }
 0x460   :  { %2971 = vmatprep.subr.bf16.mxu0 %v2772_v32  ;;  %3012 = vmatprep.subr.bf16.mxu1 %v2774_v33  ;;  %v2875_v32 = vld [vmem:[#allocation2 + $0x7a0] sm:$0xff]  ;;  %v2877_v33 = vld [vmem:[#allocation2 + $0x7b0] sm:$0xff] }
 0x461   :  { %3001 = vmatprep.mubr.bf16.mxu0 %v6666_v11  ;;  %3042 = vmatprep.mubr.bf16.mxu1 %v6666_v11  ;;  %v2795_v11 = vld [vmem:[#allocation2 + $0x520] sm:$0xff] }
 0x463   :  { %2972 = vmatpush1.bf16.msra.mxu0 %v2771_v34  ;;  %3013 = vmatpush1.bf16.msra.mxu1 %v2773_v35  ;;  %v2884_v34 = vld [vmem:[#allocation2 + $0x7e8] sm:$0xff]  ;;  %v2886_v35 = vld [vmem:[#allocation2 + $0x7f8] sm:$0xff] }
 0x464   :  { %2973 = vmatprep.subr.bf16.mxu0 %v2780_v36  ;;  %3014 = vmatprep.subr.bf16.mxu1 %v2782_v37  ;;  %v2883_v36 = vld [vmem:[#allocation2 + $0x7e0] sm:$0xff]  ;;  %v2885_v37 = vld [vmem:[#allocation2 + $0x7f0] sm:$0xff] }
 0x467   :  { %2974 = vmatpush1.bf16.msra.mxu0 %v2779_v38  ;;  %3015 = vmatpush1.bf16.msra.mxu1 %v2781_v39  ;;  %v2631_v38 = vld [vmem:[#allocation2 + $0x8] sm:$0xff]  ;;  %v2633_v39 = vld [vmem:[#allocation2 + $0x18] sm:$0xff] }
 0x468   :  { %2975 = vmatprep.subr.bf16.mxu0 %v2788_v40  ;;  %3016 = vmatprep.subr.bf16.mxu1 %v2790_v41  ;;  %v2630_v40 = vld [vmem:[#allocation2] sm:$0xff]  ;;  %v2632_v41 = vld [vmem:[#allocation2 + $0x10] sm:$0xff] }
 0x46b   :  { %2976 = vmatpush1.bf16.msra.mxu0 %v2787_v42  ;;  %3017 = vmatpush1.bf16.msra.mxu1 %v2789_v44  ;;  %v2639_v42 = vld [vmem:[#allocation2 + $0x48] sm:$0xff]  ;;  %v2641_v44 = vld [vmem:[#allocation2 + $0x58] sm:$0xff] }
 0x46c   :  { %2977 = vmatprep.subr.bf16.mxu0 %v2796_v45  ;;  %3018 = vmatprep.subr.bf16.mxu1 %v2798_v46  ;;  %v2638_v45 = vld [vmem:[#allocation2 + $0x40] sm:$0xff]  ;;  %v2640_v46 = vld [vmem:[#allocation2 + $0x50] sm:$0xff] }
 0x46f   :  { %2978 = vmatpush1.bf16.msra.mxu0 %v2795_v11  ;;  %3019 = vmatpush1.bf16.msra.mxu1 %v2797_v47  ;;  %v2647_v11 = vld [vmem:[#allocation2 + $0x88] sm:$0xff]  ;;  %v2649_v47 = vld [vmem:[#allocation2 + $0x98] sm:$0xff] }
 0x470   :  { %2979 = vmatprep.subr.bf16.mxu0 %v2804_v49  ;;  %3020 = vmatprep.subr.bf16.mxu1 %v2806_v51  ;;  %v2646_v49 = vld [vmem:[#allocation2 + $0x80] sm:$0xff]  ;;  %v2648_v51 = vld [vmem:[#allocation2 + $0x90] sm:$0xff] }
 0x473   :  { %2980 = vmatpush1.bf16.msra.mxu0 %v2803_v53  ;;  %3021 = vmatpush1.bf16.msra.mxu1 %v2805_v55  ;;  %v2655_v53 = vld [vmem:[#allocation2 + $0xc8] sm:$0xff]  ;;  %v2654_v55 = vld [vmem:[#allocation2 + $0xc0] sm:$0xff] }
 0x474   :  { %2981 = vmatprep.subr.bf16.mxu0 %v2812_v56  ;;  %3022 = vmatprep.subr.bf16.mxu1 %v2814_v48  ;;  %v2656_v56 = vld [vmem:[#allocation2 + $0xd0] sm:$0xff]  ;;  %v2663_v48 = vld [vmem:[#allocation2 + $0x108] sm:$0xff] }
 0x477   :  { %2982 = vmatpush1.bf16.msra.mxu0 %v2811_v59  ;;  %3023 = vmatpush1.bf16.msra.mxu1 %v2813_v14  ;;  %v2665_v59 = vld [vmem:[#allocation2 + $0x118] sm:$0xff]  ;;  %v2662_v14 = vld [vmem:[#allocation2 + $0x100] sm:$0xff] }
 0x478   :  { %2983 = vmatprep.subr.bf16.mxu0 %v2820_v60  ;;  %3024 = vmatprep.subr.bf16.mxu1 %v2822_v61  ;;  %v2664_v60 = vld [vmem:[#allocation2 + $0x110] sm:$0xff]  ;;  %v2671_v61 = vld [vmem:[#allocation2 + $0x148] sm:$0xff] }
 0x47b   :  { %2984 = vmatpush1.bf16.msra.mxu0 %v2819_v62  ;;  %3025 = vmatpush1.bf16.msra.mxu1 %v2821_v63  ;;  %v2673_v62 = vld [vmem:[#allocation2 + $0x158] sm:$0xff]  ;;  %v2670_v63 = vld [vmem:[#allocation2 + $0x140] sm:$0xff] }
 0x47c   :  { %2985 = vmatprep.subr.bf16.mxu0 %v2828_v0  ;;  %3026 = vmatprep.subr.bf16.mxu1 %v2830_v1  ;;  %v2672_v0 = vld [vmem:[#allocation2 + $0x150] sm:$0xff]  ;;  %v2679_v1 = vld [vmem:[#allocation2 + $0x188] sm:$0xff] }
 0x47f   :  { %2986 = vmatpush1.bf16.msra.mxu0 %v2827_v2  ;;  %3027 = vmatpush1.bf16.msra.mxu1 %v2829_v3  ;;  %v2681_v2 = vld [vmem:[#allocation2 + $0x198] sm:$0xff]  ;;  %v2678_v3 = vld [vmem:[#allocation2 + $0x180] sm:$0xff] }
 0x480   :  { %2987 = vmatprep.subr.bf16.mxu0 %v2836_v4  ;;  %3028 = vmatprep.subr.bf16.mxu1 %v2838_v5  ;;  %v2680_v4 = vld [vmem:[#allocation2 + $0x190] sm:$0xff]  ;;  %v2687_v5 = vld [vmem:[#allocation2 + $0x1c8] sm:$0xff] }
 0x483   :  { %2988 = vmatpush1.bf16.msra.mxu0 %v2835_v6  ;;  %3029 = vmatpush1.bf16.msra.mxu1 %v2837_v7  ;;  %v2689_v6 = vld [vmem:[#allocation2 + $0x1d8] sm:$0xff]  ;;  %v2686_v7 = vld [vmem:[#allocation2 + $0x1c0] sm:$0xff] }
 0x484   :  { %2989 = vmatprep.subr.bf16.mxu0 %v2844_v9  ;;  %3030 = vmatprep.subr.bf16.mxu1 %v2846_v10  ;;  %v2688_v9 = vld [vmem:[#allocation2 + $0x1d0] sm:$0xff]  ;;  %v2695_v10 = vld [vmem:[#allocation2 + $0x208] sm:$0xff] }
 0x487   :  { %2990 = vmatpush1.bf16.msra.mxu0 %v2843_v13  ;;  %3031 = vmatpush1.bf16.msra.mxu1 %v2845_v17  ;;  %v2697_v13 = vld [vmem:[#allocation2 + $0x218] sm:$0xff]  ;;  %v2694_v17 = vld [vmem:[#allocation2 + $0x200] sm:$0xff] }
 0x488   :  { %2991 = vmatprep.subr.bf16.mxu0 %v2852_v18  ;;  %3032 = vmatprep.subr.bf16.mxu1 %v2854_v19  ;;  %v2696_v18 = vld [vmem:[#allocation2 + $0x210] sm:$0xff]  ;;  %v2703_v19 = vld [vmem:[#allocation2 + $0x248] sm:$0xff] }
 0x48b   :  { %2992 = vmatpush1.bf16.msra.mxu0 %v2851_v16  ;;  %3033 = vmatpush1.bf16.msra.mxu1 %v2853_v20  ;;  %v2705_v16 = vld [vmem:[#allocation2 + $0x258] sm:$0xff]  ;;  %v2702_v20 = vld [vmem:[#allocation2 + $0x240] sm:$0xff] }
 0x48c   :  { %2993 = vmatprep.subr.bf16.mxu0 %v2860_v21  ;;  %3034 = vmatprep.subr.bf16.mxu1 %v2862_v22  ;;  %v2704_v21 = vld [vmem:[#allocation2 + $0x250] sm:$0xff]  ;;  %v2711_v22 = vld [vmem:[#allocation2 + $0x288] sm:$0xff] }
 0x48f   :  { %2994 = vmatpush1.bf16.msra.mxu0 %v2859_v24  ;;  %3035 = vmatpush1.bf16.msra.mxu1 %v2861_v25  ;;  %v2713_v24 = vld [vmem:[#allocation2 + $0x298] sm:$0xff]  ;;  %v2710_v25 = vld [vmem:[#allocation2 + $0x280] sm:$0xff] }
 0x490   :  { %2995 = vmatprep.subr.bf16.mxu0 %v2868_v26  ;;  %3036 = vmatprep.subr.bf16.mxu1 %v2870_v27  ;;  %v2712_v26 = vld [vmem:[#allocation2 + $0x290] sm:$0xff]  ;;  %v2719_v27 = vld [vmem:[#allocation2 + $0x2c8] sm:$0xff] }
 0x493   :  { %2996 = vmatpush1.bf16.msra.mxu0 %v2867_v28  ;;  %3037 = vmatpush1.bf16.msra.mxu1 %v2869_v29  ;;  %v2721_v28 = vld [vmem:[#allocation2 + $0x2d8] sm:$0xff]  ;;  %v2718_v29 = vld [vmem:[#allocation2 + $0x2c0] sm:$0xff] }
 0x494   :  { %2997 = vmatprep.subr.bf16.mxu0 %v2876_v30  ;;  %3038 = vmatprep.subr.bf16.mxu1 %v2878_v31  ;;  %v2720_v30 = vld [vmem:[#allocation2 + $0x2d0] sm:$0xff]  ;;  %v2727_v31 = vld [vmem:[#allocation2 + $0x308] sm:$0xff] }
 0x497   :  { %2998 = vmatpush1.bf16.msra.mxu0 %v2875_v32  ;;  %3039 = vmatpush1.bf16.msra.mxu1 %v2877_v33  ;;  %v2729_v32 = vld [vmem:[#allocation2 + $0x318] sm:$0xff]  ;;  %v2726_v33 = vld [vmem:[#allocation2 + $0x300] sm:$0xff] }
 0x498   :  { %2999 = vmatprep.subr.bf16.mxu0 %v2884_v34  ;;  %3040 = vmatprep.subr.bf16.mxu1 %v2886_v35  ;;  %v2728_v34 = vld [vmem:[#allocation2 + $0x310] sm:$0xff]  ;;  %v2735_v35 = vld [vmem:[#allocation2 + $0x348] sm:$0xff] }
 0x49b   :  { %3000 = vmatpush1.bf16.msra.mxu0 %v2883_v36  ;;  %3041 = vmatpush1.bf16.msra.mxu1 %v2885_v37  ;;  %v2737_v36 = vld [vmem:[#allocation2 + $0x358] sm:$0xff]  ;;  %v2734_v37 = vld [vmem:[#allocation2 + $0x340] sm:$0xff] }
 0x49c   :  { %3051 = vmatprep.subr.bf16.mxu0 %v2631_v38  ;;  %3092 = vmatprep.subr.bf16.mxu1 %v2633_v39  ;;  %v2736_v38 = vld [vmem:[#allocation2 + $0x350] sm:$0xff]  ;;  %v2743_v39 = vld [vmem:[#allocation2 + $0x388] sm:$0xff] }
 0x49e   :  { %3002 = vmatmul.mubr.bf16.vlgmr.msra.gmra.mrb[24].mxu0 %v6662_v8  ;;  %3043 = vmatmul.mubr.bf16.vlgmr.msra.gmra.mrb[20].mxu1 %v6662_v8  ;;  %v2657_v8 = vld [vmem:[#allocation2 + $0xd8] sm:$0xff] }
 0x49f   :  { %3052 = vmatpush1.bf16.msra.mxu0 %v2630_v40  ;;  %3093 = vmatpush1.bf16.msra.mxu1 %v2632_v41  ;;  %v2745_v40 = vld [vmem:[#allocation2 + $0x398] sm:$0xff]  ;;  %v2742_v41 = vld [vmem:[#allocation2 + $0x380] sm:$0xff] }
 0x4a0   :  { %3053 = vmatprep.subr.bf16.mxu0 %v2639_v42  ;;  %3094 = vmatprep.subr.bf16.mxu1 %v2641_v44  ;;  %v2744_v42 = vld [vmem:[#allocation2 + $0x390] sm:$0xff]  ;;  %v2751_v44 = vld [vmem:[#allocation2 + $0x3c8] sm:$0xff] }
 0x4a1   :  { %3083 = vmatprep.mubr.bf16.mxu0 %v6654_v58  ;;  %3124 = vmatprep.mubr.bf16.mxu1 %v6654_v58 }
 0x4a3   :  { %3054 = vmatpush1.bf16.msra.mxu0 %v2638_v45  ;;  %3095 = vmatpush1.bf16.msra.mxu1 %v2640_v46  ;;  %v2753_v45 = vld [vmem:[#allocation2 + $0x3d8] sm:$0xff]  ;;  %v2750_v46 = vld [vmem:[#allocation2 + $0x3c0] sm:$0xff] }
 0x4a4   :  { %3055 = vmatprep.subr.bf16.mxu0 %v2647_v11  ;;  %3096 = vmatprep.subr.bf16.mxu1 %v2649_v47  ;;  %v2752_v11 = vld [vmem:[#allocation2 + $0x3d0] sm:$0xff]  ;;  %v2635_v47 = vld [vmem:[#allocation2 + $0x28] sm:$0xff] }
 0x4a7   :  { %3056 = vmatpush1.bf16.msra.mxu0 %v2646_v49  ;;  %3097 = vmatpush1.bf16.msra.mxu1 %v2648_v51  ;;  %v2637_v49 = vld [vmem:[#allocation2 + $0x38] sm:$0xff]  ;;  %v2634_v51 = vld [vmem:[#allocation2 + $0x20] sm:$0xff] }
 0x4a8   :  { %3057 = vmatprep.subr.bf16.mxu0 %v2655_v53  ;;  %3098 = vmatprep.subr.bf16.mxu1 %v2657_v8  ;;  %v2636_v53 = vld [vmem:[#allocation2 + $0x30] sm:$0xff]  ;;  %v2643_v8 = vld [vmem:[#allocation2 + $0x68] sm:$0xff] }
 0x4ab   :  { %3058 = vmatpush1.bf16.msra.mxu0 %v2654_v55  ;;  %3099 = vmatpush1.bf16.msra.mxu1 %v2656_v56  ;;  %v2645_v55 = vld [vmem:[#allocation2 + $0x78] sm:$0xff]  ;;  %v2642_v56 = vld [vmem:[#allocation2 + $0x60] sm:$0xff] }
 0x4ac   :  { %3059 = vmatprep.subr.bf16.mxu0 %v2663_v48  ;;  %3100 = vmatprep.subr.bf16.mxu1 %v2665_v59  ;;  %v2644_v48 = vld [vmem:[#allocation2 + $0x70] sm:$0xff]  ;;  %v2651_v59 = vld [vmem:[#allocation2 + $0xa8] sm:$0xff] }
 0x4af   :  { %3060 = vmatpush1.bf16.msra.mxu0 %v2662_v14  ;;  %3101 = vmatpush1.bf16.msra.mxu1 %v2664_v60  ;;  %v2653_v14 = vld [vmem:[#allocation2 + $0xb8] sm:$0xff]  ;;  %v2650_v60 = vld [vmem:[#allocation2 + $0xa0] sm:$0xff] }
 0x4b0   :  { %3061 = vmatprep.subr.bf16.mxu0 %v2671_v61  ;;  %3102 = vmatprep.subr.bf16.mxu1 %v2673_v62  ;;  %v2652_v61 = vld [vmem:[#allocation2 + $0xb0] sm:$0xff]  ;;  %v2659_v62 = vld [vmem:[#allocation2 + $0xe8] sm:$0xff] }
 0x4b3   :  { %3062 = vmatpush1.bf16.msra.mxu0 %v2670_v63  ;;  %3103 = vmatpush1.bf16.msra.mxu1 %v2672_v0  ;;  %v2661_v63 = vld [vmem:[#allocation2 + $0xf8] sm:$0xff]  ;;  %v2658_v0 = vld [vmem:[#allocation2 + $0xe0] sm:$0xff] }
 0x4b4   :  { %3063 = vmatprep.subr.bf16.mxu0 %v2679_v1  ;;  %3104 = vmatprep.subr.bf16.mxu1 %v2681_v2  ;;  %v2660_v1 = vld [vmem:[#allocation2 + $0xf0] sm:$0xff]  ;;  %v2667_v2 = vld [vmem:[#allocation2 + $0x128] sm:$0xff] }
 0x4b7   :  { %3064 = vmatpush1.bf16.msra.mxu0 %v2678_v3  ;;  %3105 = vmatpush1.bf16.msra.mxu1 %v2680_v4  ;;  %v2669_v3 = vld [vmem:[#allocation2 + $0x138] sm:$0xff]  ;;  %v2668_v4 = vld [vmem:[#allocation2 + $0x130] sm:$0xff] }
 0x4b8   :  { %3065 = vmatprep.subr.bf16.mxu0 %v2687_v5  ;;  %3106 = vmatprep.subr.bf16.mxu1 %v2689_v6  ;;  %v2675_v5 = vld [vmem:[#allocation2 + $0x168] sm:$0xff]  ;;  %v2677_v6 = vld [vmem:[#allocation2 + $0x178] sm:$0xff] }
 0x4bb   :  { %3066 = vmatpush1.bf16.msra.mxu0 %v2686_v7  ;;  %3107 = vmatpush1.bf16.msra.mxu1 %v2688_v9  ;;  %v2674_v7 = vld [vmem:[#allocation2 + $0x160] sm:$0xff]  ;;  %v2676_v9 = vld [vmem:[#allocation2 + $0x170] sm:$0xff] }
 0x4bc   :  { %3067 = vmatprep.subr.bf16.mxu0 %v2695_v10  ;;  %3108 = vmatprep.subr.bf16.mxu1 %v2697_v13  ;;  %v2683_v10 = vld [vmem:[#allocation2 + $0x1a8] sm:$0xff]  ;;  %v2685_v13 = vld [vmem:[#allocation2 + $0x1b8] sm:$0xff] }
 0x4bf   :  { %3068 = vmatpush1.bf16.msra.mxu0 %v2694_v17  ;;  %3109 = vmatpush1.bf16.msra.mxu1 %v2696_v18  ;;  %v2682_v17 = vld [vmem:[#allocation2 + $0x1a0] sm:$0xff]  ;;  %v2684_v18 = vld [vmem:[#allocation2 + $0x1b0] sm:$0xff] }
 0x4c0   :  { %3069 = vmatprep.subr.bf16.mxu0 %v2703_v19  ;;  %3110 = vmatprep.subr.bf16.mxu1 %v2705_v16  ;;  %v2691_v19 = vld [vmem:[#allocation2 + $0x1e8] sm:$0xff]  ;;  %v2693_v16 = vld [vmem:[#allocation2 + $0x1f8] sm:$0xff] }
 0x4c3   :  { %3070 = vmatpush1.bf16.msra.mxu0 %v2702_v20  ;;  %3111 = vmatpush1.bf16.msra.mxu1 %v2704_v21  ;;  %v2690_v20 = vld [vmem:[#allocation2 + $0x1e0] sm:$0xff]  ;;  %v2692_v21 = vld [vmem:[#allocation2 + $0x1f0] sm:$0xff] }
 0x4c4   :  { %3071 = vmatprep.subr.bf16.mxu0 %v2711_v22  ;;  %3112 = vmatprep.subr.bf16.mxu1 %v2713_v24  ;;  %v2699_v22 = vld [vmem:[#allocation2 + $0x228] sm:$0xff]  ;;  %v2701_v24 = vld [vmem:[#allocation2 + $0x238] sm:$0xff] }
 0x4c7   :  { %3072 = vmatpush1.bf16.msra.mxu0 %v2710_v25  ;;  %3113 = vmatpush1.bf16.msra.mxu1 %v2712_v26  ;;  %v2698_v25 = vld [vmem:[#allocation2 + $0x220] sm:$0xff]  ;;  %v2700_v26 = vld [vmem:[#allocation2 + $0x230] sm:$0xff] }
 0x4c8   :  { %3073 = vmatprep.subr.bf16.mxu0 %v2719_v27  ;;  %3114 = vmatprep.subr.bf16.mxu1 %v2721_v28  ;;  %v2707_v27 = vld [vmem:[#allocation2 + $0x268] sm:$0xff]  ;;  %v2709_v28 = vld [vmem:[#allocation2 + $0x278] sm:$0xff] }
 0x4cb   :  { %3074 = vmatpush1.bf16.msra.mxu0 %v2718_v29  ;;  %3115 = vmatpush1.bf16.msra.mxu1 %v2720_v30  ;;  %v2706_v29 = vld [vmem:[#allocation2 + $0x260] sm:$0xff]  ;;  %v2708_v30 = vld [vmem:[#allocation2 + $0x270] sm:$0xff] }
 0x4cc   :  { %3075 = vmatprep.subr.bf16.mxu0 %v2727_v31  ;;  %3116 = vmatprep.subr.bf16.mxu1 %v2729_v32  ;;  %v2715_v31 = vld [vmem:[#allocation2 + $0x2a8] sm:$0xff]  ;;  %v2717_v32 = vld [vmem:[#allocation2 + $0x2b8] sm:$0xff] }
 0x4cf   :  { %3076 = vmatpush1.bf16.msra.mxu0 %v2726_v33  ;;  %3117 = vmatpush1.bf16.msra.mxu1 %v2728_v34  ;;  %v2714_v33 = vld [vmem:[#allocation2 + $0x2a0] sm:$0xff]  ;;  %v2716_v34 = vld [vmem:[#allocation2 + $0x2b0] sm:$0xff] }
 0x4d0   :  { %3077 = vmatprep.subr.bf16.mxu0 %v2735_v35  ;;  %3118 = vmatprep.subr.bf16.mxu1 %v2737_v36  ;;  %v2723_v35 = vld [vmem:[#allocation2 + $0x2e8] sm:$0xff]  ;;  %v2725_v36 = vld [vmem:[#allocation2 + $0x2f8] sm:$0xff] }
 0x4d3   :  { %3078 = vmatpush1.bf16.msra.mxu0 %v2734_v37  ;;  %3119 = vmatpush1.bf16.msra.mxu1 %v2736_v38  ;;  %v2722_v37 = vld [vmem:[#allocation2 + $0x2e0] sm:$0xff]  ;;  %v2724_v38 = vld [vmem:[#allocation2 + $0x2f0] sm:$0xff] }
 0x4d4   :  { %3079 = vmatprep.subr.bf16.mxu0 %v2743_v39  ;;  %3120 = vmatprep.subr.bf16.mxu1 %v2745_v40  ;;  %v2731_v39 = vld [vmem:[#allocation2 + $0x328] sm:$0xff]  ;;  %v2733_v40 = vld [vmem:[#allocation2 + $0x338] sm:$0xff] }
 0x4d7   :  { %3080 = vmatpush1.bf16.msra.mxu0 %v2742_v41  ;;  %3121 = vmatpush1.bf16.msra.mxu1 %v2744_v42  ;;  %v2730_v41 = vld [vmem:[#allocation2 + $0x320] sm:$0xff]  ;;  %v2732_v42 = vld [vmem:[#allocation2 + $0x330] sm:$0xff] }
 0x4d8   :  { %3081 = vmatprep.subr.bf16.mxu0 %v2751_v44  ;;  %3122 = vmatprep.subr.bf16.mxu1 %v2753_v45  ;;  %v2739_v44 = vld [vmem:[#allocation2 + $0x368] sm:$0xff]  ;;  %v2741_v45 = vld [vmem:[#allocation2 + $0x378] sm:$0xff] }
 0x4db   :  { %3082 = vmatpush1.bf16.msra.mxu0 %v2750_v46  ;;  %3123 = vmatpush1.bf16.msra.mxu1 %v2752_v11  ;;  %v2738_v46 = vld [vmem:[#allocation2 + $0x360] sm:$0xff]  ;;  %v2740_v11 = vld [vmem:[#allocation2 + $0x370] sm:$0xff] }
 0x4dc   :  { %3133 = vmatprep.subr.bf16.mxu0 %v2635_v47  ;;  %3174 = vmatprep.subr.bf16.mxu1 %v2637_v49  ;;  %v2747_v47 = vld [vmem:[#allocation2 + $0x3a8] sm:$0xff]  ;;  %v2749_v49 = vld [vmem:[#allocation2 + $0x3b8] sm:$0xff] }
 0x4de   :  { %3084 = vmatmul.mubr.bf16.vlgmr.msra.gmra.mrb[28].mxu0 %v6652_v57  ;;  %3125 = vmatmul.mubr.bf16.vlgmr.msra.gmra.mrb[24].mxu1 %v6652_v57 }
 0x4df   :  { %3134 = vmatpush1.bf16.msra.mxu0 %v2634_v51  ;;  %3175 = vmatpush1.bf16.msra.mxu1 %v2636_v53  ;;  %v2746_v51 = vld [vmem:[#allocation2 + $0x3a0] sm:$0xff]  ;;  %v2748_v53 = vld [vmem:[#allocation2 + $0x3b0] sm:$0xff] }
 0x4e0   :  { %3135 = vmatprep.subr.bf16.mxu0 %v2643_v8  ;;  %3176 = vmatprep.subr.bf16.mxu1 %v2645_v55  ;;  %v2755_v8 = vld [vmem:[#allocation2 + $0x3e8] sm:$0xff]  ;;  %v2757_v55 = vld [vmem:[#allocation2 + $0x3f8] sm:$0xff] }
 0x4e1   :  { %3165 = vmatprep.mubr.bf16.mxu0 %v6654_v58  ;;  %3206 = vmatprep.mubr.bf16.mxu1 %v6654_v58  ;;  %v2666_v58 = vld [vmem:[#allocation2 + $0x120] sm:$0xff] }
 0x4e3   :  { %3136 = vmatpush1.bf16.msra.mxu0 %v2642_v56  ;;  %3177 = vmatpush1.bf16.msra.mxu1 %v2644_v48  ;;  %v2754_v56 = vld [vmem:[#allocation2 + $0x3e0] sm:$0xff]  ;;  %v2756_v48 = vld [vmem:[#allocation2 + $0x3f0] sm:$0xff] }
 0x4e4   :  { %3137 = vmatprep.subr.bf16.mxu0 %v2651_v59  ;;  %3178 = vmatprep.subr.bf16.mxu1 %v2653_v14  ;;  %v3217_v59 = vld [vmem:[#allocation2 + $0x808] sm:$0xff]  ;;  %v3219_v14 = vld [vmem:[#allocation2 + $0x818] sm:$0xff] }
 0x4e7   :  { %3138 = vmatpush1.bf16.msra.mxu0 %v2650_v60  ;;  %3179 = vmatpush1.bf16.msra.mxu1 %v2652_v61  ;;  %v3216_v60 = vld [vmem:[#allocation2 + $0x800] sm:$0xff]  ;;  %v3218_v61 = vld [vmem:[#allocation2 + $0x810] sm:$0xff] }
 0x4e8   :  { %3139 = vmatprep.subr.bf16.mxu0 %v2659_v62  ;;  %3180 = vmatprep.subr.bf16.mxu1 %v2661_v63  ;;  %v3225_v62 = vld [vmem:[#allocation2 + $0x848] sm:$0xff]  ;;  %v3227_v63 = vld [vmem:[#allocation2 + $0x858] sm:$0xff] }
 0x4eb   :  { %3140 = vmatpush1.bf16.msra.mxu0 %v2658_v0  ;;  %3181 = vmatpush1.bf16.msra.mxu1 %v2660_v1  ;;  %v3224_v0 = vld [vmem:[#allocation2 + $0x840] sm:$0xff]  ;;  %v3226_v1 = vld [vmem:[#allocation2 + $0x850] sm:$0xff] }
 0x4ec   :  { %3141 = vmatprep.subr.bf16.mxu0 %v2667_v2  ;;  %3182 = vmatprep.subr.bf16.mxu1 %v2669_v3  ;;  %v3233_v2 = vld [vmem:[#allocation2 + $0x888] sm:$0xff]  ;;  %v3235_v3 = vld [vmem:[#allocation2 + $0x898] sm:$0xff] }
 0x4ef   :  { %3142 = vmatpush1.bf16.msra.mxu0 %v2666_v58  ;;  %3183 = vmatpush1.bf16.msra.mxu1 %v2668_v4  ;;  %v3232_v58 = vld [vmem:[#allocation2 + $0x880] sm:$0xff]  ;;  %v3234_v4 = vld [vmem:[#allocation2 + $0x890] sm:$0xff] }
 0x4f0   :  { %3143 = vmatprep.subr.bf16.mxu0 %v2675_v5  ;;  %3184 = vmatprep.subr.bf16.mxu1 %v2677_v6  ;;  %v3241_v5 = vld [vmem:[#allocation2 + $0x8c8] sm:$0xff]  ;;  %v3240_v6 = vld [vmem:[#allocation2 + $0x8c0] sm:$0xff] }
 0x4f3   :  { %3144 = vmatpush1.bf16.msra.mxu0 %v2674_v7  ;;  %3185 = vmatpush1.bf16.msra.mxu1 %v2676_v9  ;;  %v3242_v7 = vld [vmem:[#allocation2 + $0x8d0] sm:$0xff]  ;;  %v3249_v9 = vld [vmem:[#allocation2 + $0x908] sm:$0xff] }
 0x4f4   :  { %3145 = vmatprep.subr.bf16.mxu0 %v2683_v10  ;;  %3186 = vmatprep.subr.bf16.mxu1 %v2685_v13  ;;  %v3251_v10 = vld [vmem:[#allocation2 + $0x918] sm:$0xff]  ;;  %v3248_v13 = vld [vmem:[#allocation2 + $0x900] sm:$0xff] }
 0x4f7   :  { %3146 = vmatpush1.bf16.msra.mxu0 %v2682_v17  ;;  %3187 = vmatpush1.bf16.msra.mxu1 %v2684_v18  ;;  %v3250_v17 = vld [vmem:[#allocation2 + $0x910] sm:$0xff]  ;;  %v3257_v18 = vld [vmem:[#allocation2 + $0x948] sm:$0xff] }
 0x4f8   :  { %3147 = vmatprep.subr.bf16.mxu0 %v2691_v19  ;;  %3188 = vmatprep.subr.bf16.mxu1 %v2693_v16  ;;  %v3259_v19 = vld [vmem:[#allocation2 + $0x958] sm:$0xff]  ;;  %v3256_v16 = vld [vmem:[#allocation2 + $0x940] sm:$0xff] }
 0x4fb   :  { %3148 = vmatpush1.bf16.msra.mxu0 %v2690_v20  ;;  %3189 = vmatpush1.bf16.msra.mxu1 %v2692_v21  ;;  %v3258_v20 = vld [vmem:[#allocation2 + $0x950] sm:$0xff] }
 0x4fc   :  { %3149 = vmatprep.subr.bf16.mxu0 %v2699_v22  ;;  %3190 = vmatprep.subr.bf16.mxu1 %v2701_v24  ;;  %v3265_v24 = vld [vmem:[#allocation2 + $0x988] sm:$0xff] }
 0x4ff   :  { %3150 = vmatpush1.bf16.msra.mxu0 %v2698_v25  ;;  %3191 = vmatpush1.bf16.msra.mxu1 %v2700_v26  ;;  %v3267_v25 = vld [vmem:[#allocation2 + $0x998] sm:$0xff] }
 0x500   :  { %3151 = vmatprep.subr.bf16.mxu0 %v2707_v27  ;;  %3192 = vmatprep.subr.bf16.mxu1 %v2709_v28 }
 0x503   :  { %3152 = vmatpush1.bf16.msra.mxu0 %v2706_v29  ;;  %3193 = vmatpush1.bf16.msra.mxu1 %v2708_v30 }
 0x504   :  { %3153 = vmatprep.subr.bf16.mxu0 %v2715_v31  ;;  %3194 = vmatprep.subr.bf16.mxu1 %v2717_v32  ;;  %v3264_v32 = vld [vmem:[#allocation2 + $0x980] sm:$0xff] }
 0x507   :  { %3154 = vmatpush1.bf16.msra.mxu0 %v2714_v33  ;;  %3195 = vmatpush1.bf16.msra.mxu1 %v2716_v34  ;;  %v3266_v33 = vld [vmem:[#allocation2 + $0x990] sm:$0xff]  ;;  %v3273_v34 = vld [vmem:[#allocation2 + $0x9c8] sm:$0xff] }
 0x508   :  { %3155 = vmatprep.subr.bf16.mxu0 %v2723_v35  ;;  %3196 = vmatprep.subr.bf16.mxu1 %v2725_v36  ;;  %v3275_v35 = vld [vmem:[#allocation2 + $0x9d8] sm:$0xff]  ;;  %v3272_v36 = vld [vmem:[#allocation2 + $0x9c0] sm:$0xff] }
 0x50b   :  { %3156 = vmatpush1.bf16.msra.mxu0 %v2722_v37  ;;  %3197 = vmatpush1.bf16.msra.mxu1 %v2724_v38  ;;  %v3274_v37 = vld [vmem:[#allocation2 + $0x9d0] sm:$0xff]  ;;  %v3281_v38 = vld [vmem:[#allocation2 + $0xa08] sm:$0xff] }
 0x50c   :  { %3157 = vmatprep.subr.bf16.mxu0 %v2731_v39  ;;  %3198 = vmatprep.subr.bf16.mxu1 %v2733_v40  ;;  %v3283_v39 = vld [vmem:[#allocation2 + $0xa18] sm:$0xff]  ;;  %v3280_v40 = vld [vmem:[#allocation2 + $0xa00] sm:$0xff] }
 0x50f   :  { %3158 = vmatpush1.bf16.msra.mxu0 %v2730_v41  ;;  %3199 = vmatpush1.bf16.msra.mxu1 %v2732_v42  ;;  %v3282_v41 = vld [vmem:[#allocation2 + $0xa10] sm:$0xff]  ;;  %v3289_v42 = vld [vmem:[#allocation2 + $0xa48] sm:$0xff] }
 0x510   :  { %3159 = vmatprep.subr.bf16.mxu0 %v2739_v44  ;;  %3200 = vmatprep.subr.bf16.mxu1 %v2741_v45  ;;  %v3291_v44 = vld [vmem:[#allocation2 + $0xa58] sm:$0xff]  ;;  %v3288_v45 = vld [vmem:[#allocation2 + $0xa40] sm:$0xff] }
 0x513   :  { %3160 = vmatpush1.bf16.msra.mxu0 %v2738_v46  ;;  %3201 = vmatpush1.bf16.msra.mxu1 %v2740_v11  ;;  %v3290_v46 = vld [vmem:[#allocation2 + $0xa50] sm:$0xff]  ;;  %v3297_v11 = vld [vmem:[#allocation2 + $0xa88] sm:$0xff] }
 0x514   :  { %3161 = vmatprep.subr.bf16.mxu0 %v2747_v47  ;;  %3202 = vmatprep.subr.bf16.mxu1 %v2749_v49  ;;  %v3299_v47 = vld [vmem:[#allocation2 + $0xa98] sm:$0xff]  ;;  %v3296_v49 = vld [vmem:[#allocation2 + $0xa80] sm:$0xff] }
 0x517   :  { %3162 = vmatpush1.bf16.msra.mxu0 %v2746_v51  ;;  %3203 = vmatpush1.bf16.msra.mxu1 %v2748_v53  ;;  %v3298_v51 = vld [vmem:[#allocation2 + $0xa90] sm:$0xff]  ;;  %v3305_v53 = vld [vmem:[#allocation2 + $0xac8] sm:$0xff] }
 0x518   :  { %3163 = vmatprep.subr.bf16.mxu0 %v2755_v8  ;;  %3204 = vmatprep.subr.bf16.mxu1 %v2757_v55  ;;  %v3307_v8 = vld [vmem:[#allocation2 + $0xad8] sm:$0xff]  ;;  %v3304_v55 = vld [vmem:[#allocation2 + $0xac0] sm:$0xff] }
 0x51b   :  { %3164 = vmatpush1.bf16.msra.mxu0 %v2754_v56  ;;  %3205 = vmatpush1.bf16.msra.mxu1 %v2756_v48  ;;  %v3306_v56 = vld [vmem:[#allocation2 + $0xad0] sm:$0xff]  ;;  %v3313_v48 = vld [vmem:[#allocation2 + $0xb08] sm:$0xff] }
 0x51c   :  { %3344 = vmatprep.subr.bf16.mxu0 %v3217_v59  ;;  %3385 = vmatprep.subr.bf16.mxu1 %v3219_v14  ;;  %v3315_v59 = vld [vmem:[#allocation2 + $0xb18] sm:$0xff]  ;;  %v3312_v14 = vld [vmem:[#allocation2 + $0xb00] sm:$0xff] }
 0x51e   :  { %3166 = vmatmul.mubr.bf16.vlgmr.msra.gmra.mrb[32].mxu0 %v6652_v57  ;;  %3207 = vmatmul.mubr.bf16.vlgmr.msra.gmra.mrb[28].mxu1 %v6652_v57  ;;  %v3243_v57 = vld [vmem:[#allocation2 + $0x8d8] sm:$0xff] }
 0x51f   :  { %3345 = vmatpush1.bf16.msra.mxu0 %v3216_v60  ;;  %3386 = vmatpush1.bf16.msra.mxu1 %v3218_v61  ;;  %v3314_v60 = vld [vmem:[#allocation2 + $0xb10] sm:$0xff]  ;;  %v3321_v61 = vld [vmem:[#allocation2 + $0xb48] sm:$0xff] }
 0x520   :  { %3346 = vmatprep.subr.bf16.mxu0 %v3225_v62  ;;  %3387 = vmatprep.subr.bf16.mxu1 %v3227_v63  ;;  %v3323_v62 = vld [vmem:[#allocation2 + $0xb58] sm:$0xff]  ;;  %v3320_v63 = vld [vmem:[#allocation2 + $0xb40] sm:$0xff] }
 0x521   :  { %3376 = vmatprep.mubr.bf16.mxu0 %v6677_v15  ;;  %3417 = vmatprep.mubr.bf16.mxu1 %v6677_v15 }
 0x523   :  { %3347 = vmatpush1.bf16.msra.mxu0 %v3224_v0  ;;  %3388 = vmatpush1.bf16.msra.mxu1 %v3226_v1  ;;  %v3322_v0 = vld [vmem:[#allocation2 + $0xb50] sm:$0xff]  ;;  %v3329_v1 = vld [vmem:[#allocation2 + $0xb88] sm:$0xff] }
 0x524   :  { %3348 = vmatprep.subr.bf16.mxu0 %v3233_v2  ;;  %3389 = vmatprep.subr.bf16.mxu1 %v3235_v3  ;;  %v3331_v2 = vld [vmem:[#allocation2 + $0xb98] sm:$0xff]  ;;  %v3328_v3 = vld [vmem:[#allocation2 + $0xb80] sm:$0xff] }
 0x527   :  { %3349 = vmatpush1.bf16.msra.mxu0 %v3232_v58  ;;  %3390 = vmatpush1.bf16.msra.mxu1 %v3234_v4  ;;  %v3330_v58 = vld [vmem:[#allocation2 + $0xb90] sm:$0xff]  ;;  %v3337_v4 = vld [vmem:[#allocation2 + $0xbc8] sm:$0xff] }
 0x528   :  { %3350 = vmatprep.subr.bf16.mxu0 %v3241_v5  ;;  %3391 = vmatprep.subr.bf16.mxu1 %v3243_v57  ;;  %v3339_v5 = vld [vmem:[#allocation2 + $0xbd8] sm:$0xff]  ;;  %v3336_v57 = vld [vmem:[#allocation2 + $0xbc0] sm:$0xff] }
 0x52b   :  { %3351 = vmatpush1.bf16.msra.mxu0 %v3240_v6  ;;  %3392 = vmatpush1.bf16.msra.mxu1 %v3242_v7  ;;  %v3338_v6 = vld [vmem:[#allocation2 + $0xbd0] sm:$0xff]  ;;  %v3221_v7 = vld [vmem:[#allocation2 + $0x828] sm:$0xff] }
 0x52c   :  { %3352 = vmatprep.subr.bf16.mxu0 %v3249_v9  ;;  %3393 = vmatprep.subr.bf16.mxu1 %v3251_v10  ;;  %v3223_v9 = vld [vmem:[#allocation2 + $0x838] sm:$0xff]  ;;  %v3220_v10 = vld [vmem:[#allocation2 + $0x820] sm:$0xff] }
 0x52f   :  { %3353 = vmatpush1.bf16.msra.mxu0 %v3248_v13  ;;  %3394 = vmatpush1.bf16.msra.mxu1 %v3250_v17  ;;  %v3222_v13 = vld [vmem:[#allocation2 + $0x830] sm:$0xff]  ;;  %v3229_v17 = vld [vmem:[#allocation2 + $0x868] sm:$0xff] }
 0x530   :  { %3354 = vmatprep.subr.bf16.mxu0 %v3257_v18  ;;  %3395 = vmatprep.subr.bf16.mxu1 %v3259_v19  ;;  %v3231_v18 = vld [vmem:[#allocation2 + $0x878] sm:$0xff]  ;;  %v3228_v19 = vld [vmem:[#allocation2 + $0x860] sm:$0xff] }
 0x531   :  { %v6697_v21 = vpop.f32.mrb[20].mxu0  ;;  %v6699_v22 = vpop.f32.mrb[16].mxu1 }
 0x532   :  { %v6701_v26 = vpop.f32.mrb[21].mxu0  ;;  %v6703_v27 = vpop.f32.mrb[17].mxu1 }
 0x533   :  { %v2925_v28 = vpop.f32.mrb[22].mxu0  ;;  %v2966_v29 = vpop.f32.mrb[18].mxu1  ;;  %3355 = vmatpush1.bf16.msra.mxu0 %v3256_v16  ;;  %3396 = vmatpush1.bf16.msra.mxu1 %v3258_v20  ;;  %v3230_v16 = vld [vmem:[#allocation2 + $0x870] sm:$0xff]  ;;  %v3237_v20 = vld [vmem:[#allocation2 + $0x8a8] sm:$0xff] }
 0x534   :  { %v2926_v30 = vpop.f32.mrb[23].mxu0  ;;  %v2967_v31 = vpop.f32.mrb[19].mxu1  ;;  %3356 = vmatprep.subr.bf16.mxu0 %v3265_v24  ;;  %3397 = vmatprep.subr.bf16.mxu1 %v3267_v25  ;;  %v3239_v24 = vld [vmem:[#allocation2 + $0x8b8] sm:$0xff]  ;;  %v3236_v25 = vld [vmem:[#allocation2 + $0x8a0] sm:$0xff]  ;;  %v3238_v28 = vld [vmem:[#allocation2 + $0x8b0] sm:$0xff] }
 0x535   :  { %v3245_v29 = vld [vmem:[#allocation2 + $0x8e8] sm:$0xff]  ;;  %v3247_v30 = vld [vmem:[#allocation2 + $0x8f8] sm:$0xff]  ;;  %v3244_v31 = vld [vmem:[#allocation2 + $0x8e0] sm:$0xff] }
 0x537   :  { %3357 = vmatpush1.bf16.msra.mxu0 %v3264_v32  ;;  %3398 = vmatpush1.bf16.msra.mxu1 %v3266_v33  ;;  %v3246_v32 = vld [vmem:[#allocation2 + $0x8f0] sm:$0xff]  ;;  %v3253_v33 = vld [vmem:[#allocation2 + $0x928] sm:$0xff] }
 0x538   :  { %3358 = vmatprep.subr.bf16.mxu0 %v3273_v34  ;;  %3399 = vmatprep.subr.bf16.mxu1 %v3275_v35  ;;  %v3255_v34 = vld [vmem:[#allocation2 + $0x938] sm:$0xff]  ;;  %v3254_v35 = vld [vmem:[#allocation2 + $0x930] sm:$0xff] }
 0x53b   :  { %3359 = vmatpush1.bf16.msra.mxu0 %v3272_v36  ;;  %3400 = vmatpush1.bf16.msra.mxu1 %v3274_v37  ;;  %v3261_v36 = vld [vmem:[#allocation2 + $0x968] sm:$0xff]  ;;  %v3263_v37 = vld [vmem:[#allocation2 + $0x978] sm:$0xff] }
 0x53c   :  { %3360 = vmatprep.subr.bf16.mxu0 %v3281_v38  ;;  %3401 = vmatprep.subr.bf16.mxu1 %v3283_v39  ;;  %v3260_v38 = vld [vmem:[#allocation2 + $0x960] sm:$0xff]  ;;  %v3262_v39 = vld [vmem:[#allocation2 + $0x970] sm:$0xff] }
 0x53f   :  { %3361 = vmatpush1.bf16.msra.mxu0 %v3280_v40  ;;  %3402 = vmatpush1.bf16.msra.mxu1 %v3282_v41 }
 0x540   :  { %3362 = vmatprep.subr.bf16.mxu0 %v3289_v42  ;;  %3403 = vmatprep.subr.bf16.mxu1 %v3291_v44  ;;  %v3269_v42 = vld [vmem:[#allocation2 + $0x9a8] sm:$0xff]  ;;  %v3271_v44 = vld [vmem:[#allocation2 + $0x9b8] sm:$0xff] }
 0x543   :  { %3363 = vmatpush1.bf16.msra.mxu0 %v3288_v45  ;;  %3404 = vmatpush1.bf16.msra.mxu1 %v3290_v46 }
 0x544   :  { %3364 = vmatprep.subr.bf16.mxu0 %v3297_v11  ;;  %3405 = vmatprep.subr.bf16.mxu1 %v3299_v47 }
 0x547   :  { %3365 = vmatpush1.bf16.msra.mxu0 %v3296_v49  ;;  %3406 = vmatpush1.bf16.msra.mxu1 %v3298_v51 }
 0x548   :  { %3366 = vmatprep.subr.bf16.mxu0 %v3305_v53  ;;  %3407 = vmatprep.subr.bf16.mxu1 %v3307_v8  ;;  %v3268_v53 = vld [vmem:[#allocation2 + $0x9a0] sm:$0xff]  ;;  %v3270_v8 = vld [vmem:[#allocation2 + $0x9b0] sm:$0xff] }
 0x54b   :  { %3367 = vmatpush1.bf16.msra.mxu0 %v3304_v55  ;;  %3408 = vmatpush1.bf16.msra.mxu1 %v3306_v56  ;;  %v3277_v55 = vld [vmem:[#allocation2 + $0x9e8] sm:$0xff]  ;;  %v3279_v56 = vld [vmem:[#allocation2 + $0x9f8] sm:$0xff] }
 0x54c   :  { %3368 = vmatprep.subr.bf16.mxu0 %v3313_v48  ;;  %3409 = vmatprep.subr.bf16.mxu1 %v3315_v59  ;;  %v3276_v48 = vld [vmem:[#allocation2 + $0x9e0] sm:$0xff]  ;;  %v3278_v59 = vld [vmem:[#allocation2 + $0x9f0] sm:$0xff] }
 0x54f   :  { %3369 = vmatpush1.bf16.msra.mxu0 %v3312_v14  ;;  %3410 = vmatpush1.bf16.msra.mxu1 %v3314_v60  ;;  %v3285_v14 = vld [vmem:[#allocation2 + $0xa28] sm:$0xff]  ;;  %v3287_v60 = vld [vmem:[#allocation2 + $0xa38] sm:$0xff] }
 0x550   :  { %3370 = vmatprep.subr.bf16.mxu0 %v3321_v61  ;;  %3411 = vmatprep.subr.bf16.mxu1 %v3323_v62  ;;  %v3284_v61 = vld [vmem:[#allocation2 + $0xa20] sm:$0xff]  ;;  %v3286_v62 = vld [vmem:[#allocation2 + $0xa30] sm:$0xff] }
 0x553   :  { %3371 = vmatpush1.bf16.msra.mxu0 %v3320_v63  ;;  %3412 = vmatpush1.bf16.msra.mxu1 %v3322_v0  ;;  %v3293_v63 = vld [vmem:[#allocation2 + $0xa68] sm:$0xff]  ;;  %v3295_v0 = vld [vmem:[#allocation2 + $0xa78] sm:$0xff] }
 0x554   :  { %3372 = vmatprep.subr.bf16.mxu0 %v3329_v1  ;;  %3413 = vmatprep.subr.bf16.mxu1 %v3331_v2  ;;  %v3292_v1 = vld [vmem:[#allocation2 + $0xa60] sm:$0xff]  ;;  %v3294_v2 = vld [vmem:[#allocation2 + $0xa70] sm:$0xff] }
 0x557   :  { %3373 = vmatpush1.bf16.msra.mxu0 %v3328_v3  ;;  %3414 = vmatpush1.bf16.msra.mxu1 %v3330_v58  ;;  %v3301_v3 = vld [vmem:[#allocation2 + $0xaa8] sm:$0xff]  ;;  %v3303_v58 = vld [vmem:[#allocation2 + $0xab8] sm:$0xff] }
 0x558   :  { %3374 = vmatprep.subr.bf16.mxu0 %v3337_v4  ;;  %3415 = vmatprep.subr.bf16.mxu1 %v3339_v5  ;;  %v3300_v4 = vld [vmem:[#allocation2 + $0xaa0] sm:$0xff]  ;;  %v3302_v5 = vld [vmem:[#allocation2 + $0xab0] sm:$0xff] }
 0x55b   :  { %3375 = vmatpush1.bf16.msra.mxu0 %v3336_v57  ;;  %3416 = vmatpush1.bf16.msra.mxu1 %v3338_v6  ;;  %v3309_v57 = vld [vmem:[#allocation2 + $0xae8] sm:$0xff]  ;;  %v3311_v6 = vld [vmem:[#allocation2 + $0xaf8] sm:$0xff] }
 0x55c   :  { %3426 = vmatprep.subr.bf16.mxu0 %v3221_v7  ;;  %3467 = vmatprep.subr.bf16.mxu1 %v3223_v9  ;;  %v3308_v7 = vld [vmem:[#allocation2 + $0xae0] sm:$0xff]  ;;  %v3310_v9 = vld [vmem:[#allocation2 + $0xaf0] sm:$0xff] }
 0x55e   :  { %3377 = vmatmul.mubr.bf16.vlgmr.msra.gmra.mrb[36].mxu0 %v6675_v12  ;;  %3418 = vmatmul.mubr.bf16.vlgmr.msra.gmra.mrb[32].mxu1 %v6675_v12 }
 0x55f   :  { %3427 = vmatpush1.bf16.msra.mxu0 %v3220_v10  ;;  %3468 = vmatpush1.bf16.msra.mxu1 %v3222_v13  ;;  %v3317_v10 = vld [vmem:[#allocation2 + $0xb28] sm:$0xff]  ;;  %v3319_v13 = vld [vmem:[#allocation2 + $0xb38] sm:$0xff] }
 0x560   :  { %3428 = vmatprep.subr.bf16.mxu0 %v3229_v17  ;;  %3469 = vmatprep.subr.bf16.mxu1 %v3231_v18  ;;  %v3316_v17 = vld [vmem:[#allocation2 + $0xb20] sm:$0xff]  ;;  %v3318_v18 = vld [vmem:[#allocation2 + $0xb30] sm:$0xff] }
 0x561   :  { %3458 = vmatprep.mubr.bf16.mxu0 %v6677_v15  ;;  %3499 = vmatprep.mubr.bf16.mxu1 %v6677_v15  ;;  %v3252_v15 = vld [vmem:[#allocation2 + $0x920] sm:$0xff] }
 0x563   :  { %3429 = vmatpush1.bf16.msra.mxu0 %v3228_v19  ;;  %3470 = vmatpush1.bf16.msra.mxu1 %v3230_v16  ;;  %v3325_v19 = vld [vmem:[#allocation2 + $0xb68] sm:$0xff]  ;;  %v3327_v16 = vld [vmem:[#allocation2 + $0xb78] sm:$0xff] }
 0x564   :  { %3430 = vmatprep.subr.bf16.mxu0 %v3237_v20  ;;  %3471 = vmatprep.subr.bf16.mxu1 %v3239_v24  ;;  %v3324_v20 = vld [vmem:[#allocation2 + $0xb60] sm:$0xff]  ;;  %v3326_v24 = vld [vmem:[#allocation2 + $0xb70] sm:$0xff] }
 0x567   :  { %3431 = vmatpush1.bf16.msra.mxu0 %v3236_v25  ;;  %3472 = vmatpush1.bf16.msra.mxu1 %v3238_v28  ;;  %v3333_v25 = vld [vmem:[#allocation2 + $0xba8] sm:$0xff]  ;;  %v3335_v28 = vld [vmem:[#allocation2 + $0xbb8] sm:$0xff] }
 0x568   :  { %3432 = vmatprep.subr.bf16.mxu0 %v3245_v29  ;;  %3473 = vmatprep.subr.bf16.mxu1 %v3247_v30  ;;  %v3332_v29 = vld [vmem:[#allocation2 + $0xba0] sm:$0xff]  ;;  %v3334_v30 = vld [vmem:[#allocation2 + $0xbb0] sm:$0xff] }
 0x56b   :  { %3433 = vmatpush1.bf16.msra.mxu0 %v3244_v31  ;;  %3474 = vmatpush1.bf16.msra.mxu1 %v3246_v32  ;;  %v3341_v31 = vld [vmem:[#allocation2 + $0xbe8] sm:$0xff]  ;;  %v3343_v32 = vld [vmem:[#allocation2 + $0xbf8] sm:$0xff] }
 0x56c   :  { %3434 = vmatprep.subr.bf16.mxu0 %v3253_v33  ;;  %3475 = vmatprep.subr.bf16.mxu1 %v3255_v34  ;;  %v3340_v33 = vld [vmem:[#allocation2 + $0xbe0] sm:$0xff]  ;;  %v3342_v34 = vld [vmem:[#allocation2 + $0xbf0] sm:$0xff] }
 0x56f   :  { %3435 = vmatpush1.bf16.msra.mxu0 %v3252_v15  ;;  %3476 = vmatpush1.bf16.msra.mxu1 %v3254_v35 }
 0x570   :  { %3436 = vmatprep.subr.bf16.mxu0 %v3261_v36  ;;  %3477 = vmatprep.subr.bf16.mxu1 %v3263_v37 }
 0x571   :  { %v6709_v40 = vpop.f32.mrb[24].mxu0  ;;  %v6711_v41 = vpop.f32.mrb[20].mxu1 }
 0x572   :  { %v6713_v45 = vpop.f32.mrb[25].mxu0  ;;  %v6715_v46 = vpop.f32.mrb[21].mxu1 }
 0x573   :  { %v3007_v11 = vpop.f32.mrb[26].mxu0  ;;  %v3048_v47 = vpop.f32.mrb[22].mxu1  ;;  %3437 = vmatpush1.bf16.msra.mxu0 %v3260_v38  ;;  %3478 = vmatpush1.bf16.msra.mxu1 %v3262_v39 }
 0x574   :  { %v3008_v49 = vpop.f32.mrb[27].mxu0  ;;  %v3049_v51 = vpop.f32.mrb[23].mxu1  ;;  %3438 = vmatprep.subr.bf16.mxu0 %v3269_v42  ;;  %3479 = vmatprep.subr.bf16.mxu1 %v3271_v44 }
 0x577   :  { %3439 = vmatpush1.bf16.msra.mxu0 %v3268_v53  ;;  %3480 = vmatpush1.bf16.msra.mxu1 %v3270_v8 }
 0x578   :  { %3440 = vmatprep.subr.bf16.mxu0 %v3277_v55  ;;  %3481 = vmatprep.subr.bf16.mxu1 %v3279_v56 }
 0x57b   :  { %3441 = vmatpush1.bf16.msra.mxu0 %v3276_v48  ;;  %3482 = vmatpush1.bf16.msra.mxu1 %v3278_v59 }
 0x57c   :  { %3442 = vmatprep.subr.bf16.mxu0 %v3285_v14  ;;  %3483 = vmatprep.subr.bf16.mxu1 %v3287_v60  ;;  %v3517_v60 = vld [vmem:[#allocation9 + $0x6] ss:$8 sm:$0xf] }
 0x57f   :  { %3443 = vmatpush1.bf16.msra.mxu0 %v3284_v61  ;;  %3484 = vmatpush1.bf16.msra.mxu1 %v3286_v62  ;;  %v3518_v61 = vld [vmem:[#allocation9 + $0x6] ss:$8 sm:$0xf0] }
 0x580   :  { %3444 = vmatprep.subr.bf16.mxu0 %v3293_v63  ;;  %3485 = vmatprep.subr.bf16.mxu1 %v3295_v0  ;;  %v3519_v62 = vor.u32 %v3518_v61, %v3517_v60 }
 0x582   :  { %v3524_v63 = vrot.slane %v3519_v62, %v6617_v50  ;;  %v3532_v0 = vrot.slane %v3519_v62, %v6630_v23 }
 0x583   :  { %3445 = vmatpush1.bf16.msra.mxu0 %v3292_v1  ;;  %3486 = vmatpush1.bf16.msra.mxu1 %v3294_v2  ;;  %v3536_v2 = vrot.slane %v3519_v62, %v6624_v54 }
 0x584   :  { %3446 = vmatprep.subr.bf16.mxu0 %v3301_v3  ;;  %3487 = vmatprep.subr.bf16.mxu1 %v3303_v58 }
 0x587   :  { %3447 = vmatpush1.bf16.msra.mxu0 %v3300_v4  ;;  %3488 = vmatpush1.bf16.msra.mxu1 %v3302_v5 }
 0x588   :  { %3448 = vmatprep.subr.bf16.mxu0 %v3309_v57  ;;  %3489 = vmatprep.subr.bf16.mxu1 %v3311_v6 }
 0x58b   :  { %3449 = vmatpush1.bf16.msra.mxu0 %v3308_v7  ;;  %3490 = vmatpush1.bf16.msra.mxu1 %v3310_v9 }
 0x58c   :  { %3450 = vmatprep.subr.bf16.mxu0 %v3317_v10  ;;  %3491 = vmatprep.subr.bf16.mxu1 %v3319_v13 }
 0x58f   :  { %3451 = vmatpush1.bf16.msra.mxu0 %v3316_v17  ;;  %3492 = vmatpush1.bf16.msra.mxu1 %v3318_v18 }
 0x590   :  { %3452 = vmatprep.subr.bf16.mxu0 %v3325_v19  ;;  %3493 = vmatprep.subr.bf16.mxu1 %v3327_v16 }
 0x593   :  { %3453 = vmatpush1.bf16.msra.mxu0 %v3324_v20  ;;  %3494 = vmatpush1.bf16.msra.mxu1 %v3326_v24 }
 0x594   :  { %3454 = vmatprep.subr.bf16.mxu0 %v3333_v25  ;;  %3495 = vmatprep.subr.bf16.mxu1 %v3335_v28 }
 0x597   :  { %3455 = vmatpush1.bf16.msra.mxu0 %v3332_v29  ;;  %3496 = vmatpush1.bf16.msra.mxu1 %v3334_v30 }
 0x598   :  { %3456 = vmatprep.subr.bf16.mxu0 %v3341_v31  ;;  %3497 = vmatprep.subr.bf16.mxu1 %v3343_v32  ;;  %v6738_v31 = vsub.s32 4, %v6341_v43  ;;  %v6741_v32 = vsub.s32 6, %v6341_v43 }
 0x59b   :  { %3457 = vmatpush1.bf16.msra.mxu0 %v3340_v33  ;;  %3498 = vmatpush1.bf16.msra.mxu1 %v3342_v34  ;;  %v3543_v33 = vsub.s32 5, %v6341_v43  ;;  %v3551_v34 = vsub.s32 7, %v6341_v43 }
 0x59e   :  { %3459 = vmatmul.mubr.bf16.vlgmr.msra.gmra.mrb[40].mxu0 %v6675_v12  ;;  %3500 = vmatmul.mubr.bf16.vlgmr.msra.gmra.mrb[36].mxu1 %v6675_v12 }
 0x5b1   :  { %v3085_v15 = vpop.f32.mrb[28].mxu0  ;;  %v3126_v35 = vpop.f32.mrb[24].mxu1 }
 0x5b2   :  { %v3086_v36 = vadd.f32 %v3085_v15, %v6697_v21  ;;  %v3127_v37 = vadd.f32 %v3126_v35, %v6699_v22  ;;  %v3087_v38 = vpop.f32.mrb[29].mxu0  ;;  %v3128_v39 = vpop.f32.mrb[25].mxu1  ;;  %v3540_v15 = vrot.slane %v3519_v62, %v6738_v31  ;;  %v3548_v35 = vrot.slane %v3519_v62, %v6741_v32 }
 0x5b3   :  { %v3088_v42 = vadd.f32 %v3087_v38, %v6701_v26  ;;  %v3129_v44 = vadd.f32 %v3128_v39, %v6703_v27  ;;  %v3089_v11 = vpop.f32.mrb[30].mxu0  ;;  %v3130_v47 = vpop.f32.mrb[26].mxu1  ;;  %v3544_v38 = vrot.slane %v3519_v62, %v3543_v33  ;;  %v3552_v39 = vrot.slane %v3519_v62, %v3551_v34 }
 0x5b4   :  { %v3090_v49 = vpop.f32.mrb[31].mxu0  ;;  %v3131_v51 = vpop.f32.mrb[27].mxu1 }
 0x5f1   :  { %v3167_v53 = vpop.f32.mrb[32].mxu0  ;;  %v3208_v8 = vpop.f32.mrb[28].mxu1 }
 0x5f2   :  { %v3168_v12 = vadd.f32 %v3167_v53, %v6709_v40  ;;  %v3209_v55 = vadd.f32 %v3208_v8, %v6711_v41  ;;  %v3169_v56 = vpop.f32.mrb[33].mxu0  ;;  %v3210_v21 = vpop.f32.mrb[29].mxu1  ;;  %v3528_v41 = vrot.slane %v3519_v62, %v6620_v52 }
 0x5f3   :  { %v3170_v22 = vadd.f32 %v3169_v56, %v6713_v45  ;;  %v3211_v48 = vadd.f32 %v3210_v21, %v6715_v46  ;;  %v3171_v59 = vpop.f32.mrb[34].mxu0  ;;  %v3212_v26 = vpop.f32.mrb[30].mxu1 }
 0x5f4   :  { %v3172_v14 = vpop.f32.mrb[35].mxu0  ;;  %v3213_v27 = vpop.f32.mrb[31].mxu1 }
 0x631   :  { %v3378_v40 = vpop.f32.mrb[36].mxu0  ;;  %v3419_v1 = vpop.f32.mrb[32].mxu1 }
 0x632   :  { %v3508_v45 = vadd.f32 %v3378_v40, %v3086_v36  ;;  %v3510_v3 = vadd.f32 %v3419_v1, %v3127_v37  ;;  %v3380_v46 = vpop.f32.mrb[37].mxu0  ;;  %v3421_v58 = vpop.f32.mrb[33].mxu1 }
 0x633   :  { %v3509_v4 = vadd.f32 %v3380_v46, %v3088_v42  ;;  %v3511_v5 = vadd.f32 %v3421_v58, %v3129_v44  ;;  %v3382_v57 = vpop.f32.mrb[38].mxu0  ;;  %v3423_v6 = vpop.f32.mrb[34].mxu1 }
 0x634   :  { %v3561_v7 = vadd.f32 %v3524_v63, %v3508_v45  ;;  %v3563_v9 = vadd.f32 %v3532_v0, %v3510_v3  ;;  %v3383_v10 = vpop.f32.mrb[39].mxu0  ;;  %v3424_v13 = vpop.f32.mrb[35].mxu1 }
 0x635   :  { %v3562_v17 = vadd.f32 %v3528_v41, %v3509_v4  ;;  %v3564_v18 = vadd.f32 %v3536_v2, %v3511_v5 }
 0x636   :  { %vm3569_vm5 = vcmp.ge.f32.partialorder %v3561_v7, 0.0  ;;  %v3577_v19 = vmul.f32 0.2, %v3561_v7  ;;  %vm3571_vm6 = vcmp.ge.f32.partialorder %v3563_v9, 0.0  ;;  %v3579_v16 = vmul.f32 0.2, %v3563_v9 }
 0x637   :  { %vm3570_vm7 = vcmp.ge.f32.partialorder %v3562_v17, 0.0  ;;  %v3578_v20 = vmul.f32 0.2, %v3562_v17  ;;  %vm3572_vm8 = vcmp.ge.f32.partialorder %v3564_v18, 0.0  ;;  %v3580_v24 = vmul.f32 0.2, %v3564_v18 }
 0x638   :  { %v6731_v25 = vsel %vm3569_vm5, %v3561_v7, %v3577_v19  ;;  %v6733_v28 = vsel %vm3571_vm6, %v3563_v9, %v3579_v16 }
 0x639   :  { %v3586_v29 = vsel %vm3570_vm7, %v3562_v17, %v3578_v20  ;;  %v6735_v30 = vsel %vm3572_vm8, %v3564_v18, %v3580_v24 }
 0x671   :  { %v3460_v36 = vpop.f32.mrb[40].mxu0  ;;  %v3501_v37 = vpop.f32.mrb[36].mxu1 }
 0x672   :  { %v3512_v42 = vadd.f32 %v3460_v36, %v3168_v12  ;;  %v3514_v44 = vadd.f32 %v3501_v37, %v3209_v55  ;;  %v3462_v11 = vpop.f32.mrb[41].mxu0  ;;  %v3503_v47 = vpop.f32.mrb[37].mxu1 }
 0x673   :  { %v3513_v49 = vadd.f32 %v3462_v11, %v3170_v22  ;;  %v3515_v51 = vadd.f32 %v3503_v47, %v3211_v48  ;;  %v3464_v53 = vpop.f32.mrb[42].mxu0  ;;  %v3505_v8 = vpop.f32.mrb[38].mxu1 }
 0x674   :  { %v3565_v56 = vadd.f32 %v3540_v15, %v3512_v42  ;;  %v3567_v21 = vadd.f32 %v3548_v35, %v3514_v44  ;;  %v3465_v59 = vpop.f32.mrb[43].mxu0  ;;  %v3506_v26 = vpop.f32.mrb[39].mxu1 }
 0x675   :  { %v3566_v14 = vadd.f32 %v3544_v38, %v3513_v49  ;;  %v3568_v27 = vadd.f32 %v3552_v39, %v3515_v51 }
 0x676   :  { %vm3573_vm9 = vcmp.ge.f32.partialorder %v3565_v56, 0.0  ;;  %v3581_v60 = vmul.f32 0.2, %v3565_v56  ;;  %vm3575_vm10 = vcmp.ge.f32.partialorder %v3567_v21, 0.0  ;;  %v3583_v61 = vmul.f32 0.2, %v3567_v21 }
 0x677   :  { %vm3574_vm11 = vcmp.ge.f32.partialorder %v3566_v14, 0.0  ;;  %v3582_v62 = vmul.f32 0.2, %v3566_v14  ;;  %vm3576_vm12 = vcmp.ge.f32.partialorder %v3568_v27, 0.0  ;;  %v3584_v12 = vmul.f32 0.2, %v3568_v27 }
 0x678   :  { %v6751_v55 = vsel %vm3573_vm9, %v3565_v56, %v3581_v60  ;;  %v6753_v22 = vsel %vm3575_vm10, %v3567_v21, %v3583_v61 }
 0x679   :  { %v6755_v48 = vsel %vm3574_vm11, %v3566_v14, %v3582_v62  ;;  %v6757_v63 = vsel %vm3576_vm12, %v3568_v27, %v3584_v12 }
 0x67a   :  { %6013 = dma.done.wait [#allocation4 + $0x1], 65536 }
 0x67b   :  { %6014 = vsyncadd [#allocation4 + $0x1], 4294901760  ;;  %v6759_v0 = vpack.c.bf16 %v3586_v29, %v3586_v29  ;;  %v3606_v40 = vld [vmem:[#allocation3 + $0x8] sm:$0xff]  ;;  %v3608_v1 = vld [vmem:[#allocation3 + $0x18] sm:$0xff]  ;;  %vm4928_vm1 = vcmask 1041408   ;;  %vm4947_vm6 = vcmask 1024  }
 0x67c   :  { %v3605_v41 = vld [vmem:[#allocation3] sm:$0xff]  ;;  %4162 = vmatprep.subr.bf16.mxu0 %v3606_v40  ;;  %4326 = vmatprep.subr.bf16.mxu1 %v3608_v1  ;;  %v3607_v2 = vld [vmem:[#allocation3 + $0x10] sm:$0xff]  ;;  %v3614_v45 = vld [vmem:[#allocation3 + $0x48] sm:$0xff] }
 0x67d   :  { %4194 = vmatprep.mubr.bf16.mxu0 %v6759_v0  ;;  %4358 = vmatprep.mubr.bf16.mxu1 %v6759_v0  ;;  %v3616_v3 = vld [vmem:[#allocation3 + $0x58] sm:$0xff]  ;;  %v3613_v46 = vld [vmem:[#allocation3 + $0x40] sm:$0xff]  ;;  %v3615_v58 = vld [vmem:[#allocation3 + $0x50] sm:$0xff] }
 0x67e   :  { %4163 = vmatpush1.bf16.msra.mxu0 %v3605_v41  ;;  %4327 = vmatpush1.bf16.msra.mxu1 %v3607_v2  ;;  %v3622_v4 = vld [vmem:[#allocation3 + $0x88] sm:$0xff]  ;;  %v3624_v5 = vld [vmem:[#allocation3 + $0x98] sm:$0xff]  ;;  %v3621_v57 = vld [vmem:[#allocation3 + $0x80] sm:$0xff] }
 0x67f   :  { %4164 = vmatprep.subr.bf16.mxu0 %v3614_v45  ;;  %4328 = vmatprep.subr.bf16.mxu1 %v3616_v3  ;;  %v3623_v6 = vld [vmem:[#allocation3 + $0x90] sm:$0xff]  ;;  %v3630_v7 = vld [vmem:[#allocation3 + $0xc8] sm:$0xff]  ;;  %v3632_v9 = vld [vmem:[#allocation3 + $0xd8] sm:$0xff] }
 0x680   :  { %v3629_v10 = vld [vmem:[#allocation3 + $0xc0] sm:$0xff]  ;;  %v3631_v13 = vld [vmem:[#allocation3 + $0xd0] sm:$0xff]  ;;  %v3638_v17 = vld [vmem:[#allocation3 + $0x108] sm:$0xff] }
 0x681   :  { %v3640_v18 = vld [vmem:[#allocation3 + $0x118] sm:$0xff]  ;;  %v3637_v19 = vld [vmem:[#allocation3 + $0x100] sm:$0xff]  ;;  %v3639_v16 = vld [vmem:[#allocation3 + $0x110] sm:$0xff] }
 0x682   :  { %4165 = vmatpush1.bf16.msra.mxu0 %v3613_v46  ;;  %4329 = vmatpush1.bf16.msra.mxu1 %v3615_v58  ;;  %v3646_v20 = vld [vmem:[#allocation3 + $0x148] sm:$0xff]  ;;  %v3648_v24 = vld [vmem:[#allocation3 + $0x158] sm:$0xff]  ;;  %v3645_v29 = vld [vmem:[#allocation3 + $0x140] sm:$0xff] }
 0x683   :  { %4166 = vmatprep.subr.bf16.mxu0 %v3622_v4  ;;  %4330 = vmatprep.subr.bf16.mxu1 %v3624_v5  ;;  %v3647_v15 = vld [vmem:[#allocation3 + $0x150] sm:$0xff]  ;;  %v3654_v35 = vld [vmem:[#allocation3 + $0x188] sm:$0xff]  ;;  %v3656_v36 = vld [vmem:[#allocation3 + $0x198] sm:$0xff] }
 0x684   :  { %v3653_v37 = vld [vmem:[#allocation3 + $0x180] sm:$0xff]  ;;  %v3655_v38 = vld [vmem:[#allocation3 + $0x190] sm:$0xff]  ;;  %v3662_v39 = vld [vmem:[#allocation3 + $0x1c8] sm:$0xff] }
 0x685   :  { %v3664_v42 = vld [vmem:[#allocation3 + $0x1d8] sm:$0xff]  ;;  %v3661_v44 = vld [vmem:[#allocation3 + $0x1c0] sm:$0xff]  ;;  %v3663_v11 = vld [vmem:[#allocation3 + $0x1d0] sm:$0xff] }
 0x686   :  { %4167 = vmatpush1.bf16.msra.mxu0 %v3621_v57  ;;  %4331 = vmatpush1.bf16.msra.mxu1 %v3623_v6  ;;  %v3670_v47 = vld [vmem:[#allocation3 + $0x208] sm:$0xff]  ;;  %v3672_v49 = vld [vmem:[#allocation3 + $0x218] sm:$0xff]  ;;  %v3669_v51 = vld [vmem:[#allocation3 + $0x200] sm:$0xff] }
 0x687   :  { %4168 = vmatprep.subr.bf16.mxu0 %v3630_v7  ;;  %4332 = vmatprep.subr.bf16.mxu1 %v3632_v9  ;;  %v3671_v53 = vld [vmem:[#allocation3 + $0x210] sm:$0xff]  ;;  %v3678_v8 = vld [vmem:[#allocation3 + $0x248] sm:$0xff]  ;;  %v3680_v56 = vld [vmem:[#allocation3 + $0x258] sm:$0xff] }
 0x688   :  { %v3677_v21 = vld [vmem:[#allocation3 + $0x240] sm:$0xff]  ;;  %v3679_v59 = vld [vmem:[#allocation3 + $0x250] sm:$0xff]  ;;  %v3686_v26 = vld [vmem:[#allocation3 + $0x288] sm:$0xff] }
 0x689   :  { %v3688_v14 = vld [vmem:[#allocation3 + $0x298] sm:$0xff]  ;;  %v3685_v27 = vld [vmem:[#allocation3 + $0x280] sm:$0xff]  ;;  %v3687_v60 = vld [vmem:[#allocation3 + $0x290] sm:$0xff] }
 0x68a   :  { %4169 = vmatpush1.bf16.msra.mxu0 %v3629_v10  ;;  %4333 = vmatpush1.bf16.msra.mxu1 %v3631_v13  ;;  %v3694_v61 = vld [vmem:[#allocation3 + $0x2c8] sm:$0xff]  ;;  %v3696_v62 = vld [vmem:[#allocation3 + $0x2d8] sm:$0xff]  ;;  %v3693_v12 = vld [vmem:[#allocation3 + $0x2c0] sm:$0xff] }
 0x68b   :  { %4170 = vmatprep.subr.bf16.mxu0 %v3638_v17  ;;  %4334 = vmatprep.subr.bf16.mxu1 %v3640_v18  ;;  %v3695_v40 = vld [vmem:[#allocation3 + $0x2d0] sm:$0xff]  ;;  %v3702_v1 = vld [vmem:[#allocation3 + $0x308] sm:$0xff]  ;;  %v3704_v41 = vld [vmem:[#allocation3 + $0x318] sm:$0xff] }
 0x68c   :  { %v3701_v2 = vld [vmem:[#allocation3 + $0x300] sm:$0xff]  ;;  %v3703_v45 = vld [vmem:[#allocation3 + $0x310] sm:$0xff]  ;;  %v3710_v3 = vld [vmem:[#allocation3 + $0x348] sm:$0xff] }
 0x68d   :  { %v3712_v46 = vld [vmem:[#allocation3 + $0x358] sm:$0xff]  ;;  %v3709_v58 = vld [vmem:[#allocation3 + $0x340] sm:$0xff]  ;;  %v3711_v4 = vld [vmem:[#allocation3 + $0x350] sm:$0xff] }
 0x68e   :  { %4171 = vmatpush1.bf16.msra.mxu0 %v3637_v19  ;;  %4335 = vmatpush1.bf16.msra.mxu1 %v3639_v16  ;;  %v3718_v5 = vld [vmem:[#allocation3 + $0x388] sm:$0xff]  ;;  %v3720_v57 = vld [vmem:[#allocation3 + $0x398] sm:$0xff]  ;;  %v3717_v6 = vld [vmem:[#allocation3 + $0x380] sm:$0xff]  ;;  %v6765_v16 = vpack.c.bf16 %v6731_v25, %v6731_v25 }
 0x68f   :  { %4172 = vmatprep.subr.bf16.mxu0 %v3646_v20  ;;  %4336 = vmatprep.subr.bf16.mxu1 %v3648_v24  ;;  %v3719_v7 = vld [vmem:[#allocation3 + $0x390] sm:$0xff]  ;;  %v3726_v9 = vld [vmem:[#allocation3 + $0x3c8] sm:$0xff]  ;;  %v3728_v10 = vld [vmem:[#allocation3 + $0x3d8] sm:$0xff] }
 0x690   :  { %v3725_v13 = vld [vmem:[#allocation3 + $0x3c0] sm:$0xff]  ;;  %v3727_v17 = vld [vmem:[#allocation3 + $0x3d0] sm:$0xff]  ;;  %v3734_v18 = vld [vmem:[#allocation3 + $0x408] sm:$0xff] }
 0x691   :  { %v3736_v19 = vld [vmem:[#allocation3 + $0x418] sm:$0xff]  ;;  %v3733_v20 = vld [vmem:[#allocation3 + $0x400] sm:$0xff]  ;;  %v3735_v24 = vld [vmem:[#allocation3 + $0x410] sm:$0xff] }
 0x692   :  { %4173 = vmatpush1.bf16.msra.mxu0 %v3645_v29  ;;  %4337 = vmatpush1.bf16.msra.mxu1 %v3647_v15  ;;  %v3742_v29 = vld [vmem:[#allocation3 + $0x448] sm:$0xff]  ;;  %v3744_v15 = vld [vmem:[#allocation3 + $0x458] sm:$0xff]  ;;  %v3741_v25 = vld [vmem:[#allocation3 + $0x440] sm:$0xff] }
 0x693   :  { %4174 = vmatprep.subr.bf16.mxu0 %v3654_v35  ;;  %4338 = vmatprep.subr.bf16.mxu1 %v3656_v36  ;;  %v6769_v35 = vpack.c.bf16 %v6735_v30, %v6735_v30  ;;  %v3743_v36 = vld [vmem:[#allocation3 + $0x450] sm:$0xff]  ;;  %v3749_v30 = vld [vmem:[#allocation3 + $0x480] sm:$0xff] }
 0x696   :  { %4175 = vmatpush1.bf16.msra.mxu0 %v3653_v37  ;;  %4339 = vmatpush1.bf16.msra.mxu1 %v3655_v38  ;;  %v3750_v37 = vld [vmem:[#allocation3 + $0x488] sm:$0xff]  ;;  %v3752_v38 = vld [vmem:[#allocation3 + $0x498] sm:$0xff] }
 0x697   :  { %4176 = vmatprep.subr.bf16.mxu0 %v3662_v39  ;;  %4340 = vmatprep.subr.bf16.mxu1 %v3664_v42  ;;  %v3751_v39 = vld [vmem:[#allocation3 + $0x490] sm:$0xff]  ;;  %v3758_v42 = vld [vmem:[#allocation3 + $0x4c8] sm:$0xff] }
 0x69a   :  { %4177 = vmatpush1.bf16.msra.mxu0 %v3661_v44  ;;  %4341 = vmatpush1.bf16.msra.mxu1 %v3663_v11  ;;  %v3760_v44 = vld [vmem:[#allocation3 + $0x4d8] sm:$0xff]  ;;  %v3757_v11 = vld [vmem:[#allocation3 + $0x4c0] sm:$0xff] }
 0x69b   :  { %4178 = vmatprep.subr.bf16.mxu0 %v3670_v47  ;;  %4342 = vmatprep.subr.bf16.mxu1 %v3672_v49  ;;  %v3759_v47 = vld [vmem:[#allocation3 + $0x4d0] sm:$0xff]  ;;  %v3766_v49 = vld [vmem:[#allocation3 + $0x508] sm:$0xff] }
 0x69e   :  { %4179 = vmatpush1.bf16.msra.mxu0 %v3669_v51  ;;  %4343 = vmatpush1.bf16.msra.mxu1 %v3671_v53  ;;  %v3768_v51 = vld [vmem:[#allocation3 + $0x518] sm:$0xff]  ;;  %v3765_v53 = vld [vmem:[#allocation3 + $0x500] sm:$0xff] }
 0x69f   :  { %4180 = vmatprep.subr.bf16.mxu0 %v3678_v8  ;;  %4344 = vmatprep.subr.bf16.mxu1 %v3680_v56  ;;  %v3767_v8 = vld [vmem:[#allocation3 + $0x510] sm:$0xff]  ;;  %v3774_v56 = vld [vmem:[#allocation3 + $0x548] sm:$0xff] }
 0x6a2   :  { %4181 = vmatpush1.bf16.msra.mxu0 %v3677_v21  ;;  %4345 = vmatpush1.bf16.msra.mxu1 %v3679_v59  ;;  %v3776_v21 = vld [vmem:[#allocation3 + $0x558] sm:$0xff]  ;;  %v3773_v59 = vld [vmem:[#allocation3 + $0x540] sm:$0xff] }
 0x6a3   :  { %4182 = vmatprep.subr.bf16.mxu0 %v3686_v26  ;;  %4346 = vmatprep.subr.bf16.mxu1 %v3688_v14  ;;  %v3775_v26 = vld [vmem:[#allocation3 + $0x550] sm:$0xff]  ;;  %v3782_v14 = vld [vmem:[#allocation3 + $0x588] sm:$0xff] }
 0x6a6   :  { %4183 = vmatpush1.bf16.msra.mxu0 %v3685_v27  ;;  %4347 = vmatpush1.bf16.msra.mxu1 %v3687_v60  ;;  %v3784_v27 = vld [vmem:[#allocation3 + $0x598] sm:$0xff]  ;;  %v3781_v60 = vld [vmem:[#allocation3 + $0x580] sm:$0xff] }
 0x6a7   :  { %4184 = vmatprep.subr.bf16.mxu0 %v3694_v61  ;;  %4348 = vmatprep.subr.bf16.mxu1 %v3696_v62  ;;  %v3783_v61 = vld [vmem:[#allocation3 + $0x590] sm:$0xff]  ;;  %v3790_v62 = vld [vmem:[#allocation3 + $0x5c8] sm:$0xff] }
 0x6aa   :  { %4185 = vmatpush1.bf16.msra.mxu0 %v3693_v12  ;;  %4349 = vmatpush1.bf16.msra.mxu1 %v3695_v40  ;;  %v3792_v12 = vld [vmem:[#allocation3 + $0x5d8] sm:$0xff]  ;;  %v3789_v40 = vld [vmem:[#allocation3 + $0x5c0] sm:$0xff] }
 0x6ab   :  { %4186 = vmatprep.subr.bf16.mxu0 %v3702_v1  ;;  %4350 = vmatprep.subr.bf16.mxu1 %v3704_v41  ;;  %v3791_v1 = vld [vmem:[#allocation3 + $0x5d0] sm:$0xff]  ;;  %v3798_v41 = vld [vmem:[#allocation3 + $0x608] sm:$0xff] }
 0x6ae   :  { %4187 = vmatpush1.bf16.msra.mxu0 %v3701_v2  ;;  %4351 = vmatpush1.bf16.msra.mxu1 %v3703_v45  ;;  %v3800_v2 = vld [vmem:[#allocation3 + $0x618] sm:$0xff]  ;;  %v3797_v45 = vld [vmem:[#allocation3 + $0x600] sm:$0xff] }
 0x6af   :  { %4188 = vmatprep.subr.bf16.mxu0 %v3710_v3  ;;  %4352 = vmatprep.subr.bf16.mxu1 %v3712_v46  ;;  %v3799_v3 = vld [vmem:[#allocation3 + $0x610] sm:$0xff]  ;;  %v3806_v46 = vld [vmem:[#allocation3 + $0x648] sm:$0xff] }
 0x6b2   :  { %4189 = vmatpush1.bf16.msra.mxu0 %v3709_v58  ;;  %4353 = vmatpush1.bf16.msra.mxu1 %v3711_v4  ;;  %v3808_v58 = vld [vmem:[#allocation3 + $0x658] sm:$0xff]  ;;  %v3805_v4 = vld [vmem:[#allocation3 + $0x640] sm:$0xff] }
 0x6b3   :  { %4190 = vmatprep.subr.bf16.mxu0 %v3718_v5  ;;  %4354 = vmatprep.subr.bf16.mxu1 %v3720_v57  ;;  %v3807_v5 = vld [vmem:[#allocation3 + $0x650] sm:$0xff]  ;;  %v3814_v57 = vld [vmem:[#allocation3 + $0x688] sm:$0xff] }
 0x6b6   :  { %4191 = vmatpush1.bf16.msra.mxu0 %v3717_v6  ;;  %4355 = vmatpush1.bf16.msra.mxu1 %v3719_v7  ;;  %v3816_v6 = vld [vmem:[#allocation3 + $0x698] sm:$0xff]  ;;  %v3813_v7 = vld [vmem:[#allocation3 + $0x680] sm:$0xff] }
 0x6b7   :  { %4192 = vmatprep.subr.bf16.mxu0 %v3726_v9  ;;  %4356 = vmatprep.subr.bf16.mxu1 %v3728_v10  ;;  %v3815_v9 = vld [vmem:[#allocation3 + $0x690] sm:$0xff]  ;;  %v3822_v10 = vld [vmem:[#allocation3 + $0x6c8] sm:$0xff] }
 0x6ba   :  { %4193 = vmatpush1.bf16.msra.mxu0 %v3725_v13  ;;  %4357 = vmatpush1.bf16.msra.mxu1 %v3727_v17  ;;  %v3824_v13 = vld [vmem:[#allocation3 + $0x6d8] sm:$0xff]  ;;  %v3821_v17 = vld [vmem:[#allocation3 + $0x6c0] sm:$0xff] }
 0x6bb   :  { %4203 = vmatprep.subr.bf16.mxu0 %v3734_v18  ;;  %4367 = vmatprep.subr.bf16.mxu1 %v3736_v19  ;;  %v3823_v18 = vld [vmem:[#allocation3 + $0x6d0] sm:$0xff]  ;;  %v3830_v19 = vld [vmem:[#allocation3 + $0x708] sm:$0xff] }
 0x6bd   :  { %4195 = vmatmul.mubr.bf16.vlgmr.msra.gmra.mrb[44].mxu0 %v6765_v16  ;;  %4359 = vmatmul.mubr.bf16.vlgmr.msra.gmra.mrb[40].mxu1 %v6765_v16 }
 0x6be   :  { %4204 = vmatpush1.bf16.msra.mxu0 %v3733_v20  ;;  %4368 = vmatpush1.bf16.msra.mxu1 %v3735_v24  ;;  %v3832_v20 = vld [vmem:[#allocation3 + $0x718] sm:$0xff]  ;;  %v3829_v24 = vld [vmem:[#allocation3 + $0x700] sm:$0xff] }
 0x6bf   :  { %4205 = vmatprep.subr.bf16.mxu0 %v3742_v29  ;;  %4369 = vmatprep.subr.bf16.mxu1 %v3744_v15  ;;  %v3831_v29 = vld [vmem:[#allocation3 + $0x710] sm:$0xff]  ;;  %v3838_v15 = vld [vmem:[#allocation3 + $0x748] sm:$0xff] }
 0x6c0   :  { %4235 = vmatprep.mubr.bf16.mxu0 %v6769_v35  ;;  %4399 = vmatprep.mubr.bf16.mxu1 %v6769_v35 }
 0x6c2   :  { %4206 = vmatpush1.bf16.msra.mxu0 %v3741_v25  ;;  %4370 = vmatpush1.bf16.msra.mxu1 %v3743_v36  ;;  %v3840_v25 = vld [vmem:[#allocation3 + $0x758] sm:$0xff]  ;;  %v3837_v36 = vld [vmem:[#allocation3 + $0x740] sm:$0xff] }
 0x6c3   :  { %4207 = vmatprep.subr.bf16.mxu0 %v3750_v37  ;;  %4371 = vmatprep.subr.bf16.mxu1 %v3752_v38  ;;  %v3839_v37 = vld [vmem:[#allocation3 + $0x750] sm:$0xff]  ;;  %v3846_v38 = vld [vmem:[#allocation3 + $0x788] sm:$0xff] }
 0x6c6   :  { %4208 = vmatpush1.bf16.msra.mxu0 %v3749_v30  ;;  %4372 = vmatpush1.bf16.msra.mxu1 %v3751_v39  ;;  %v3848_v30 = vld [vmem:[#allocation3 + $0x798] sm:$0xff]  ;;  %v3845_v39 = vld [vmem:[#allocation3 + $0x780] sm:$0xff] }
 0x6c7   :  { %4209 = vmatprep.subr.bf16.mxu0 %v3758_v42  ;;  %4373 = vmatprep.subr.bf16.mxu1 %v3760_v44  ;;  %v3847_v42 = vld [vmem:[#allocation3 + $0x790] sm:$0xff]  ;;  %v3854_v44 = vld [vmem:[#allocation3 + $0x7c8] sm:$0xff] }
 0x6ca   :  { %4210 = vmatpush1.bf16.msra.mxu0 %v3757_v11  ;;  %4374 = vmatpush1.bf16.msra.mxu1 %v3759_v47  ;;  %v3856_v11 = vld [vmem:[#allocation3 + $0x7d8] sm:$0xff]  ;;  %v3853_v47 = vld [vmem:[#allocation3 + $0x7c0] sm:$0xff] }
 0x6cb   :  { %4211 = vmatprep.subr.bf16.mxu0 %v3766_v49  ;;  %4375 = vmatprep.subr.bf16.mxu1 %v3768_v51  ;;  %v3855_v49 = vld [vmem:[#allocation3 + $0x7d0] sm:$0xff]  ;;  %v3862_v51 = vld [vmem:[#allocation3 + $0x808] sm:$0xff] }
 0x6ce   :  { %4212 = vmatpush1.bf16.msra.mxu0 %v3765_v53  ;;  %4376 = vmatpush1.bf16.msra.mxu1 %v3767_v8  ;;  %v3864_v53 = vld [vmem:[#allocation3 + $0x818] sm:$0xff]  ;;  %v6777_v8 = vpack.c.bf16 %v6733_v28, %v6733_v28  ;;  %v3869_v28 = vld [vmem:[#allocation3 + $0x840] sm:$0xff] }
 0x6cf   :  { %4213 = vmatprep.subr.bf16.mxu0 %v3774_v56  ;;  %4377 = vmatprep.subr.bf16.mxu1 %v3776_v21  ;;  %v3861_v56 = vld [vmem:[#allocation3 + $0x800] sm:$0xff]  ;;  %v3863_v21 = vld [vmem:[#allocation3 + $0x810] sm:$0xff] }
 0x6d2   :  { %4214 = vmatpush1.bf16.msra.mxu0 %v3773_v59  ;;  %4378 = vmatpush1.bf16.msra.mxu1 %v3775_v26  ;;  %v3870_v59 = vld [vmem:[#allocation3 + $0x848] sm:$0xff]  ;;  %v3872_v26 = vld [vmem:[#allocation3 + $0x858] sm:$0xff] }
 0x6d3   :  { %4215 = vmatprep.subr.bf16.mxu0 %v3782_v14  ;;  %4379 = vmatprep.subr.bf16.mxu1 %v3784_v27  ;;  %v6781_v14 = vpack.c.bf16 %v6755_v48, %v6755_v48  ;;  %v3871_v27 = vld [vmem:[#allocation3 + $0x850] sm:$0xff]  ;;  %v3877_v48 = vld [vmem:[#allocation3 + $0x880] sm:$0xff] }
 0x6d6   :  { %4216 = vmatpush1.bf16.msra.mxu0 %v3781_v60  ;;  %4380 = vmatpush1.bf16.msra.mxu1 %v3783_v61  ;;  %v3878_v60 = vld [vmem:[#allocation3 + $0x888] sm:$0xff]  ;;  %v3880_v61 = vld [vmem:[#allocation3 + $0x898] sm:$0xff] }
 0x6d7   :  { %4217 = vmatprep.subr.bf16.mxu0 %v3790_v62  ;;  %4381 = vmatprep.subr.bf16.mxu1 %v3792_v12  ;;  %v3879_v62 = vld [vmem:[#allocation3 + $0x890] sm:$0xff]  ;;  %v3886_v12 = vld [vmem:[#allocation3 + $0x8c8] sm:$0xff] }
 0x6da   :  { %4218 = vmatpush1.bf16.msra.mxu0 %v3789_v40  ;;  %4382 = vmatpush1.bf16.msra.mxu1 %v3791_v1  ;;  %v3888_v40 = vld [vmem:[#allocation3 + $0x8d8] sm:$0xff]  ;;  %v3885_v1 = vld [vmem:[#allocation3 + $0x8c0] sm:$0xff] }
 0x6db   :  { %4219 = vmatprep.subr.bf16.mxu0 %v3798_v41  ;;  %4383 = vmatprep.subr.bf16.mxu1 %v3800_v2  ;;  %v3887_v41 = vld [vmem:[#allocation3 + $0x8d0] sm:$0xff]  ;;  %v3894_v2 = vld [vmem:[#allocation3 + $0x908] sm:$0xff] }
 0x6de   :  { %4220 = vmatpush1.bf16.msra.mxu0 %v3797_v45  ;;  %4384 = vmatpush1.bf16.msra.mxu1 %v3799_v3  ;;  %v3896_v45 = vld [vmem:[#allocation3 + $0x918] sm:$0xff]  ;;  %v3893_v3 = vld [vmem:[#allocation3 + $0x900] sm:$0xff] }
 0x6df   :  { %4221 = vmatprep.subr.bf16.mxu0 %v3806_v46  ;;  %4385 = vmatprep.subr.bf16.mxu1 %v3808_v58  ;;  %v3895_v46 = vld [vmem:[#allocation3 + $0x910] sm:$0xff]  ;;  %v3902_v58 = vld [vmem:[#allocation3 + $0x948] sm:$0xff] }
 0x6e2   :  { %4222 = vmatpush1.bf16.msra.mxu0 %v3805_v4  ;;  %4386 = vmatpush1.bf16.msra.mxu1 %v3807_v5  ;;  %v3904_v4 = vld [vmem:[#allocation3 + $0x958] sm:$0xff]  ;;  %v3901_v5 = vld [vmem:[#allocation3 + $0x940] sm:$0xff] }
 0x6e3   :  { %4223 = vmatprep.subr.bf16.mxu0 %v3814_v57  ;;  %4387 = vmatprep.subr.bf16.mxu1 %v3816_v6  ;;  %v3903_v57 = vld [vmem:[#allocation3 + $0x950] sm:$0xff]  ;;  %v3910_v6 = vld [vmem:[#allocation3 + $0x988] sm:$0xff] }
 0x6e6   :  { %4224 = vmatpush1.bf16.msra.mxu0 %v3813_v7  ;;  %4388 = vmatpush1.bf16.msra.mxu1 %v3815_v9  ;;  %v3912_v7 = vld [vmem:[#allocation3 + $0x998] sm:$0xff]  ;;  %v3909_v9 = vld [vmem:[#allocation3 + $0x980] sm:$0xff] }
 0x6e7   :  { %4225 = vmatprep.subr.bf16.mxu0 %v3822_v10  ;;  %4389 = vmatprep.subr.bf16.mxu1 %v3824_v13  ;;  %v3911_v10 = vld [vmem:[#allocation3 + $0x990] sm:$0xff]  ;;  %v3918_v13 = vld [vmem:[#allocation3 + $0x9c8] sm:$0xff] }
 0x6ea   :  { %4226 = vmatpush1.bf16.msra.mxu0 %v3821_v17  ;;  %4390 = vmatpush1.bf16.msra.mxu1 %v3823_v18  ;;  %v3920_v17 = vld [vmem:[#allocation3 + $0x9d8] sm:$0xff]  ;;  %v3917_v18 = vld [vmem:[#allocation3 + $0x9c0] sm:$0xff] }
 0x6eb   :  { %4227 = vmatprep.subr.bf16.mxu0 %v3830_v19  ;;  %4391 = vmatprep.subr.bf16.mxu1 %v3832_v20  ;;  %v3919_v19 = vld [vmem:[#allocation3 + $0x9d0] sm:$0xff]  ;;  %v3926_v20 = vld [vmem:[#allocation3 + $0xa08] sm:$0xff] }
 0x6ee   :  { %4228 = vmatpush1.bf16.msra.mxu0 %v3829_v24  ;;  %4392 = vmatpush1.bf16.msra.mxu1 %v3831_v29  ;;  %v3928_v24 = vld [vmem:[#allocation3 + $0xa18] sm:$0xff]  ;;  %v3925_v29 = vld [vmem:[#allocation3 + $0xa00] sm:$0xff] }
 0x6ef   :  { %4229 = vmatprep.subr.bf16.mxu0 %v3838_v15  ;;  %4393 = vmatprep.subr.bf16.mxu1 %v3840_v25  ;;  %v3927_v15 = vld [vmem:[#allocation3 + $0xa10] sm:$0xff]  ;;  %v3934_v25 = vld [vmem:[#allocation3 + $0xa48] sm:$0xff] }
 0x6f2   :  { %4230 = vmatpush1.bf16.msra.mxu0 %v3837_v36  ;;  %4394 = vmatpush1.bf16.msra.mxu1 %v3839_v37  ;;  %v3936_v36 = vld [vmem:[#allocation3 + $0xa58] sm:$0xff]  ;;  %v3933_v37 = vld [vmem:[#allocation3 + $0xa40] sm:$0xff] }
 0x6f3   :  { %4231 = vmatprep.subr.bf16.mxu0 %v3846_v38  ;;  %4395 = vmatprep.subr.bf16.mxu1 %v3848_v30  ;;  %v3935_v38 = vld [vmem:[#allocation3 + $0xa50] sm:$0xff]  ;;  %v3942_v30 = vld [vmem:[#allocation3 + $0xa88] sm:$0xff] }
 0x6f6   :  { %4232 = vmatpush1.bf16.msra.mxu0 %v3845_v39  ;;  %4396 = vmatpush1.bf16.msra.mxu1 %v3847_v42  ;;  %v3944_v39 = vld [vmem:[#allocation3 + $0xa98] sm:$0xff]  ;;  %v3941_v42 = vld [vmem:[#allocation3 + $0xa80] sm:$0xff] }
 0x6f7   :  { %4233 = vmatprep.subr.bf16.mxu0 %v3854_v44  ;;  %4397 = vmatprep.subr.bf16.mxu1 %v3856_v11  ;;  %v3943_v44 = vld [vmem:[#allocation3 + $0xa90] sm:$0xff]  ;;  %v3950_v11 = vld [vmem:[#allocation3 + $0xac8] sm:$0xff] }
 0x6fa   :  { %4234 = vmatpush1.bf16.msra.mxu0 %v3853_v47  ;;  %4398 = vmatpush1.bf16.msra.mxu1 %v3855_v49  ;;  %v3952_v47 = vld [vmem:[#allocation3 + $0xad8] sm:$0xff]  ;;  %v3949_v49 = vld [vmem:[#allocation3 + $0xac0] sm:$0xff] }
 0x6fb   :  { %4244 = vmatprep.subr.bf16.mxu0 %v3862_v51  ;;  %4408 = vmatprep.subr.bf16.mxu1 %v3864_v53  ;;  %v3951_v51 = vld [vmem:[#allocation3 + $0xad0] sm:$0xff]  ;;  %v3958_v53 = vld [vmem:[#allocation3 + $0xb08] sm:$0xff] }
 0x6fd   :  { %4236 = vmatmul.mubr.bf16.vlgmr.msra.gmra.mrb[44].mxu0 %v6777_v8  ;;  %4400 = vmatmul.mubr.bf16.vlgmr.msra.gmra.mrb[40].mxu1 %v6777_v8 }
 0x6fe   :  { %4245 = vmatpush1.bf16.msra.mxu0 %v3861_v56  ;;  %4409 = vmatpush1.bf16.msra.mxu1 %v3863_v21  ;;  %v3960_v56 = vld [vmem:[#allocation3 + $0xb18] sm:$0xff]  ;;  %v3957_v21 = vld [vmem:[#allocation3 + $0xb00] sm:$0xff] }
 0x6ff   :  { %4246 = vmatprep.subr.bf16.mxu0 %v3870_v59  ;;  %4410 = vmatprep.subr.bf16.mxu1 %v3872_v26  ;;  %v3959_v59 = vld [vmem:[#allocation3 + $0xb10] sm:$0xff]  ;;  %v3966_v26 = vld [vmem:[#allocation3 + $0xb48] sm:$0xff] }
 0x700   :  { %4276 = vmatprep.mubr.bf16.mxu0 %v6781_v14  ;;  %4440 = vmatprep.mubr.bf16.mxu1 %v6781_v14 }
 0x702   :  { %4247 = vmatpush1.bf16.msra.mxu0 %v3869_v28  ;;  %4411 = vmatpush1.bf16.msra.mxu1 %v3871_v27  ;;  %v3968_v28 = vld [vmem:[#allocation3 + $0xb58] sm:$0xff]  ;;  %v3965_v27 = vld [vmem:[#allocation3 + $0xb40] sm:$0xff] }
 0x703   :  { %4248 = vmatprep.subr.bf16.mxu0 %v3878_v60  ;;  %4412 = vmatprep.subr.bf16.mxu1 %v3880_v61  ;;  %v3967_v60 = vld [vmem:[#allocation3 + $0xb50] sm:$0xff]  ;;  %v3974_v61 = vld [vmem:[#allocation3 + $0xb88] sm:$0xff] }
 0x706   :  { %4249 = vmatpush1.bf16.msra.mxu0 %v3877_v48  ;;  %4413 = vmatpush1.bf16.msra.mxu1 %v3879_v62  ;;  %v3976_v48 = vld [vmem:[#allocation3 + $0xb98] sm:$0xff]  ;;  %v3973_v62 = vld [vmem:[#allocation3 + $0xb80] sm:$0xff] }
 0x707   :  { %4250 = vmatprep.subr.bf16.mxu0 %v3886_v12  ;;  %4414 = vmatprep.subr.bf16.mxu1 %v3888_v40  ;;  %v3975_v12 = vld [vmem:[#allocation3 + $0xb90] sm:$0xff]  ;;  %v3982_v40 = vld [vmem:[#allocation3 + $0xbc8] sm:$0xff] }
 0x70a   :  { %4251 = vmatpush1.bf16.msra.mxu0 %v3885_v1  ;;  %4415 = vmatpush1.bf16.msra.mxu1 %v3887_v41  ;;  %v3984_v1 = vld [vmem:[#allocation3 + $0xbd8] sm:$0xff]  ;;  %v3981_v41 = vld [vmem:[#allocation3 + $0xbc0] sm:$0xff] }
 0x70b   :  { %4252 = vmatprep.subr.bf16.mxu0 %v3894_v2  ;;  %4416 = vmatprep.subr.bf16.mxu1 %v3896_v45  ;;  %v3983_v2 = vld [vmem:[#allocation3 + $0xbd0] sm:$0xff]  ;;  %v3990_v45 = vld [vmem:[#allocation3 + $0xc08] sm:$0xff] }
 0x70e   :  { %4253 = vmatpush1.bf16.msra.mxu0 %v3893_v3  ;;  %4417 = vmatpush1.bf16.msra.mxu1 %v3895_v46  ;;  %v3992_v3 = vld [vmem:[#allocation3 + $0xc18] sm:$0xff]  ;;  %v6789_v46 = vpack.c.bf16 %v6751_v55, %v6751_v55  ;;  %v3997_v55 = vld [vmem:[#allocation3 + $0xc40] sm:$0xff] }
 0x70f   :  { %4254 = vmatprep.subr.bf16.mxu0 %v3902_v58  ;;  %4418 = vmatprep.subr.bf16.mxu1 %v3904_v4  ;;  %v3989_v58 = vld [vmem:[#allocation3 + $0xc00] sm:$0xff]  ;;  %v3991_v4 = vld [vmem:[#allocation3 + $0xc10] sm:$0xff] }
 0x712   :  { %4255 = vmatpush1.bf16.msra.mxu0 %v3901_v5  ;;  %4419 = vmatpush1.bf16.msra.mxu1 %v3903_v57  ;;  %v3998_v5 = vld [vmem:[#allocation3 + $0xc48] sm:$0xff]  ;;  %v4000_v57 = vld [vmem:[#allocation3 + $0xc58] sm:$0xff] }
 0x713   :  { %4256 = vmatprep.subr.bf16.mxu0 %v3910_v6  ;;  %4420 = vmatprep.subr.bf16.mxu1 %v3912_v7  ;;  %v6793_v6 = vpack.c.bf16 %v6757_v63, %v6757_v63  ;;  %v3999_v7 = vld [vmem:[#allocation3 + $0xc50] sm:$0xff]  ;;  %v4005_v63 = vld [vmem:[#allocation3 + $0xc80] sm:$0xff] }
 0x716   :  { %4257 = vmatpush1.bf16.msra.mxu0 %v3909_v9  ;;  %4421 = vmatpush1.bf16.msra.mxu1 %v3911_v10  ;;  %v4006_v9 = vld [vmem:[#allocation3 + $0xc88] sm:$0xff]  ;;  %v4008_v10 = vld [vmem:[#allocation3 + $0xc98] sm:$0xff] }
 0x717   :  { %4258 = vmatprep.subr.bf16.mxu0 %v3918_v13  ;;  %4422 = vmatprep.subr.bf16.mxu1 %v3920_v17  ;;  %v4007_v13 = vld [vmem:[#allocation3 + $0xc90] sm:$0xff]  ;;  %v4014_v17 = vld [vmem:[#allocation3 + $0xcc8] sm:$0xff] }
 0x71a   :  { %4259 = vmatpush1.bf16.msra.mxu0 %v3917_v18  ;;  %4423 = vmatpush1.bf16.msra.mxu1 %v3919_v19  ;;  %v4016_v18 = vld [vmem:[#allocation3 + $0xcd8] sm:$0xff]  ;;  %v4013_v19 = vld [vmem:[#allocation3 + $0xcc0] sm:$0xff] }
 0x71b   :  { %4260 = vmatprep.subr.bf16.mxu0 %v3926_v20  ;;  %4424 = vmatprep.subr.bf16.mxu1 %v3928_v24  ;;  %v4015_v20 = vld [vmem:[#allocation3 + $0xcd0] sm:$0xff]  ;;  %v4022_v24 = vld [vmem:[#allocation3 + $0xd08] sm:$0xff] }
 0x71e   :  { %4261 = vmatpush1.bf16.msra.mxu0 %v3925_v29  ;;  %4425 = vmatpush1.bf16.msra.mxu1 %v3927_v15  ;;  %v4024_v29 = vld [vmem:[#allocation3 + $0xd18] sm:$0xff]  ;;  %v4021_v15 = vld [vmem:[#allocation3 + $0xd00] sm:$0xff] }
 0x71f   :  { %4262 = vmatprep.subr.bf16.mxu0 %v3934_v25  ;;  %4426 = vmatprep.subr.bf16.mxu1 %v3936_v36  ;;  %v4023_v25 = vld [vmem:[#allocation3 + $0xd10] sm:$0xff]  ;;  %v4030_v36 = vld [vmem:[#allocation3 + $0xd48] sm:$0xff] }
 0x722   :  { %4263 = vmatpush1.bf16.msra.mxu0 %v3933_v37  ;;  %4427 = vmatpush1.bf16.msra.mxu1 %v3935_v38  ;;  %v4032_v37 = vld [vmem:[#allocation3 + $0xd58] sm:$0xff]  ;;  %v4029_v38 = vld [vmem:[#allocation3 + $0xd40] sm:$0xff] }
 0x723   :  { %4264 = vmatprep.subr.bf16.mxu0 %v3942_v30  ;;  %4428 = vmatprep.subr.bf16.mxu1 %v3944_v39  ;;  %v4031_v30 = vld [vmem:[#allocation3 + $0xd50] sm:$0xff]  ;;  %v4038_v39 = vld [vmem:[#allocation3 + $0xd88] sm:$0xff] }
 0x726   :  { %4265 = vmatpush1.bf16.msra.mxu0 %v3941_v42  ;;  %4429 = vmatpush1.bf16.msra.mxu1 %v3943_v44  ;;  %v4040_v42 = vld [vmem:[#allocation3 + $0xd98] sm:$0xff]  ;;  %v4037_v44 = vld [vmem:[#allocation3 + $0xd80] sm:$0xff] }
 0x727   :  { %4266 = vmatprep.subr.bf16.mxu0 %v3950_v11  ;;  %4430 = vmatprep.subr.bf16.mxu1 %v3952_v47  ;;  %v4039_v11 = vld [vmem:[#allocation3 + $0xd90] sm:$0xff]  ;;  %v4046_v47 = vld [vmem:[#allocation3 + $0xdc8] sm:$0xff] }
 0x72a   :  { %4267 = vmatpush1.bf16.msra.mxu0 %v3949_v49  ;;  %4431 = vmatpush1.bf16.msra.mxu1 %v3951_v51  ;;  %v4048_v49 = vld [vmem:[#allocation3 + $0xdd8] sm:$0xff]  ;;  %v4045_v51 = vld [vmem:[#allocation3 + $0xdc0] sm:$0xff] }
 0x72b   :  { %4268 = vmatprep.subr.bf16.mxu0 %v3958_v53  ;;  %4432 = vmatprep.subr.bf16.mxu1 %v3960_v56  ;;  %v4047_v53 = vld [vmem:[#allocation3 + $0xdd0] sm:$0xff]  ;;  %v4054_v56 = vld [vmem:[#allocation3 + $0xe08] sm:$0xff] }
 0x72e   :  { %4269 = vmatpush1.bf16.msra.mxu0 %v3957_v21  ;;  %4433 = vmatpush1.bf16.msra.mxu1 %v3959_v59  ;;  %v4056_v21 = vld [vmem:[#allocation3 + $0xe18] sm:$0xff]  ;;  %v4053_v59 = vld [vmem:[#allocation3 + $0xe00] sm:$0xff] }
 0x72f   :  { %4270 = vmatprep.subr.bf16.mxu0 %v3966_v26  ;;  %4434 = vmatprep.subr.bf16.mxu1 %v3968_v28  ;;  %v4055_v26 = vld [vmem:[#allocation3 + $0xe10] sm:$0xff]  ;;  %v4062_v28 = vld [vmem:[#allocation3 + $0xe48] sm:$0xff] }
 0x732   :  { %4271 = vmatpush1.bf16.msra.mxu0 %v3965_v27  ;;  %4435 = vmatpush1.bf16.msra.mxu1 %v3967_v60  ;;  %v4064_v27 = vld [vmem:[#allocation3 + $0xe58] sm:$0xff]  ;;  %v4061_v60 = vld [vmem:[#allocation3 + $0xe40] sm:$0xff] }
 0x733   :  { %4272 = vmatprep.subr.bf16.mxu0 %v3974_v61  ;;  %4436 = vmatprep.subr.bf16.mxu1 %v3976_v48  ;;  %v4063_v61 = vld [vmem:[#allocation3 + $0xe50] sm:$0xff]  ;;  %v4070_v48 = vld [vmem:[#allocation3 + $0xe88] sm:$0xff] }
 0x736   :  { %4273 = vmatpush1.bf16.msra.mxu0 %v3973_v62  ;;  %4437 = vmatpush1.bf16.msra.mxu1 %v3975_v12  ;;  %v4072_v62 = vld [vmem:[#allocation3 + $0xe98] sm:$0xff]  ;;  %v4069_v12 = vld [vmem:[#allocation3 + $0xe80] sm:$0xff] }
 0x737   :  { %4274 = vmatprep.subr.bf16.mxu0 %v3982_v40  ;;  %4438 = vmatprep.subr.bf16.mxu1 %v3984_v1  ;;  %v4071_v40 = vld [vmem:[#allocation3 + $0xe90] sm:$0xff]  ;;  %v4078_v1 = vld [vmem:[#allocation3 + $0xec8] sm:$0xff] }
 0x73a   :  { %4275 = vmatpush1.bf16.msra.mxu0 %v3981_v41  ;;  %4439 = vmatpush1.bf16.msra.mxu1 %v3983_v2  ;;  %v4080_v41 = vld [vmem:[#allocation3 + $0xed8] sm:$0xff]  ;;  %v4077_v2 = vld [vmem:[#allocation3 + $0xec0] sm:$0xff] }
 0x73b   :  { %4285 = vmatprep.subr.bf16.mxu0 %v3990_v45  ;;  %4449 = vmatprep.subr.bf16.mxu1 %v3992_v3  ;;  %v4079_v45 = vld [vmem:[#allocation3 + $0xed0] sm:$0xff]  ;;  %v4086_v3 = vld [vmem:[#allocation3 + $0xf08] sm:$0xff] }
 0x73d   :  { %4277 = vmatmul.mubr.bf16.vlgmr.msra.gmra.mrb[44].mxu0 %v6789_v46  ;;  %4441 = vmatmul.mubr.bf16.vlgmr.msra.gmra.mrb[40].mxu1 %v6789_v46 }
 0x73e   :  { %4286 = vmatpush1.bf16.msra.mxu0 %v3989_v58  ;;  %4450 = vmatpush1.bf16.msra.mxu1 %v3991_v4  ;;  %v4088_v58 = vld [vmem:[#allocation3 + $0xf18] sm:$0xff]  ;;  %v4085_v4 = vld [vmem:[#allocation3 + $0xf00] sm:$0xff] }
 0x73f   :  { %4287 = vmatprep.subr.bf16.mxu0 %v3998_v5  ;;  %4451 = vmatprep.subr.bf16.mxu1 %v4000_v57  ;;  %v4087_v5 = vld [vmem:[#allocation3 + $0xf10] sm:$0xff]  ;;  %v4094_v57 = vld [vmem:[#allocation3 + $0xf48] sm:$0xff] }
 0x740   :  { %4317 = vmatprep.mubr.bf16.mxu0 %v6793_v6  ;;  %4481 = vmatprep.mubr.bf16.mxu1 %v6793_v6 }
 0x742   :  { %4288 = vmatpush1.bf16.msra.mxu0 %v3997_v55  ;;  %4452 = vmatpush1.bf16.msra.mxu1 %v3999_v7  ;;  %v4096_v55 = vld [vmem:[#allocation3 + $0xf58] sm:$0xff]  ;;  %v4093_v7 = vld [vmem:[#allocation3 + $0xf40] sm:$0xff] }
 0x743   :  { %4289 = vmatprep.subr.bf16.mxu0 %v4006_v9  ;;  %4453 = vmatprep.subr.bf16.mxu1 %v4008_v10  ;;  %v4095_v9 = vld [vmem:[#allocation3 + $0xf50] sm:$0xff]  ;;  %v4102_v10 = vld [vmem:[#allocation3 + $0xf88] sm:$0xff] }
 0x746   :  { %4290 = vmatpush1.bf16.msra.mxu0 %v4005_v63  ;;  %4454 = vmatpush1.bf16.msra.mxu1 %v4007_v13  ;;  %v4104_v63 = vld [vmem:[#allocation3 + $0xf98] sm:$0xff]  ;;  %v4101_v13 = vld [vmem:[#allocation3 + $0xf80] sm:$0xff] }
 0x747   :  { %4291 = vmatprep.subr.bf16.mxu0 %v4014_v17  ;;  %4455 = vmatprep.subr.bf16.mxu1 %v4016_v18  ;;  %v4103_v17 = vld [vmem:[#allocation3 + $0xf90] sm:$0xff]  ;;  %v4110_v18 = vld [vmem:[#allocation3 + $0xfc8] sm:$0xff] }
 0x74a   :  { %4292 = vmatpush1.bf16.msra.mxu0 %v4013_v19  ;;  %4456 = vmatpush1.bf16.msra.mxu1 %v4015_v20  ;;  %v4112_v19 = vld [vmem:[#allocation3 + $0xfd8] sm:$0xff]  ;;  %v4109_v20 = vld [vmem:[#allocation3 + $0xfc0] sm:$0xff] }
 0x74b   :  { %4293 = vmatprep.subr.bf16.mxu0 %v4022_v24  ;;  %4457 = vmatprep.subr.bf16.mxu1 %v4024_v29  ;;  %v4111_v24 = vld [vmem:[#allocation3 + $0xfd0] sm:$0xff]  ;;  %v3610_v29 = vld [vmem:[#allocation3 + $0x28] sm:$0xff] }
 0x74e   :  { %4294 = vmatpush1.bf16.msra.mxu0 %v4021_v15  ;;  %4458 = vmatpush1.bf16.msra.mxu1 %v4023_v25  ;;  %v3612_v15 = vld [vmem:[#allocation3 + $0x38] sm:$0xff]  ;;  %v6801_v25 = vpack.c.bf16 %v6753_v22, %v6753_v22  ;;  %v3626_v22 = vld [vmem:[#allocation3 + $0xa8] sm:$0xff] }
 0x74f   :  { %4295 = vmatprep.subr.bf16.mxu0 %v4030_v36  ;;  %4459 = vmatprep.subr.bf16.mxu1 %v4032_v37  ;;  %v3609_v36 = vld [vmem:[#allocation3 + $0x20] sm:$0xff]  ;;  %v3611_v37 = vld [vmem:[#allocation3 + $0x30] sm:$0xff] }
 0x752   :  { %4296 = vmatpush1.bf16.msra.mxu0 %v4029_v38  ;;  %4460 = vmatpush1.bf16.msra.mxu1 %v4031_v30  ;;  %v3618_v38 = vld [vmem:[#allocation3 + $0x68] sm:$0xff]  ;;  %v3620_v30 = vld [vmem:[#allocation3 + $0x78] sm:$0xff] }
 0x753   :  { %4297 = vmatprep.subr.bf16.mxu0 %v4038_v39  ;;  %4461 = vmatprep.subr.bf16.mxu1 %v4040_v42  ;;  %v3617_v39 = vld [vmem:[#allocation3 + $0x60] sm:$0xff]  ;;  %v3619_v42 = vld [vmem:[#allocation3 + $0x70] sm:$0xff] }
 0x756   :  { %4298 = vmatpush1.bf16.msra.mxu0 %v4037_v44  ;;  %4462 = vmatpush1.bf16.msra.mxu1 %v4039_v11  ;;  %v3628_v44 = vld [vmem:[#allocation3 + $0xb8] sm:$0xff]  ;;  %v3625_v11 = vld [vmem:[#allocation3 + $0xa0] sm:$0xff] }
 0x757   :  { %4299 = vmatprep.subr.bf16.mxu0 %v4046_v47  ;;  %4463 = vmatprep.subr.bf16.mxu1 %v4048_v49  ;;  %v3627_v47 = vld [vmem:[#allocation3 + $0xb0] sm:$0xff]  ;;  %v3634_v49 = vld [vmem:[#allocation3 + $0xe8] sm:$0xff] }
 0x75a   :  { %4300 = vmatpush1.bf16.msra.mxu0 %v4045_v51  ;;  %4464 = vmatpush1.bf16.msra.mxu1 %v4047_v53  ;;  %v3636_v51 = vld [vmem:[#allocation3 + $0xf8] sm:$0xff]  ;;  %v3633_v53 = vld [vmem:[#allocation3 + $0xe0] sm:$0xff] }
 0x75b   :  { %4301 = vmatprep.subr.bf16.mxu0 %v4054_v56  ;;  %4465 = vmatprep.subr.bf16.mxu1 %v4056_v21  ;;  %v3635_v56 = vld [vmem:[#allocation3 + $0xf0] sm:$0xff]  ;;  %v3642_v21 = vld [vmem:[#allocation3 + $0x128] sm:$0xff] }
 0x75e   :  { %4302 = vmatpush1.bf16.msra.mxu0 %v4053_v59  ;;  %4466 = vmatpush1.bf16.msra.mxu1 %v4055_v26  ;;  %v3644_v59 = vld [vmem:[#allocation3 + $0x138] sm:$0xff]  ;;  %v3643_v26 = vld [vmem:[#allocation3 + $0x130] sm:$0xff] }
 0x75f   :  { %4303 = vmatprep.subr.bf16.mxu0 %v4062_v28  ;;  %4467 = vmatprep.subr.bf16.mxu1 %v4064_v27  ;;  %v3650_v28 = vld [vmem:[#allocation3 + $0x168] sm:$0xff]  ;;  %v3652_v27 = vld [vmem:[#allocation3 + $0x178] sm:$0xff] }
 0x762   :  { %4304 = vmatpush1.bf16.msra.mxu0 %v4061_v60  ;;  %4468 = vmatpush1.bf16.msra.mxu1 %v4063_v61  ;;  %v3649_v60 = vld [vmem:[#allocation3 + $0x160] sm:$0xff]  ;;  %v3651_v61 = vld [vmem:[#allocation3 + $0x170] sm:$0xff] }
 0x763   :  { %4305 = vmatprep.subr.bf16.mxu0 %v4070_v48  ;;  %4469 = vmatprep.subr.bf16.mxu1 %v4072_v62  ;;  %v3658_v48 = vld [vmem:[#allocation3 + $0x1a8] sm:$0xff]  ;;  %v3660_v62 = vld [vmem:[#allocation3 + $0x1b8] sm:$0xff] }
 0x766   :  { %4306 = vmatpush1.bf16.msra.mxu0 %v4069_v12  ;;  %4470 = vmatpush1.bf16.msra.mxu1 %v4071_v40  ;;  %v3657_v12 = vld [vmem:[#allocation3 + $0x1a0] sm:$0xff]  ;;  %v3659_v40 = vld [vmem:[#allocation3 + $0x1b0] sm:$0xff] }
 0x767   :  { %4307 = vmatprep.subr.bf16.mxu0 %v4078_v1  ;;  %4471 = vmatprep.subr.bf16.mxu1 %v4080_v41  ;;  %v3666_v1 = vld [vmem:[#allocation3 + $0x1e8] sm:$0xff]  ;;  %v3668_v41 = vld [vmem:[#allocation3 + $0x1f8] sm:$0xff] }
 0x76a   :  { %4308 = vmatpush1.bf16.msra.mxu0 %v4077_v2  ;;  %4472 = vmatpush1.bf16.msra.mxu1 %v4079_v45  ;;  %v3665_v2 = vld [vmem:[#allocation3 + $0x1e0] sm:$0xff]  ;;  %v3667_v45 = vld [vmem:[#allocation3 + $0x1f0] sm:$0xff] }
 0x76b   :  { %4309 = vmatprep.subr.bf16.mxu0 %v4086_v3  ;;  %4473 = vmatprep.subr.bf16.mxu1 %v4088_v58  ;;  %v3674_v3 = vld [vmem:[#allocation3 + $0x228] sm:$0xff]  ;;  %v3676_v58 = vld [vmem:[#allocation3 + $0x238] sm:$0xff] }
 0x76e   :  { %4310 = vmatpush1.bf16.msra.mxu0 %v4085_v4  ;;  %4474 = vmatpush1.bf16.msra.mxu1 %v4087_v5  ;;  %v3673_v4 = vld [vmem:[#allocation3 + $0x220] sm:$0xff]  ;;  %v3675_v5 = vld [vmem:[#allocation3 + $0x230] sm:$0xff] }
 0x76f   :  { %4311 = vmatprep.subr.bf16.mxu0 %v4094_v57  ;;  %4475 = vmatprep.subr.bf16.mxu1 %v4096_v55  ;;  %v3682_v57 = vld [vmem:[#allocation3 + $0x268] sm:$0xff]  ;;  %v3684_v55 = vld [vmem:[#allocation3 + $0x278] sm:$0xff] }
 0x772   :  { %4312 = vmatpush1.bf16.msra.mxu0 %v4093_v7  ;;  %4476 = vmatpush1.bf16.msra.mxu1 %v4095_v9  ;;  %v3681_v7 = vld [vmem:[#allocation3 + $0x260] sm:$0xff]  ;;  %v3683_v9 = vld [vmem:[#allocation3 + $0x270] sm:$0xff] }
 0x773   :  { %4313 = vmatprep.subr.bf16.mxu0 %v4102_v10  ;;  %4477 = vmatprep.subr.bf16.mxu1 %v4104_v63  ;;  %v3690_v10 = vld [vmem:[#allocation3 + $0x2a8] sm:$0xff]  ;;  %v3692_v63 = vld [vmem:[#allocation3 + $0x2b8] sm:$0xff] }
 0x776   :  { %4314 = vmatpush1.bf16.msra.mxu0 %v4101_v13  ;;  %4478 = vmatpush1.bf16.msra.mxu1 %v4103_v17  ;;  %v3689_v13 = vld [vmem:[#allocation3 + $0x2a0] sm:$0xff]  ;;  %v3691_v17 = vld [vmem:[#allocation3 + $0x2b0] sm:$0xff] }
 0x777   :  { %4315 = vmatprep.subr.bf16.mxu0 %v4110_v18  ;;  %4479 = vmatprep.subr.bf16.mxu1 %v4112_v19  ;;  %v3698_v18 = vld [vmem:[#allocation3 + $0x2e8] sm:$0xff]  ;;  %v3700_v19 = vld [vmem:[#allocation3 + $0x2f8] sm:$0xff] }
 0x77a   :  { %4316 = vmatpush1.bf16.msra.mxu0 %v4109_v20  ;;  %4480 = vmatpush1.bf16.msra.mxu1 %v4111_v24  ;;  %v3697_v20 = vld [vmem:[#allocation3 + $0x2e0] sm:$0xff]  ;;  %v3699_v24 = vld [vmem:[#allocation3 + $0x2f0] sm:$0xff] }
 0x77b   :  { %4490 = vmatprep.subr.bf16.mxu0 %v3610_v29  ;;  %4654 = vmatprep.subr.bf16.mxu1 %v3612_v15  ;;  %v3706_v29 = vld [vmem:[#allocation3 + $0x328] sm:$0xff]  ;;  %v3708_v15 = vld [vmem:[#allocation3 + $0x338] sm:$0xff] }
 0x77d   :  { %4318 = vmatmul.mubr.bf16.vlgmr.msra.gmra.mrb[44].mxu0 %v6801_v25  ;;  %4482 = vmatmul.mubr.bf16.vlgmr.msra.gmra.mrb[40].mxu1 %v6801_v25 }
 0x77e   :  { %4491 = vmatpush1.bf16.msra.mxu0 %v3609_v36  ;;  %4655 = vmatpush1.bf16.msra.mxu1 %v3611_v37  ;;  %v3705_v36 = vld [vmem:[#allocation3 + $0x320] sm:$0xff]  ;;  %v3707_v37 = vld [vmem:[#allocation3 + $0x330] sm:$0xff] }
 0x77f   :  { %4492 = vmatprep.subr.bf16.mxu0 %v3618_v38  ;;  %4656 = vmatprep.subr.bf16.mxu1 %v3620_v30  ;;  %v3714_v38 = vld [vmem:[#allocation3 + $0x368] sm:$0xff]  ;;  %v3716_v30 = vld [vmem:[#allocation3 + $0x378] sm:$0xff] }
 0x780   :  { %4522 = vmatprep.mubr.bf16.mxu0 %v6759_v0  ;;  %4686 = vmatprep.mubr.bf16.mxu1 %v6759_v0  ;;  %v3641_v0 = vld [vmem:[#allocation3 + $0x120] sm:$0xff] }
 0x782   :  { %4493 = vmatpush1.bf16.msra.mxu0 %v3617_v39  ;;  %4657 = vmatpush1.bf16.msra.mxu1 %v3619_v42  ;;  %v3713_v39 = vld [vmem:[#allocation3 + $0x360] sm:$0xff]  ;;  %v3715_v42 = vld [vmem:[#allocation3 + $0x370] sm:$0xff] }
 0x783   :  { %4494 = vmatprep.subr.bf16.mxu0 %v3626_v22  ;;  %4658 = vmatprep.subr.bf16.mxu1 %v3628_v44  ;;  %v3722_v22 = vld [vmem:[#allocation3 + $0x3a8] sm:$0xff]  ;;  %v3724_v44 = vld [vmem:[#allocation3 + $0x3b8] sm:$0xff] }
 0x786   :  { %4495 = vmatpush1.bf16.msra.mxu0 %v3625_v11  ;;  %4659 = vmatpush1.bf16.msra.mxu1 %v3627_v47  ;;  %v3721_v11 = vld [vmem:[#allocation3 + $0x3a0] sm:$0xff]  ;;  %v3723_v47 = vld [vmem:[#allocation3 + $0x3b0] sm:$0xff] }
 0x787   :  { %4496 = vmatprep.subr.bf16.mxu0 %v3634_v49  ;;  %4660 = vmatprep.subr.bf16.mxu1 %v3636_v51  ;;  %v3730_v49 = vld [vmem:[#allocation3 + $0x3e8] sm:$0xff]  ;;  %v3732_v51 = vld [vmem:[#allocation3 + $0x3f8] sm:$0xff] }
 0x78a   :  { %4497 = vmatpush1.bf16.msra.mxu0 %v3633_v53  ;;  %4661 = vmatpush1.bf16.msra.mxu1 %v3635_v56  ;;  %v3729_v53 = vld [vmem:[#allocation3 + $0x3e0] sm:$0xff]  ;;  %v3731_v56 = vld [vmem:[#allocation3 + $0x3f0] sm:$0xff] }
 0x78b   :  { %4498 = vmatprep.subr.bf16.mxu0 %v3642_v21  ;;  %4662 = vmatprep.subr.bf16.mxu1 %v3644_v59  ;;  %v3738_v21 = vld [vmem:[#allocation3 + $0x428] sm:$0xff]  ;;  %v3740_v59 = vld [vmem:[#allocation3 + $0x438] sm:$0xff] }
 0x78e   :  { %4499 = vmatpush1.bf16.msra.mxu0 %v3641_v0  ;;  %4663 = vmatpush1.bf16.msra.mxu1 %v3643_v26  ;;  %v3737_v0 = vld [vmem:[#allocation3 + $0x420] sm:$0xff]  ;;  %v3739_v26 = vld [vmem:[#allocation3 + $0x430] sm:$0xff] }
 0x78f   :  { %4500 = vmatprep.subr.bf16.mxu0 %v3650_v28  ;;  %4664 = vmatprep.subr.bf16.mxu1 %v3652_v27  ;;  %v3746_v28 = vld [vmem:[#allocation3 + $0x468] sm:$0xff]  ;;  %v3748_v27 = vld [vmem:[#allocation3 + $0x478] sm:$0xff] }
 0x792   :  { %4501 = vmatpush1.bf16.msra.mxu0 %v3649_v60  ;;  %4665 = vmatpush1.bf16.msra.mxu1 %v3651_v61  ;;  %v3745_v60 = vld [vmem:[#allocation3 + $0x460] sm:$0xff]  ;;  %v3747_v61 = vld [vmem:[#allocation3 + $0x470] sm:$0xff] }
 0x793   :  { %4502 = vmatprep.subr.bf16.mxu0 %v3658_v48  ;;  %4666 = vmatprep.subr.bf16.mxu1 %v3660_v62  ;;  %v3754_v48 = vld [vmem:[#allocation3 + $0x4a8] sm:$0xff]  ;;  %v3756_v62 = vld [vmem:[#allocation3 + $0x4b8] sm:$0xff] }
 0x796   :  { %4503 = vmatpush1.bf16.msra.mxu0 %v3657_v12  ;;  %4667 = vmatpush1.bf16.msra.mxu1 %v3659_v40  ;;  %v3753_v12 = vld [vmem:[#allocation3 + $0x4a0] sm:$0xff]  ;;  %v3755_v40 = vld [vmem:[#allocation3 + $0x4b0] sm:$0xff] }
 0x797   :  { %4504 = vmatprep.subr.bf16.mxu0 %v3666_v1  ;;  %4668 = vmatprep.subr.bf16.mxu1 %v3668_v41  ;;  %v3762_v1 = vld [vmem:[#allocation3 + $0x4e8] sm:$0xff]  ;;  %v3761_v41 = vld [vmem:[#allocation3 + $0x4e0] sm:$0xff] }
 0x79a   :  { %4505 = vmatpush1.bf16.msra.mxu0 %v3665_v2  ;;  %4669 = vmatpush1.bf16.msra.mxu1 %v3667_v45  ;;  %v3763_v2 = vld [vmem:[#allocation3 + $0x4f0] sm:$0xff]  ;;  %v3770_v45 = vld [vmem:[#allocation3 + $0x528] sm:$0xff] }
 0x79b   :  { %4506 = vmatprep.subr.bf16.mxu0 %v3674_v3  ;;  %4670 = vmatprep.subr.bf16.mxu1 %v3676_v58  ;;  %v3772_v3 = vld [vmem:[#allocation3 + $0x538] sm:$0xff]  ;;  %v3771_v58 = vld [vmem:[#allocation3 + $0x530] sm:$0xff] }
 0x79e   :  { %4507 = vmatpush1.bf16.msra.mxu0 %v3673_v4  ;;  %4671 = vmatpush1.bf16.msra.mxu1 %v3675_v5  ;;  %v3778_v4 = vld [vmem:[#allocation3 + $0x568] sm:$0xff]  ;;  %v3780_v5 = vld [vmem:[#allocation3 + $0x578] sm:$0xff] }
 0x79f   :  { %4508 = vmatprep.subr.bf16.mxu0 %v3682_v57  ;;  %4672 = vmatprep.subr.bf16.mxu1 %v3684_v55  ;;  %v3777_v57 = vld [vmem:[#allocation3 + $0x560] sm:$0xff]  ;;  %v3779_v55 = vld [vmem:[#allocation3 + $0x570] sm:$0xff] }
 0x7a2   :  { %4509 = vmatpush1.bf16.msra.mxu0 %v3681_v7  ;;  %4673 = vmatpush1.bf16.msra.mxu1 %v3683_v9  ;;  %v3786_v7 = vld [vmem:[#allocation3 + $0x5a8] sm:$0xff]  ;;  %v3788_v9 = vld [vmem:[#allocation3 + $0x5b8] sm:$0xff] }
 0x7a3   :  { %4510 = vmatprep.subr.bf16.mxu0 %v3690_v10  ;;  %4674 = vmatprep.subr.bf16.mxu1 %v3692_v63  ;;  %v3785_v10 = vld [vmem:[#allocation3 + $0x5a0] sm:$0xff]  ;;  %v3787_v63 = vld [vmem:[#allocation3 + $0x5b0] sm:$0xff] }
 0x7a6   :  { %4511 = vmatpush1.bf16.msra.mxu0 %v3689_v13  ;;  %4675 = vmatpush1.bf16.msra.mxu1 %v3691_v17  ;;  %v3794_v13 = vld [vmem:[#allocation3 + $0x5e8] sm:$0xff]  ;;  %v3796_v17 = vld [vmem:[#allocation3 + $0x5f8] sm:$0xff] }
 0x7a7   :  { %4512 = vmatprep.subr.bf16.mxu0 %v3698_v18  ;;  %4676 = vmatprep.subr.bf16.mxu1 %v3700_v19  ;;  %v3793_v18 = vld [vmem:[#allocation3 + $0x5e0] sm:$0xff]  ;;  %v3795_v19 = vld [vmem:[#allocation3 + $0x5f0] sm:$0xff] }
 0x7aa   :  { %4513 = vmatpush1.bf16.msra.mxu0 %v3697_v20  ;;  %4677 = vmatpush1.bf16.msra.mxu1 %v3699_v24  ;;  %v3802_v20 = vld [vmem:[#allocation3 + $0x628] sm:$0xff]  ;;  %v3804_v24 = vld [vmem:[#allocation3 + $0x638] sm:$0xff] }
 0x7ab   :  { %4514 = vmatprep.subr.bf16.mxu0 %v3706_v29  ;;  %4678 = vmatprep.subr.bf16.mxu1 %v3708_v15  ;;  %v3801_v29 = vld [vmem:[#allocation3 + $0x620] sm:$0xff]  ;;  %v3803_v15 = vld [vmem:[#allocation3 + $0x630] sm:$0xff] }
 0x7ae   :  { %4515 = vmatpush1.bf16.msra.mxu0 %v3705_v36  ;;  %4679 = vmatpush1.bf16.msra.mxu1 %v3707_v37  ;;  %v3810_v36 = vld [vmem:[#allocation3 + $0x668] sm:$0xff]  ;;  %v3812_v37 = vld [vmem:[#allocation3 + $0x678] sm:$0xff] }
 0x7af   :  { %4516 = vmatprep.subr.bf16.mxu0 %v3714_v38  ;;  %4680 = vmatprep.subr.bf16.mxu1 %v3716_v30  ;;  %v3809_v38 = vld [vmem:[#allocation3 + $0x660] sm:$0xff]  ;;  %v3811_v30 = vld [vmem:[#allocation3 + $0x670] sm:$0xff] }
 0x7b2   :  { %4517 = vmatpush1.bf16.msra.mxu0 %v3713_v39  ;;  %4681 = vmatpush1.bf16.msra.mxu1 %v3715_v42  ;;  %v3818_v39 = vld [vmem:[#allocation3 + $0x6a8] sm:$0xff]  ;;  %v3820_v42 = vld [vmem:[#allocation3 + $0x6b8] sm:$0xff] }
 0x7b3   :  { %4518 = vmatprep.subr.bf16.mxu0 %v3722_v22  ;;  %4682 = vmatprep.subr.bf16.mxu1 %v3724_v44  ;;  %v3817_v22 = vld [vmem:[#allocation3 + $0x6a0] sm:$0xff]  ;;  %v3819_v44 = vld [vmem:[#allocation3 + $0x6b0] sm:$0xff] }
 0x7b6   :  { %4519 = vmatpush1.bf16.msra.mxu0 %v3721_v11  ;;  %4683 = vmatpush1.bf16.msra.mxu1 %v3723_v47  ;;  %v3826_v11 = vld [vmem:[#allocation3 + $0x6e8] sm:$0xff]  ;;  %v3828_v47 = vld [vmem:[#allocation3 + $0x6f8] sm:$0xff] }
 0x7b7   :  { %4520 = vmatprep.subr.bf16.mxu0 %v3730_v49  ;;  %4684 = vmatprep.subr.bf16.mxu1 %v3732_v51  ;;  %v3825_v49 = vld [vmem:[#allocation3 + $0x6e0] sm:$0xff]  ;;  %v3827_v51 = vld [vmem:[#allocation3 + $0x6f0] sm:$0xff] }
 0x7ba   :  { %4521 = vmatpush1.bf16.msra.mxu0 %v3729_v53  ;;  %4685 = vmatpush1.bf16.msra.mxu1 %v3731_v56  ;;  %v3834_v53 = vld [vmem:[#allocation3 + $0x728] sm:$0xff]  ;;  %v3836_v56 = vld [vmem:[#allocation3 + $0x738] sm:$0xff] }
 0x7bb   :  { %4531 = vmatprep.subr.bf16.mxu0 %v3738_v21  ;;  %4695 = vmatprep.subr.bf16.mxu1 %v3740_v59  ;;  %v3833_v21 = vld [vmem:[#allocation3 + $0x720] sm:$0xff]  ;;  %v3835_v59 = vld [vmem:[#allocation3 + $0x730] sm:$0xff] }
 0x7bd   :  { %4523 = vmatmul.mubr.bf16.vlgmr.msra.gmra.mrb[48].mxu0 %v6765_v16  ;;  %4687 = vmatmul.mubr.bf16.vlgmr.msra.gmra.mrb[44].mxu1 %v6765_v16  ;;  %v3764_v16 = vld [vmem:[#allocation3 + $0x4f8] sm:$0xff] }
 0x7be   :  { %4532 = vmatpush1.bf16.msra.mxu0 %v3737_v0  ;;  %4696 = vmatpush1.bf16.msra.mxu1 %v3739_v26  ;;  %v3842_v0 = vld [vmem:[#allocation3 + $0x768] sm:$0xff]  ;;  %v3844_v26 = vld [vmem:[#allocation3 + $0x778] sm:$0xff] }
 0x7bf   :  { %4533 = vmatprep.subr.bf16.mxu0 %v3746_v28  ;;  %4697 = vmatprep.subr.bf16.mxu1 %v3748_v27  ;;  %v3841_v28 = vld [vmem:[#allocation3 + $0x760] sm:$0xff]  ;;  %v3843_v27 = vld [vmem:[#allocation3 + $0x770] sm:$0xff] }
 0x7c0   :  { %4563 = vmatprep.mubr.bf16.mxu0 %v6769_v35  ;;  %4727 = vmatprep.mubr.bf16.mxu1 %v6769_v35  ;;  %v3769_v35 = vld [vmem:[#allocation3 + $0x520] sm:$0xff] }
 0x7c2   :  { %4534 = vmatpush1.bf16.msra.mxu0 %v3745_v60  ;;  %4698 = vmatpush1.bf16.msra.mxu1 %v3747_v61  ;;  %v3850_v60 = vld [vmem:[#allocation3 + $0x7a8] sm:$0xff]  ;;  %v3852_v61 = vld [vmem:[#allocation3 + $0x7b8] sm:$0xff] }
 0x7c3   :  { %4535 = vmatprep.subr.bf16.mxu0 %v3754_v48  ;;  %4699 = vmatprep.subr.bf16.mxu1 %v3756_v62  ;;  %v3849_v48 = vld [vmem:[#allocation3 + $0x7a0] sm:$0xff]  ;;  %v3851_v62 = vld [vmem:[#allocation3 + $0x7b0] sm:$0xff] }
 0x7c6   :  { %4536 = vmatpush1.bf16.msra.mxu0 %v3753_v12  ;;  %4700 = vmatpush1.bf16.msra.mxu1 %v3755_v40  ;;  %v3858_v12 = vld [vmem:[#allocation3 + $0x7e8] sm:$0xff]  ;;  %v3860_v40 = vld [vmem:[#allocation3 + $0x7f8] sm:$0xff] }
 0x7c7   :  { %4537 = vmatprep.subr.bf16.mxu0 %v3762_v1  ;;  %4701 = vmatprep.subr.bf16.mxu1 %v3764_v16  ;;  %v3857_v1 = vld [vmem:[#allocation3 + $0x7e0] sm:$0xff]  ;;  %v3859_v16 = vld [vmem:[#allocation3 + $0x7f0] sm:$0xff] }
 0x7ca   :  { %4538 = vmatpush1.bf16.msra.mxu0 %v3761_v41  ;;  %4702 = vmatpush1.bf16.msra.mxu1 %v3763_v2  ;;  %v3866_v41 = vld [vmem:[#allocation3 + $0x828] sm:$0xff]  ;;  %v3868_v2 = vld [vmem:[#allocation3 + $0x838] sm:$0xff] }
 0x7cb   :  { %4539 = vmatprep.subr.bf16.mxu0 %v3770_v45  ;;  %4703 = vmatprep.subr.bf16.mxu1 %v3772_v3  ;;  %v3865_v45 = vld [vmem:[#allocation3 + $0x820] sm:$0xff]  ;;  %v3867_v3 = vld [vmem:[#allocation3 + $0x830] sm:$0xff] }
 0x7ce   :  { %4540 = vmatpush1.bf16.msra.mxu0 %v3769_v35  ;;  %4704 = vmatpush1.bf16.msra.mxu1 %v3771_v58  ;;  %v3874_v35 = vld [vmem:[#allocation3 + $0x868] sm:$0xff]  ;;  %v3876_v58 = vld [vmem:[#allocation3 + $0x878] sm:$0xff] }
 0x7cf   :  { %4541 = vmatprep.subr.bf16.mxu0 %v3778_v4  ;;  %4705 = vmatprep.subr.bf16.mxu1 %v3780_v5  ;;  %v3873_v4 = vld [vmem:[#allocation3 + $0x860] sm:$0xff]  ;;  %v3875_v5 = vld [vmem:[#allocation3 + $0x870] sm:$0xff] }
 0x7d2   :  { %4542 = vmatpush1.bf16.msra.mxu0 %v3777_v57  ;;  %4706 = vmatpush1.bf16.msra.mxu1 %v3779_v55  ;;  %v3882_v57 = vld [vmem:[#allocation3 + $0x8a8] sm:$0xff]  ;;  %v3884_v55 = vld [vmem:[#allocation3 + $0x8b8] sm:$0xff] }
 0x7d3   :  { %4543 = vmatprep.subr.bf16.mxu0 %v3786_v7  ;;  %4707 = vmatprep.subr.bf16.mxu1 %v3788_v9  ;;  %v3881_v7 = vld [vmem:[#allocation3 + $0x8a0] sm:$0xff]  ;;  %v3883_v9 = vld [vmem:[#allocation3 + $0x8b0] sm:$0xff] }
 0x7d6   :  { %4544 = vmatpush1.bf16.msra.mxu0 %v3785_v10  ;;  %4708 = vmatpush1.bf16.msra.mxu1 %v3787_v63  ;;  %v3890_v10 = vld [vmem:[#allocation3 + $0x8e8] sm:$0xff]  ;;  %v3889_v63 = vld [vmem:[#allocation3 + $0x8e0] sm:$0xff] }
 0x7d7   :  { %4545 = vmatprep.subr.bf16.mxu0 %v3794_v13  ;;  %4709 = vmatprep.subr.bf16.mxu1 %v3796_v17  ;;  %v3891_v13 = vld [vmem:[#allocation3 + $0x8f0] sm:$0xff]  ;;  %v3898_v17 = vld [vmem:[#allocation3 + $0x928] sm:$0xff] }
 0x7da   :  { %4546 = vmatpush1.bf16.msra.mxu0 %v3793_v18  ;;  %4710 = vmatpush1.bf16.msra.mxu1 %v3795_v19  ;;  %v3900_v18 = vld [vmem:[#allocation3 + $0x938] sm:$0xff]  ;;  %v3899_v19 = vld [vmem:[#allocation3 + $0x930] sm:$0xff] }
 0x7db   :  { %4547 = vmatprep.subr.bf16.mxu0 %v3802_v20  ;;  %4711 = vmatprep.subr.bf16.mxu1 %v3804_v24  ;;  %v3906_v20 = vld [vmem:[#allocation3 + $0x968] sm:$0xff]  ;;  %v3908_v24 = vld [vmem:[#allocation3 + $0x978] sm:$0xff] }
 0x7de   :  { %4548 = vmatpush1.bf16.msra.mxu0 %v3801_v29  ;;  %4712 = vmatpush1.bf16.msra.mxu1 %v3803_v15  ;;  %v3905_v29 = vld [vmem:[#allocation3 + $0x960] sm:$0xff]  ;;  %v3907_v15 = vld [vmem:[#allocation3 + $0x970] sm:$0xff] }
 0x7df   :  { %4549 = vmatprep.subr.bf16.mxu0 %v3810_v36  ;;  %4713 = vmatprep.subr.bf16.mxu1 %v3812_v37  ;;  %v3914_v36 = vld [vmem:[#allocation3 + $0x9a8] sm:$0xff]  ;;  %v3916_v37 = vld [vmem:[#allocation3 + $0x9b8] sm:$0xff] }
 0x7e2   :  { %4550 = vmatpush1.bf16.msra.mxu0 %v3809_v38  ;;  %4714 = vmatpush1.bf16.msra.mxu1 %v3811_v30  ;;  %v3913_v38 = vld [vmem:[#allocation3 + $0x9a0] sm:$0xff]  ;;  %v3915_v30 = vld [vmem:[#allocation3 + $0x9b0] sm:$0xff] }
 0x7e3   :  { %4551 = vmatprep.subr.bf16.mxu0 %v3818_v39  ;;  %4715 = vmatprep.subr.bf16.mxu1 %v3820_v42  ;;  %v3922_v39 = vld [vmem:[#allocation3 + $0x9e8] sm:$0xff]  ;;  %v3924_v42 = vld [vmem:[#allocation3 + $0x9f8] sm:$0xff] }
 0x7e6   :  { %4552 = vmatpush1.bf16.msra.mxu0 %v3817_v22  ;;  %4716 = vmatpush1.bf16.msra.mxu1 %v3819_v44  ;;  %v3921_v22 = vld [vmem:[#allocation3 + $0x9e0] sm:$0xff]  ;;  %v3923_v44 = vld [vmem:[#allocation3 + $0x9f0] sm:$0xff] }
 0x7e7   :  { %4553 = vmatprep.subr.bf16.mxu0 %v3826_v11  ;;  %4717 = vmatprep.subr.bf16.mxu1 %v3828_v47  ;;  %v3930_v11 = vld [vmem:[#allocation3 + $0xa28] sm:$0xff]  ;;  %v3932_v47 = vld [vmem:[#allocation3 + $0xa38] sm:$0xff] }
 0x7ea   :  { %4554 = vmatpush1.bf16.msra.mxu0 %v3825_v49  ;;  %4718 = vmatpush1.bf16.msra.mxu1 %v3827_v51  ;;  %v3929_v49 = vld [vmem:[#allocation3 + $0xa20] sm:$0xff]  ;;  %v3931_v51 = vld [vmem:[#allocation3 + $0xa30] sm:$0xff] }
 0x7eb   :  { %4555 = vmatprep.subr.bf16.mxu0 %v3834_v53  ;;  %4719 = vmatprep.subr.bf16.mxu1 %v3836_v56  ;;  %v3938_v53 = vld [vmem:[#allocation3 + $0xa68] sm:$0xff]  ;;  %v3940_v56 = vld [vmem:[#allocation3 + $0xa78] sm:$0xff] }
 0x7ee   :  { %4556 = vmatpush1.bf16.msra.mxu0 %v3833_v21  ;;  %4720 = vmatpush1.bf16.msra.mxu1 %v3835_v59  ;;  %v3937_v21 = vld [vmem:[#allocation3 + $0xa60] sm:$0xff]  ;;  %v3939_v59 = vld [vmem:[#allocation3 + $0xa70] sm:$0xff] }
 0x7ef   :  { %4557 = vmatprep.subr.bf16.mxu0 %v3842_v0  ;;  %4721 = vmatprep.subr.bf16.mxu1 %v3844_v26  ;;  %v3946_v0 = vld [vmem:[#allocation3 + $0xaa8] sm:$0xff]  ;;  %v3948_v26 = vld [vmem:[#allocation3 + $0xab8] sm:$0xff] }
 0x7f2   :  { %4558 = vmatpush1.bf16.msra.mxu0 %v3841_v28  ;;  %4722 = vmatpush1.bf16.msra.mxu1 %v3843_v27  ;;  %v3945_v28 = vld [vmem:[#allocation3 + $0xaa0] sm:$0xff]  ;;  %v3947_v27 = vld [vmem:[#allocation3 + $0xab0] sm:$0xff] }
 0x7f3   :  { %4559 = vmatprep.subr.bf16.mxu0 %v3850_v60  ;;  %4723 = vmatprep.subr.bf16.mxu1 %v3852_v61  ;;  %v3954_v60 = vld [vmem:[#allocation3 + $0xae8] sm:$0xff]  ;;  %v3956_v61 = vld [vmem:[#allocation3 + $0xaf8] sm:$0xff] }
 0x7f6   :  { %4560 = vmatpush1.bf16.msra.mxu0 %v3849_v48  ;;  %4724 = vmatpush1.bf16.msra.mxu1 %v3851_v62  ;;  %v3953_v48 = vld [vmem:[#allocation3 + $0xae0] sm:$0xff]  ;;  %v3955_v62 = vld [vmem:[#allocation3 + $0xaf0] sm:$0xff] }
 0x7f7   :  { %4561 = vmatprep.subr.bf16.mxu0 %v3858_v12  ;;  %4725 = vmatprep.subr.bf16.mxu1 %v3860_v40  ;;  %v3962_v12 = vld [vmem:[#allocation3 + $0xb28] sm:$0xff]  ;;  %v3964_v40 = vld [vmem:[#allocation3 + $0xb38] sm:$0xff] }
 0x7fa   :  { %4562 = vmatpush1.bf16.msra.mxu0 %v3857_v1  ;;  %4726 = vmatpush1.bf16.msra.mxu1 %v3859_v16  ;;  %v3961_v1 = vld [vmem:[#allocation3 + $0xb20] sm:$0xff]  ;;  %v3963_v16 = vld [vmem:[#allocation3 + $0xb30] sm:$0xff] }
 0x7fb   :  { %4572 = vmatprep.subr.bf16.mxu0 %v3866_v41  ;;  %4736 = vmatprep.subr.bf16.mxu1 %v3868_v2  ;;  %v3970_v41 = vld [vmem:[#allocation3 + $0xb68] sm:$0xff]  ;;  %v3972_v2 = vld [vmem:[#allocation3 + $0xb78] sm:$0xff] }
 0x7fd   :  { %4564 = vmatmul.mubr.bf16.vlgmr.msra.gmra.mrb[48].mxu0 %v6777_v8  ;;  %4728 = vmatmul.mubr.bf16.vlgmr.msra.gmra.mrb[44].mxu1 %v6777_v8  ;;  %v3892_v8 = vld [vmem:[#allocation3 + $0x8f8] sm:$0xff] }
 0x7fe   :  { %4573 = vmatpush1.bf16.msra.mxu0 %v3865_v45  ;;  %4737 = vmatpush1.bf16.msra.mxu1 %v3867_v3  ;;  %v3969_v45 = vld [vmem:[#allocation3 + $0xb60] sm:$0xff]  ;;  %v3971_v3 = vld [vmem:[#allocation3 + $0xb70] sm:$0xff] }
 0x7ff   :  { %4574 = vmatprep.subr.bf16.mxu0 %v3874_v35  ;;  %4738 = vmatprep.subr.bf16.mxu1 %v3876_v58  ;;  %v3978_v35 = vld [vmem:[#allocation3 + $0xba8] sm:$0xff]  ;;  %v3980_v58 = vld [vmem:[#allocation3 + $0xbb8] sm:$0xff] }
 0x800   :  { %4604 = vmatprep.mubr.bf16.mxu0 %v6781_v14  ;;  %4768 = vmatprep.mubr.bf16.mxu1 %v6781_v14  ;;  %v3897_v14 = vld [vmem:[#allocation3 + $0x920] sm:$0xff] }
 0x802   :  { %4575 = vmatpush1.bf16.msra.mxu0 %v3873_v4  ;;  %4739 = vmatpush1.bf16.msra.mxu1 %v3875_v5  ;;  %v3977_v4 = vld [vmem:[#allocation3 + $0xba0] sm:$0xff]  ;;  %v3979_v5 = vld [vmem:[#allocation3 + $0xbb0] sm:$0xff] }
 0x803   :  { %4576 = vmatprep.subr.bf16.mxu0 %v3882_v57  ;;  %4740 = vmatprep.subr.bf16.mxu1 %v3884_v55  ;;  %v3986_v57 = vld [vmem:[#allocation3 + $0xbe8] sm:$0xff]  ;;  %v3988_v55 = vld [vmem:[#allocation3 + $0xbf8] sm:$0xff] }
 0x806   :  { %4577 = vmatpush1.bf16.msra.mxu0 %v3881_v7  ;;  %4741 = vmatpush1.bf16.msra.mxu1 %v3883_v9  ;;  %v3985_v7 = vld [vmem:[#allocation3 + $0xbe0] sm:$0xff]  ;;  %v3987_v9 = vld [vmem:[#allocation3 + $0xbf0] sm:$0xff] }
 0x807   :  { %4578 = vmatprep.subr.bf16.mxu0 %v3890_v10  ;;  %4742 = vmatprep.subr.bf16.mxu1 %v3892_v8  ;;  %v3994_v10 = vld [vmem:[#allocation3 + $0xc28] sm:$0xff]  ;;  %v3996_v8 = vld [vmem:[#allocation3 + $0xc38] sm:$0xff] }
 0x80a   :  { %4579 = vmatpush1.bf16.msra.mxu0 %v3889_v63  ;;  %4743 = vmatpush1.bf16.msra.mxu1 %v3891_v13  ;;  %v3993_v63 = vld [vmem:[#allocation3 + $0xc20] sm:$0xff]  ;;  %v3995_v13 = vld [vmem:[#allocation3 + $0xc30] sm:$0xff] }
 0x80b   :  { %4580 = vmatprep.subr.bf16.mxu0 %v3898_v17  ;;  %4744 = vmatprep.subr.bf16.mxu1 %v3900_v18  ;;  %v4002_v17 = vld [vmem:[#allocation3 + $0xc68] sm:$0xff]  ;;  %v4004_v18 = vld [vmem:[#allocation3 + $0xc78] sm:$0xff] }
 0x80e   :  { %4581 = vmatpush1.bf16.msra.mxu0 %v3897_v14  ;;  %4745 = vmatpush1.bf16.msra.mxu1 %v3899_v19  ;;  %v4001_v14 = vld [vmem:[#allocation3 + $0xc60] sm:$0xff]  ;;  %v4003_v19 = vld [vmem:[#allocation3 + $0xc70] sm:$0xff] }
 0x80f   :  { %4582 = vmatprep.subr.bf16.mxu0 %v3906_v20  ;;  %4746 = vmatprep.subr.bf16.mxu1 %v3908_v24  ;;  %v4010_v20 = vld [vmem:[#allocation3 + $0xca8] sm:$0xff]  ;;  %v4012_v24 = vld [vmem:[#allocation3 + $0xcb8] sm:$0xff] }
 0x812   :  { %4583 = vmatpush1.bf16.msra.mxu0 %v3905_v29  ;;  %4747 = vmatpush1.bf16.msra.mxu1 %v3907_v15  ;;  %v4009_v29 = vld [vmem:[#allocation3 + $0xca0] sm:$0xff]  ;;  %v4011_v15 = vld [vmem:[#allocation3 + $0xcb0] sm:$0xff] }
 0x813   :  { %4584 = vmatprep.subr.bf16.mxu0 %v3914_v36  ;;  %4748 = vmatprep.subr.bf16.mxu1 %v3916_v37  ;;  %v4018_v36 = vld [vmem:[#allocation3 + $0xce8] sm:$0xff] }
 0x814   :  { %v4118_v37 = vld [vmem:[#allocation9 + $0x7] ss:$8 sm:$0xf] }
 0x816   :  { %4585 = vmatpush1.bf16.msra.mxu0 %v3913_v38  ;;  %4749 = vmatpush1.bf16.msra.mxu1 %v3915_v30  ;;  %v4119_v38 = vld [vmem:[#allocation9 + $0x7] ss:$8 sm:$0xf0] }
 0x817   :  { %4586 = vmatprep.subr.bf16.mxu0 %v3922_v39  ;;  %4750 = vmatprep.subr.bf16.mxu1 %v3924_v42  ;;  %v6819_v30 = vld [vmem:[#allocation15] sm:$0xff]  ;;  %v4019_v42 = vld [vmem:[#allocation3 + $0xcf0] sm:$0xff] }
 0x818   :  { %v4017_v39 = vld [vmem:[#allocation3 + $0xce0] sm:$0xff] }
 0x81a   :  { %4587 = vmatpush1.bf16.msra.mxu0 %v3921_v22  ;;  %4751 = vmatpush1.bf16.msra.mxu1 %v3923_v44  ;;  %v4026_v22 = vld [vmem:[#allocation3 + $0xd28] sm:$0xff]  ;;  %v6821_v44 = vor.u32 %v4119_v38, %v4118_v37  ;;  %v4049_v37 = vld [vmem:[#allocation3 + $0xde0] sm:$0xff] }
 0x81b   :  { %4588 = vmatprep.subr.bf16.mxu0 %v3930_v11  ;;  %4752 = vmatprep.subr.bf16.mxu1 %v3932_v47  ;;  %v4844_v11 = vunpack.c.l.bf16 %v6819_v30  ;;  %v4025_v47 = vld [vmem:[#allocation3 + $0xd20] sm:$0xff] }
 0x81e   :  { %4589 = vmatpush1.bf16.msra.mxu0 %v3929_v49  ;;  %4753 = vmatpush1.bf16.msra.mxu1 %v3931_v51  ;;  %v4027_v49 = vld [vmem:[#allocation3 + $0xd30] sm:$0xff]  ;;  %v4034_v51 = vld [vmem:[#allocation3 + $0xd68] sm:$0xff] }
 0x81f   :  { %4590 = vmatprep.subr.bf16.mxu0 %v3938_v53  ;;  %4754 = vmatprep.subr.bf16.mxu1 %v3940_v56  ;;  %v4036_v53 = vld [vmem:[#allocation3 + $0xd78] sm:$0xff]  ;;  %v4125_v56 = vrot.slane %v6821_v44, %v6617_v50 }
 0x822   :  { %4591 = vmatpush1.bf16.msra.mxu0 %v3937_v21  ;;  %4755 = vmatpush1.bf16.msra.mxu1 %v3939_v59  ;;  %v4851_v21 = vrot.slane %v4844_v11, %v6617_v50  ;;  %v4133_v59 = vrot.slane %v6821_v44, %v6630_v23 }
 0x823   :  { %4592 = vmatprep.subr.bf16.mxu0 %v3946_v0  ;;  %4756 = vmatprep.subr.bf16.mxu1 %v3948_v26  ;;  %v4859_v0 = vrot.slane %v4844_v11, %v6738_v31  ;;  %v4129_v26 = vrot.slane %v6821_v44, %v6620_v52 }
 0x825   :  { %v4899_v52 = vrot.slane %v4859_v0, %v6617_v50  ;;  %v4068_v0 = vld [vmem:[#allocation3 + $0xe78] sm:$0xff] }
 0x826   :  { %4593 = vmatpush1.bf16.msra.mxu0 %v3945_v28  ;;  %4757 = vmatpush1.bf16.msra.mxu1 %v3947_v27  ;;  %v4855_v28 = vrot.slane %v4844_v11, %v6630_v23  ;;  %v4137_v27 = vrot.slane %v6821_v44, %v6624_v54 }
 0x827   :  { %4594 = vmatprep.subr.bf16.mxu0 %v3954_v60  ;;  %4758 = vmatprep.subr.bf16.mxu1 %v3956_v61  ;;  %v4033_v60 = vld [vmem:[#allocation3 + $0xd60] sm:$0xff]  ;;  %v4035_v61 = vld [vmem:[#allocation3 + $0xd70] sm:$0xff] }
 0x828   :  { %v4895_v54 = vrot.slane %v4855_v28, %v6617_v50  ;;  %v4065_v28 = vld [vmem:[#allocation3 + $0xe60] sm:$0xff] }
 0x82a   :  { %4595 = vmatpush1.bf16.msra.mxu0 %v3953_v48  ;;  %4759 = vmatpush1.bf16.msra.mxu1 %v3955_v62 }
 0x82b   :  { %4596 = vmatprep.subr.bf16.mxu0 %v3962_v12  ;;  %4760 = vmatprep.subr.bf16.mxu1 %v3964_v40  ;;  %v4863_v12 = vrot.slane %v4844_v11, %v6741_v32  ;;  %v4042_v40 = vld [vmem:[#allocation3 + $0xda8] sm:$0xff]  ;;  %v4060_v11 = vld [vmem:[#allocation3 + $0xe38] sm:$0xff] }
 0x82e   :  { %4597 = vmatpush1.bf16.msra.mxu0 %v3961_v1  ;;  %4761 = vmatpush1.bf16.msra.mxu1 %v3963_v16  ;;  %v4044_v1 = vld [vmem:[#allocation3 + $0xdb8] sm:$0xff] }
 0x82f   :  { %4598 = vmatprep.subr.bf16.mxu0 %v3970_v41  ;;  %4762 = vmatprep.subr.bf16.mxu1 %v3972_v2  ;;  %v4891_v41 = vrot.slane %v4851_v21, %v6617_v50 }
 0x832   :  { %4599 = vmatpush1.bf16.msra.mxu0 %v3969_v45  ;;  %4763 = vmatpush1.bf16.msra.mxu1 %v3971_v3 }
 0x833   :  { %4600 = vmatprep.subr.bf16.mxu0 %v3978_v35  ;;  %4764 = vmatprep.subr.bf16.mxu1 %v3980_v58 }
 0x836   :  { %4601 = vmatpush1.bf16.msra.mxu0 %v3977_v4  ;;  %4765 = vmatpush1.bf16.msra.mxu1 %v3979_v5 }
 0x837   :  { %4602 = vmatprep.subr.bf16.mxu0 %v3986_v57  ;;  %4766 = vmatprep.subr.bf16.mxu1 %v3988_v55  ;;  %v4041_v57 = vld [vmem:[#allocation3 + $0xda0] sm:$0xff]  ;;  %v4043_v55 = vld [vmem:[#allocation3 + $0xdb0] sm:$0xff] }
 0x83a   :  { %4603 = vmatpush1.bf16.msra.mxu0 %v3985_v7  ;;  %4767 = vmatpush1.bf16.msra.mxu1 %v3987_v9  ;;  %v4050_v7 = vld [vmem:[#allocation3 + $0xde8] sm:$0xff] }
 0x83b   :  { %4613 = vmatprep.subr.bf16.mxu0 %v3994_v10  ;;  %4777 = vmatprep.subr.bf16.mxu1 %v3996_v8 }
 0x83d   :  { %4605 = vmatmul.mubr.bf16.vlgmr.msra.gmra.mrb[48].mxu0 %v6789_v46  ;;  %4769 = vmatmul.mubr.bf16.vlgmr.msra.gmra.mrb[44].mxu1 %v6789_v46  ;;  %v4020_v46 = vld [vmem:[#allocation3 + $0xcf8] sm:$0xff] }
 0x83e   :  { %4614 = vmatpush1.bf16.msra.mxu0 %v3993_v63  ;;  %4778 = vmatpush1.bf16.msra.mxu1 %v3995_v13 }
 0x83f   :  { %4615 = vmatprep.subr.bf16.mxu0 %v4002_v17  ;;  %4779 = vmatprep.subr.bf16.mxu1 %v4004_v18  ;;  %v4903_v18 = vrot.slane %v4863_v12, %v6617_v50  ;;  %v4082_v12 = vld [vmem:[#allocation3 + $0xee8] sm:$0xff] }
 0x840   :  { %4645 = vmatprep.mubr.bf16.mxu0 %v6793_v6  ;;  %4809 = vmatprep.mubr.bf16.mxu1 %v6793_v6  ;;  %v4028_v6 = vld [vmem:[#allocation3 + $0xd38] sm:$0xff] }
 0x842   :  { %4616 = vmatpush1.bf16.msra.mxu0 %v4001_v14  ;;  %4780 = vmatpush1.bf16.msra.mxu1 %v4003_v19 }
 0x843   :  { %4617 = vmatprep.subr.bf16.mxu0 %v4010_v20  ;;  %4781 = vmatprep.subr.bf16.mxu1 %v4012_v24  ;;  %v4052_v20 = vld [vmem:[#allocation3 + $0xdf8] sm:$0xff] }
 0x846   :  { %4618 = vmatpush1.bf16.msra.mxu0 %v4009_v29  ;;  %4782 = vmatpush1.bf16.msra.mxu1 %v4011_v15 }
 0x847   :  { %4619 = vmatprep.subr.bf16.mxu0 %v4018_v36  ;;  %4783 = vmatprep.subr.bf16.mxu1 %v4020_v46 }
 0x84a   :  { %4620 = vmatpush1.bf16.msra.mxu0 %v4017_v39  ;;  %4784 = vmatpush1.bf16.msra.mxu1 %v4019_v42  ;;  %v4051_v39 = vld [vmem:[#allocation3 + $0xdf0] sm:$0xff]  ;;  %v4058_v42 = vld [vmem:[#allocation3 + $0xe28] sm:$0xff] }
 0x84b   :  { %4621 = vmatprep.subr.bf16.mxu0 %v4026_v22  ;;  %4785 = vmatprep.subr.bf16.mxu1 %v4028_v6 }
 0x84e   :  { %4622 = vmatpush1.bf16.msra.mxu0 %v4025_v47  ;;  %4786 = vmatpush1.bf16.msra.mxu1 %v4027_v49 }
 0x84f   :  { %4623 = vmatprep.subr.bf16.mxu0 %v4034_v51  ;;  %4787 = vmatprep.subr.bf16.mxu1 %v4036_v53  ;;  %v4057_v51 = vld [vmem:[#allocation3 + $0xe20] sm:$0xff]  ;;  %v4059_v53 = vld [vmem:[#allocation3 + $0xe30] sm:$0xff] }
 0x850   :  { %v4319_v48 = vpop.f32.mrb[44].mxu0  ;;  %v4483_v62 = vpop.f32.mrb[40].mxu1 }
 0x851   :  { %v5337_v16 = vadd.f32 %v4319_v48, %v4125_v56  ;;  %v5339_v2 = vadd.f32 %v4483_v62, %v4133_v59  ;;  %v4321_v45 = vpop.f32.mrb[45].mxu0  ;;  %v4485_v3 = vpop.f32.mrb[41].mxu1  ;;  %v4066_v56 = vld [vmem:[#allocation3 + $0xe68] sm:$0xff]  ;;  %v4073_v48 = vld [vmem:[#allocation3 + $0xea0] sm:$0xff]  ;;  %v4075_v62 = vld [vmem:[#allocation3 + $0xeb0] sm:$0xff] }
 0x852   :  { %v5338_v35 = vadd.f32 %v4321_v45, %v4129_v26  ;;  %v5340_v58 = vadd.f32 %v4485_v3, %v4137_v27  ;;  %v4323_v4 = vpop.f32.mrb[46].mxu0  ;;  %v4487_v5 = vpop.f32.mrb[42].mxu1  ;;  %4624 = vmatpush1.bf16.msra.mxu0 %v4033_v60  ;;  %4788 = vmatpush1.bf16.msra.mxu1 %v4035_v61  ;;  %v4067_v27 = vld [vmem:[#allocation3 + $0xe70] sm:$0xff]  ;;  %v4074_v60 = vld [vmem:[#allocation3 + $0xea8] sm:$0xff]  ;;  %v4076_v61 = vld [vmem:[#allocation3 + $0xeb8] sm:$0xff] }
 0x853   :  { %vm4818_vm13 = vcmp.ge.f32.partialorder %v5337_v16, 0.0  ;;  %v4826_v9 = vmul.f32 0.2, %v5337_v16  ;;  %vm4820_vm14 = vcmp.ge.f32.partialorder %v5339_v2, 0.0  ;;  %v4828_v10 = vmul.f32 0.2, %v5339_v2  ;;  %4625 = vmatprep.subr.bf16.mxu0 %v4042_v40  ;;  %4789 = vmatprep.subr.bf16.mxu1 %v4044_v1 }
 0x854   :  { %vm4819_vm15 = vcmp.ge.f32.partialorder %v5338_v35, 0.0  ;;  %v4827_v8 = vmul.f32 0.2, %v5338_v35  ;;  %vm4821_vm0 = vcmp.ge.f32.partialorder %v5340_v58, 0.0  ;;  %v4829_v63 = vmul.f32 0.2, %v5340_v58 }
 0x855   :  { %v4834_v13 = vsel %vm4818_vm13, %v5337_v16, %v4826_v9  ;;  %v4836_v17 = vsel %vm4820_vm14, %v5339_v2, %v4828_v10  ;;  %v4324_v14 = vpop.f32.mrb[47].mxu0  ;;  %v4488_v19 = vpop.f32.mrb[43].mxu1  ;;  %v4084_v40 = vld [vmem:[#allocation3 + $0xef8] sm:$0xff]  ;;  %v4081_v1 = vld [vmem:[#allocation3 + $0xee0] sm:$0xff]  ;;  %v4083_v16 = vld [vmem:[#allocation3 + $0xef0] sm:$0xff] }
 0x856   :  { %v4920_v24 = vmul.f32 %v4891_v41, %v4834_v13  ;;  %v4835_v29 = vsel %vm4819_vm15, %v5338_v35, %v4827_v8  ;;  %v4837_v15 = vsel %vm4821_vm0, %v5340_v58, %v4829_v63  ;;  %4626 = vmatpush1.bf16.msra.mxu0 %v4041_v57  ;;  %v4922_v36 = vmul.f32 %v4899_v52, %v4836_v17  ;;  %v4090_v41 = vld [vmem:[#allocation3 + $0xf28] sm:$0xff]  ;;  %v4092_v2 = vld [vmem:[#allocation3 + $0xf38] sm:$0xff]  ;;  %v4089_v52 = vld [vmem:[#allocation3 + $0xf20] sm:$0xff] }
 0x857   :  { %v4921_v46 = vmul.f32 %v4895_v54, %v4835_v29  ;;  %4790 = vmatpush1.bf16.msra.mxu1 %v4043_v55  ;;  %4627 = vmatprep.subr.bf16.mxu0 %v4050_v7  ;;  %v4923_v6 = vmul.f32 %v4903_v18, %v4837_v15  ;;  %v4091_v45 = vld [vmem:[#allocation3 + $0xf30] sm:$0xff]  ;;  %v4098_v3 = vld [vmem:[#allocation3 + $0xf68] sm:$0xff]  ;;  %v4100_v35 = vld [vmem:[#allocation3 + $0xf78] sm:$0xff]  ;;  %v4845_v63 = vunpack.c.h.bf16 %v6819_v30  ;;  %v4141_v13 = vrot.slane %v6821_v44, %v6738_v31 }
 0x858   :  { %v4929_v38 = vsel %vm4928_vm1, %v4920_v24, 0.0  ;;  %4791 = vmatprep.subr.bf16.mxu1 %v4052_v20  ;;  %v4932_v49 = vsel %vm4928_vm1, %v4922_v36, 0.0  ;;  %v4097_v54 = vld [vmem:[#allocation3 + $0xf60] sm:$0xff]  ;;  %v4099_v58 = vld [vmem:[#allocation3 + $0xf70] sm:$0xff]  ;;  %v4106_v4 = vld [vmem:[#allocation3 + $0xfa8] sm:$0xff]  ;;  %v4149_v18 = vrot.slane %v6821_v44, %v6741_v32  ;;  %v4145_v14 = vrot.slane %v6821_v44, %v3543_v33 }
 0x859   :  { %v4930_v22 = vsel %vm4928_vm1, %v4921_v46, 0.0  ;;  %v4934_v59 = vsel %vm4928_vm1, %v4923_v6, 0.0  ;;  %v4108_v5 = vld [vmem:[#allocation3 + $0xfb8] sm:$0xff]  ;;  %v4105_v57 = vld [vmem:[#allocation3 + $0xfa0] sm:$0xff]  ;;  %v4107_v55 = vld [vmem:[#allocation3 + $0xfb0] sm:$0xff]  ;;  %v4867_v17 = vrot.slane %v4845_v63, %v6617_v50  ;;  %v4875_v19 = vrot.slane %v4845_v63, %v6738_v31 }
 0x85a   :  { %v4931_v47 = vadd.f32 %v4930_v22, %v4929_v38  ;;  %4628 = vmatpush1.bf16.msra.mxu0 %v4049_v37  ;;  %v4114_v7 = vld [vmem:[#allocation3 + $0xfe8] sm:$0xff]  ;;  %v4116_v9 = vld [vmem:[#allocation3 + $0xff8] sm:$0xff]  ;;  %v4113_v10 = vld [vmem:[#allocation3 + $0xfe0] sm:$0xff]  ;;  %v4871_v20 = vrot.slane %v4845_v63, %v6630_v23  ;;  %v4879_v36 = vrot.slane %v4845_v63, %v6741_v32 }
 0x85b   :  { %4792 = vmatpush1.bf16.msra.mxu1 %v4051_v39  ;;  %4629 = vmatprep.subr.bf16.mxu0 %v4058_v42  ;;  %v4115_v8 = vld [vmem:[#allocation3 + $0xff0] sm:$0xff]  ;;  %v4907_v46 = vrot.slane %v4867_v17, %v6617_v50  ;;  %v4915_v31 = vrot.slane %v4875_v19, %v6617_v50 }
 0x85c   :  { %4793 = vmatprep.subr.bf16.mxu1 %v4060_v11  ;;  %v4933_v21 = vadd.f32 %v4932_v49, %v4931_v47  ;;  %v4911_v43 = vrot.slane %v4871_v20, %v6617_v50 }
 0x85e   :  { %4630 = vmatpush1.bf16.msra.mxu0 %v4057_v51  ;;  %v6844_v26 = vadd.f32 %v4934_v59, %v4933_v21 }
 0x85f   :  { %4794 = vmatpush1.bf16.msra.mxu1 %v4059_v53  ;;  %4631 = vmatprep.subr.bf16.mxu0 %v4066_v56  ;;  %v4919_v56 = vrot.slane %v4879_v36, %v6617_v50 }
 0x860   :  { %4795 = vmatprep.subr.bf16.mxu1 %v4068_v0 }
 0x862   :  { %4632 = vmatpush1.bf16.msra.mxu0 %v4065_v28 }
 0x863   :  { %4796 = vmatpush1.bf16.msra.mxu1 %v4067_v27  ;;  %4633 = vmatprep.subr.bf16.mxu0 %v4074_v60 }
 0x864   :  { %4797 = vmatprep.subr.bf16.mxu1 %v4076_v61 }
 0x866   :  { %4634 = vmatpush1.bf16.msra.mxu0 %v4073_v48 }
 0x867   :  { %4798 = vmatpush1.bf16.msra.mxu1 %v4075_v62  ;;  %4635 = vmatprep.subr.bf16.mxu0 %v4082_v12 }
 0x868   :  { %4799 = vmatprep.subr.bf16.mxu1 %v4084_v40 }
 0x86a   :  { %4636 = vmatpush1.bf16.msra.mxu0 %v4081_v1 }
 0x86b   :  { %4800 = vmatpush1.bf16.msra.mxu1 %v4083_v16  ;;  %4637 = vmatprep.subr.bf16.mxu0 %v4090_v41  ;;  %v4842_v16 = vld [vmem:[#allocation9 + $0x40] ss:$0 sm:$0xff] }
 0x86c   :  { %4801 = vmatprep.subr.bf16.mxu1 %v4092_v2 }
 0x86e   :  { %4638 = vmatpush1.bf16.msra.mxu0 %v4089_v52 }
 0x86f   :  { %4802 = vmatpush1.bf16.msra.mxu1 %v4091_v45  ;;  %4639 = vmatprep.subr.bf16.mxu0 %v4098_v3 }
 0x870   :  { %4803 = vmatprep.subr.bf16.mxu1 %v4100_v35 }
 0x872   :  { %4640 = vmatpush1.bf16.msra.mxu0 %v4097_v54 }
 0x873   :  { %4804 = vmatpush1.bf16.msra.mxu1 %v4099_v58  ;;  %4641 = vmatprep.subr.bf16.mxu0 %v4106_v4 }
 0x874   :  { %4805 = vmatprep.subr.bf16.mxu1 %v4108_v5 }
 0x876   :  { %4642 = vmatpush1.bf16.msra.mxu0 %v4105_v57 }
 0x877   :  { %4806 = vmatpush1.bf16.msra.mxu1 %v4107_v55  ;;  %4643 = vmatprep.subr.bf16.mxu0 %v4114_v7 }
 0x878   :  { %4807 = vmatprep.subr.bf16.mxu1 %v4116_v9 }
 0x87a   :  { %4644 = vmatpush1.bf16.msra.mxu0 %v4113_v10 }
 0x87b   :  { %4808 = vmatpush1.bf16.msra.mxu1 %v4115_v8 }
 0x87d   :  { %4646 = vmatmul.mubr.bf16.vlgmr.msra.gmra.mrb[48].mxu0 %v6801_v25 }
 0x87e   :  { %4810 = vmatmul.mubr.bf16.vlgmr.msra.gmra.mrb[44].mxu1 %v6801_v25  ;;  %v4153_v25 = vrot.slane %v6821_v44, %v3551_v34 }
 0x950   :  { %v4647_v30 = vpop.f32.mrb[48].mxu0 }
 0x951   :  { %v5341_v24 = vadd.f32 %v4647_v30, %v4141_v13  ;;  %v4811_v29 = vpop.f32.mrb[44].mxu1  ;;  %v4649_v15 = vpop.f32.mrb[49].mxu0 }
 0x952   :  { %v5343_v37 = vadd.f32 %v4811_v29, %v4149_v18  ;;  %v5342_v38 = vadd.f32 %v4649_v15, %v4145_v14  ;;  %v4813_v39 = vpop.f32.mrb[45].mxu1  ;;  %v4651_v33 = vpop.f32.mrb[50].mxu0 }
 0x953   :  { %vm4822_vm2 = vcmp.ge.f32.partialorder %v5341_v24, 0.0  ;;  %v4830_v23 = vmul.f32 0.2, %v5341_v24  ;;  %v5344_v42 = vadd.f32 %v4813_v39, %v4153_v25  ;;  %v4815_v34 = vpop.f32.mrb[46].mxu1  ;;  %v4652_v44 = vpop.f32.mrb[51].mxu0 }
 0x954   :  { %vm4824_vm3 = vcmp.ge.f32.partialorder %v5343_v37, 0.0  ;;  %v4832_v22 = vmul.f32 0.2, %v5343_v37  ;;  %vm4823_vm4 = vcmp.ge.f32.partialorder %v5342_v38, 0.0  ;;  %v4831_v6 = vmul.f32 0.2, %v5342_v38 }
 0x955   :  { %v4838_v32 = vsel %vm4822_vm2, %v5341_v24, %v4830_v23  ;;  %vm4825_vm5 = vcmp.ge.f32.partialorder %v5344_v42, 0.0  ;;  %v4833_v11 = vmul.f32 0.2, %v5344_v42  ;;  %v4816_v47 = vpop.f32.mrb[47].mxu1 }
 0x956   :  { %v4924_v49 = vmul.f32 %v4907_v46, %v4838_v32  ;;  %v4840_v51 = vsel %vm4824_vm3, %v5343_v37, %v4832_v22  ;;  %v4839_v53 = vsel %vm4823_vm4, %v5342_v38, %v4831_v6 }
 0x957   :  { %v4925_v21 = vmul.f32 %v4911_v43, %v4839_v53  ;;  %v4841_v59 = vsel %vm4825_vm5, %v5344_v42, %v4833_v11  ;;  %v4926_v0 = vmul.f32 %v4915_v31, %v4840_v51 }
 0x958   :  { %v4936_v28 = vsel %vm4928_vm1, %v4924_v49, 0.0  ;;  %v4927_v61 = vmul.f32 %v4919_v56, %v4841_v59 }
 0x959   :  { %v4937_v27 = vadd.f32 %v4936_v28, %v6844_v26  ;;  %v4938_v60 = vsel %vm4928_vm1, %v4925_v21, 0.0  ;;  %v4940_v62 = vsel %vm4928_vm1, %v4926_v0, 0.0 }
 0x95a   :  { %v4942_v40 = vsel %vm4928_vm1, %v4927_v61, 0.0 }
 0x95b   :  { %v4939_v48 = vadd.f32 %v4938_v60, %v4937_v27 }
 0x95d   :  { %v4941_v12 = vadd.f32 %v4940_v62, %v4939_v48 }
 0x95f   :  { %v4943_v1 = vadd.f32 %v4942_v40, %v4941_v12 }
 0x961   :  { %4944 = vadd.xlane.f32.xlu0 %v4943_v1 }
 0x9ee   :  { %v4945_v50 = vpop.xlane.xlu0 %4944 }
 0x9ef   :  { %v4946_v41 = vadd.f32 %v4945_v50, %v4842_v16 }
 0x9f1   :  { %4948 = vst.msk [vmem:[%s6885_s10] sm:$0x3] %vm4947_vm6, %v4946_v41 }
 0x9f2   :  { %4953 = vsyncpa [#allocation6], 1 }
 0x9f3   :  { %4954 = vsyncpa [#allocation8], 1 }
 0x9f4   :  { %4955 = vsyncpa [#allocation11], 1 }
 0x9f5   :  { %4956 = vsyncpa [#allocation14], 1 }
 0x9f6   :  { %4957 = vsyncmov [#allocation4] }
 0x9f9   :  { %s4958_s7 = vpop.sfrf %4957 }
 0x9fa   :  { %p5329_p0 = scmp.ne.s32.totalorder %s4958_s7, 0 }
 0x9fc   :  { %4962 = shalt.err (%p5329_p0)  }
 0x9fd   :  { %4964 = vsyncmov [#allocation4 + $0x1] }
 0xa00   :  { %s4965_s11 = vpop.sfrf %4964 }
 0xa01   :  { %p5330_p1 = scmp.ne.s32.totalorder %s4965_s11, 0 }
 0xa03   :  { %4969 = shalt.err (%p5330_p1)  }

</bundles_post_ra>
